<compile_context>
chip_gen: v7x
topology: tpu7x:2x2x1
jax: 0.10.0
libtpu: 0.0.40
codegen_flags: <defaults>
</compile_context>

<pallas_src>
from functools import partial

import jax
import jax.numpy as jnp
from jax.experimental import pallas as pl
from jax.experimental.pallas import tpu as pltpu


# ------------------------------ Pallas kernel --------------------------------

def _segmenter_kernel(x_ref, w1_ref, b1_ref, w2_ref, b2_ref, w3_ref, b3_ref,
                      mask_ref, out_ref, buf_ref, *, Wp, LEN, base, store_off):
    """Fused encoder(3x3+ReLU) -> decoder(3x3+ReLU) -> 1x1 head for one image.

    Activations are kept in a flat row-major (PH*Wp, C) layout with a zero
    border; a 3x3 'same' conv is then 9 shifted-window matmuls: the shift for
    tap (kh, kw) is the static flat offset kh*Wp + kw.  Wrap-around columns
    (the Wp - W junk columns per row) are masked to zero so they double as the
    zero padding of the next row.
    """
    f32, bf16 = jnp.float32, jnp.bfloat16

    def conv3x3(src, w_ref):
        # src: (PH*Wp, Cin) f32 flat zero-padded image; w_ref: (9, Cin, Cout)
        acc = None
        for kh in range(3):
            for kw in range(3):
                tap = kh * 3 + kw
                off = base + kh * Wp + kw                 # static python ints
                lhs = src[off:off + LEN, :].astype(bf16)  # (LEN, Cin) bf16
                rhs = w_ref[tap].astype(bf16)             # (Cin, Cout) bf16
                d = jnp.dot(lhs, rhs, preferred_element_type=f32)
                acc = d if acc is None else acc + d
        return acc                                        # (LEN, Cout) f32

    # ---------------- encoder: 3x3 conv + bias + ReLU ----------------
    x_all = x_ref[...]                                    # (PH*Wp, Cin) f32
    y1 = jnp.maximum(conv3x3(x_all, w1_ref) + b1_ref[...], 0.0)
    y1 = y1 * mask_ref[...]                               # zero wrap-around cols

    # Place y1 back into a zero-padded flat image buffer (same geometry as x).
    buf_ref[...] = jnp.zeros_like(buf_ref)
    buf_ref[pl.ds(store_off, LEN), :] = y1                # aligned static store

    # ---------------- decoder: 3x3 conv + bias + ReLU ----------------
    y1_pad = buf_ref[...]                                 # (PH*Wp, ECH) f32
    y2 = jnp.maximum(conv3x3(y1_pad, w2_ref) + b2_ref[...], 0.0)

    # ---------------- 1x1 conv head fused as epilogue ----------------
    out = jnp.dot(y2.astype(bf16), w3_ref[...].astype(bf16),
                  preferred_element_type=f32) + b3_ref[...]
    out_ref[...] = out.astype(out_ref.dtype)


# ------------------------------- forward pass --------------------------------

def segmenter_forward(params, x_nchw):
    N, Cin, H, W = x_nchw.shape
    ECH = params["w1"].shape[-1]
    DCH = params["w2"].shape[-1]
    NC = params["w3"].shape[-1]

    PAD_L = 8                       # left zero-pad columns (keeps store aligned)
    Wp = W + PAD_L                  # padded row width; the conv's right halo
                                    # wraps into the next row's zero left pad
    oi, oj = 1, PAD_L               # image origin inside the padded buffer
    base = (oi - 1) * Wp + (oj - 1)         # first read offset for tap (0, 0)
    store_off = oi * Wp + oj                # where row-major conv output lands
    LEN = H * Wp                            # rows of flat conv output computed
    PH = -(-(base + LEN + 2 * Wp + 2) // Wp)  # rows needed to keep reads in-bounds
    PHWp = PH * Wp

    # Stage the (tiny) input once into the flat zero-padded layout.
    x_nhwc = jnp.transpose(x_nchw, (0, 2, 3, 1)).astype(jnp.float32)
    xbuf = jnp.zeros((N, PH, Wp, Cin), jnp.float32)
    xbuf = xbuf.at[:, oi:oi + H, oj:oj + W, :].set(x_nhwc)
    xflat = xbuf.reshape(N, PHWp, Cin)

    # 0/1 mask of the columns that hold valid conv outputs (c < W).
    mask = (jnp.arange(LEN) % Wp < W).astype(jnp.float32).reshape(LEN, 1)

    w1 = params["w1"].reshape(9, Cin, ECH)
    w2 = params["w2"].reshape(9, ECH, DCH)
    w3 = params["w3"]
    b1 = params["b1"].reshape(1, ECH)
    b2 = params["b2"].reshape(1, DCH)
    b3 = params["b3"].reshape(1, NC)

    flops = 2 * N * LEN * (9 * Cin * ECH + 9 * ECH * DCH + DCH * NC)
    bytes_accessed = 4 * (xflat.size + w1.size + w2.size + w3.size
                          + b1.size + b2.size + b3.size + mask.size
                          + N * LEN * NC)

    kernel = partial(_segmenter_kernel, Wp=Wp, LEN=LEN, base=base,
                     store_off=store_off)

    out_flat = pl.pallas_call(
        kernel,
        out_shape=jax.ShapeDtypeStruct((N, LEN, NC), jnp.float32),
        grid=(N,),
        in_specs=[
            pl.BlockSpec((None, PHWp, Cin), lambda n: (n, 0, 0)),   # x (per image)
            pl.BlockSpec((9, Cin, ECH), lambda n: (0, 0, 0)),       # enc weights
            pl.BlockSpec((1, ECH), lambda n: (0, 0)),               # enc bias
            pl.BlockSpec((9, ECH, DCH), lambda n: (0, 0, 0)),       # dec weights
            pl.BlockSpec((1, DCH), lambda n: (0, 0)),               # dec bias
            pl.BlockSpec((DCH, NC), lambda n: (0, 0)),              # 1x1 head weight
            pl.BlockSpec((1, NC), lambda n: (0, 0)),                # head bias
            pl.BlockSpec((LEN, 1), lambda n: (0, 0)),               # valid-col mask
        ],
        out_specs=pl.BlockSpec((None, LEN, NC), lambda n: (n, 0, 0)),
        scratch_shapes=[pltpu.VMEM((PHWp, ECH), jnp.float32)],
        compiler_params=pltpu.CompilerParams(
            dimension_semantics=("parallel",)),
        cost_estimate=pl.CostEstimate(flops=flops, transcendentals=0,
                                      bytes_accessed=bytes_accessed),
    )(xflat, w1, b1, w2, b2, w3, b3, mask)

    # Trim the wrap-around columns of the tiny head output and return NCHW.
    out = out_flat.reshape(N, H, Wp, NC)[:, :, :W, :]
    return jnp.transpose(out, (0, 3, 1, 2))


# ---------------------------------- params -----------------------------------

def init_params(key, in_ch, enc_ch, dec_ch, num_classes):
    ks = jax.random.split(key, 6)
    return {
        "w1": jax.random.normal(ks[0], (3, 3, in_ch, enc_ch), jnp.float32) * 0.1,
        "b1": jax.random.normal(ks[1], (enc_ch,), jnp.float32) * 0.1,
        "w2": jax.random.normal(ks[2], (3, 3, enc_ch, dec_ch), jnp.float32) * 0.1,
        "b2": jax.random.normal(ks[3], (dec_ch,), jnp.float32) * 0.1,
        "w3": jax.random.normal(ks[4], (dec_ch, num_classes), jnp.float32) * 0.1,
        "b3": jax.random.normal(ks[5], (num_classes,), jnp.float32) * 0.1,
    }


# --------------------------- plain-JAX reference ------------------------------

def _im2col_3x3(x_nhwc):
    n, h, w, c = x_nhwc.shape
    xp = jnp.pad(x_nhwc, ((0, 0), (1, 1), (1, 1), (0, 0)))
    cols = [xp[:, i:i + h, j:j + w, :] for i in range(3) for j in range(3)]
    return jnp.concatenate(cols, axis=-1)


def ref_forward(params, x_nchw):
    """Reference with the same bf16-operand / f32-accumulate numerics."""
    f32, bf16 = jnp.float32, jnp.bfloat16
    n, cin, h, w = x_nchw.shape
    x = jnp.transpose(x_nchw, (0, 2, 3, 1)).astype(f32)

    def conv3x3_relu(t, wgt, b):
        c, co = t.shape[-1], wgt.shape[-1]
        p = _im2col_3x3(t).reshape(-1, 9 * c)
        y = jnp.dot(p.astype(bf16), wgt.reshape(9 * c, co).astype(bf16),
                    preferred_element_type=f32) + b
        return jnp.maximum(y, 0.0).reshape(n, h, w, co)

    y1 = conv3x3_relu(x, params["w1"], params["b1"])
    y2 = conv3x3_relu(y1, params["w2"], params["b2"])
    o = jnp.dot(y2.reshape(-1, y2.shape[-1]).astype(bf16),
                params["w3"].astype(bf16), preferred_element_type=f32)
    o = o + params["b3"]
    return jnp.transpose(o.reshape(n, h, w, -1), (0, 3, 1, 2))


# ----------------------------------- main -------------------------------------

if __name__ == "__main__":
    key = jax.random.PRNGKey(0)
    k_x, k_p = jax.random.split(key)

    N, Cin, H, W = 2, 4, 16, 16
    ECH, DCH, NC = 32, 32, 5

    x = jax.random.normal(k_x, (N, Cin, H, W), jnp.float32)
    params = init_params(k_p, Cin, ECH, DCH, NC)

    fwd = jax.jit(segmenter_forward)
    out = jax.block_until_ready(fwd(params, x))

    assert out.shape == (N, NC, H, W), out.shape
    assert out.dtype == jnp.float32

    ref = jax.block_until_ready(ref_forward(params, x))
    max_err = float(jnp.max(jnp.abs(out - ref)))
    assert jnp.allclose(out, ref, atol=1e-3, rtol=1e-3), max_err

    print("KERNEL_OK")
</pallas_src>

<mosaic_0001>
module attributes {stable_mosaic.version = 11 : i64} {
  func.func @_segmenter_kernel(%arg0: i32, %arg1: memref<1x456x4xf32, #tpu.memory_space<vmem>>, %arg2: memref<9x4x32xf32, #tpu.memory_space<vmem>>, %arg3: memref<1x32xf32, #tpu.memory_space<vmem>>, %arg4: memref<9x32x32xf32, #tpu.memory_space<vmem>>, %arg5: memref<1x32xf32, #tpu.memory_space<vmem>>, %arg6: memref<32x5xf32, #tpu.memory_space<vmem>>, %arg7: memref<1x5xf32, #tpu.memory_space<vmem>>, %arg8: memref<384x1xf32, #tpu.memory_space<vmem>>, %arg9: memref<1x384x5xf32, #tpu.memory_space<vmem>>, %arg10: memref<456x32xf32, #tpu.memory_space<vmem>>) attributes {dimension_semantics = [#tpu.dimension_semantics<parallel>], iteration_bounds = array<i64: 2>, scalar_prefetch = 0 : i64, scratch_operands = 1 : i64, tpu.core_type = #tpu.core_type<tc>, window_params = [{transform_indices = @transform_0, window_bounds = array<i64: 1, 456, 4>}, {pipeline_mode = #tpu.pipeline_mode<synchronous>, transform_indices = @transform_1, window_bounds = array<i64: 9, 4, 32>}, {pipeline_mode = #tpu.pipeline_mode<synchronous>, transform_indices = @transform_2, window_bounds = array<i64: 1, 32>}, {pipeline_mode = #tpu.pipeline_mode<synchronous>, transform_indices = @transform_3, window_bounds = array<i64: 9, 32, 32>}, {pipeline_mode = #tpu.pipeline_mode<synchronous>, transform_indices = @transform_4, window_bounds = array<i64: 1, 32>}, {pipeline_mode = #tpu.pipeline_mode<synchronous>, transform_indices = @transform_5, window_bounds = array<i64: 32, 5>}, {pipeline_mode = #tpu.pipeline_mode<synchronous>, transform_indices = @transform_6, window_bounds = array<i64: 1, 5>}, {pipeline_mode = #tpu.pipeline_mode<synchronous>, transform_indices = @transform_7, window_bounds = array<i64: 384, 1>}, {transform_indices = @transform_8, window_bounds = array<i64: 1, 384, 5>}]} {
    %c0 = arith.constant 0 : index
    %c0_0 = arith.constant 0 : index
    %c0_1 = arith.constant 0 : index
    %0 = vector.load %arg1[%c0, %c0_0, %c0_1] : memref<1x456x4xf32, #tpu.memory_space<vmem>>, vector<1x456x4xf32>
    %1 = vector.shape_cast %0 : vector<1x456x4xf32> to vector<456x4xf32>
    %2 = vector.extract_strided_slice %1 {offsets = [7, 0], sizes = [384, 4], strides = [1, 1]} : vector<456x4xf32> to vector<384x4xf32>
    %3 = arith.truncf %2 : vector<384x4xf32> to vector<384x4xbf16>
    %c0_2 = arith.constant 0 : index
    %c0_3 = arith.constant 0 : index
    %c0_4 = arith.constant 0 : index
    %4 = vector.load %arg2[%c0_2, %c0_3, %c0_4] : memref<9x4x32xf32, #tpu.memory_space<vmem>>, vector<1x4x32xf32>
    %5 = vector.shape_cast %4 : vector<1x4x32xf32> to vector<4x32xf32>
    %6 = arith.truncf %5 : vector<4x32xf32> to vector<4x32xbf16>
    %cst = arith.constant dense<0.000000e+00> : vector<384x32xf32>
    %7 = tpu.matmul %3, %6, %cst {dimension_numbers = #tpu.dot_dimension_numbers<[1], [0], [0], [1], [0, 0, 1, 1], [], []>} : vector<384x4xbf16>, vector<4x32xbf16>, vector<384x32xf32> -> vector<384x32xf32>
    %8 = vector.extract_strided_slice %1 {offsets = [8, 0], sizes = [384, 4], strides = [1, 1]} : vector<456x4xf32> to vector<384x4xf32>
    %9 = arith.truncf %8 : vector<384x4xf32> to vector<384x4xbf16>
    %c1 = arith.constant 1 : index
    %c0_5 = arith.constant 0 : index
    %c0_6 = arith.constant 0 : index
    %10 = vector.load %arg2[%c1, %c0_5, %c0_6] : memref<9x4x32xf32, #tpu.memory_space<vmem>>, vector<1x4x32xf32>
    %11 = vector.shape_cast %10 : vector<1x4x32xf32> to vector<4x32xf32>
    %12 = arith.truncf %11 : vector<4x32xf32> to vector<4x32xbf16>
    %cst_7 = arith.constant dense<0.000000e+00> : vector<384x32xf32>
    %13 = tpu.matmul %9, %12, %cst_7 {dimension_numbers = #tpu.dot_dimension_numbers<[1], [0], [0], [1], [0, 0, 1, 1], [], []>} : vector<384x4xbf16>, vector<4x32xbf16>, vector<384x32xf32> -> vector<384x32xf32>
    %14 = arith.addf %7, %13 : vector<384x32xf32>
    %15 = vector.extract_strided_slice %1 {offsets = [9, 0], sizes = [384, 4], strides = [1, 1]} : vector<456x4xf32> to vector<384x4xf32>
    %16 = arith.truncf %15 : vector<384x4xf32> to vector<384x4xbf16>
    %c2 = arith.constant 2 : index
    %c0_8 = arith.constant 0 : index
    %c0_9 = arith.constant 0 : index
    %17 = vector.load %arg2[%c2, %c0_8, %c0_9] : memref<9x4x32xf32, #tpu.memory_space<vmem>>, vector<1x4x32xf32>
    %18 = vector.shape_cast %17 : vector<1x4x32xf32> to vector<4x32xf32>
    %19 = arith.truncf %18 : vector<4x32xf32> to vector<4x32xbf16>
    %cst_10 = arith.constant dense<0.000000e+00> : vector<384x32xf32>
    %20 = tpu.matmul %16, %19, %cst_10 {dimension_numbers = #tpu.dot_dimension_numbers<[1], [0], [0], [1], [0, 0, 1, 1], [], []>} : vector<384x4xbf16>, vector<4x32xbf16>, vector<384x32xf32> -> vector<384x32xf32>
    %21 = arith.addf %14, %20 : vector<384x32xf32>
    %22 = vector.extract_strided_slice %1 {offsets = [31, 0], sizes = [384, 4], strides = [1, 1]} : vector<456x4xf32> to vector<384x4xf32>
    %23 = arith.truncf %22 : vector<384x4xf32> to vector<384x4xbf16>
    %c3 = arith.constant 3 : index
    %c0_11 = arith.constant 0 : index
    %c0_12 = arith.constant 0 : index
    %24 = vector.load %arg2[%c3, %c0_11, %c0_12] : memref<9x4x32xf32, #tpu.memory_space<vmem>>, vector<1x4x32xf32>
    %25 = vector.shape_cast %24 : vector<1x4x32xf32> to vector<4x32xf32>
    %26 = arith.truncf %25 : vector<4x32xf32> to vector<4x32xbf16>
    %cst_13 = arith.constant dense<0.000000e+00> : vector<384x32xf32>
    %27 = tpu.matmul %23, %26, %cst_13 {dimension_numbers = #tpu.dot_dimension_numbers<[1], [0], [0], [1], [0, 0, 1, 1], [], []>} : vector<384x4xbf16>, vector<4x32xbf16>, vector<384x32xf32> -> vector<384x32xf32>
    %28 = arith.addf %21, %27 : vector<384x32xf32>
    %29 = vector.extract_strided_slice %1 {offsets = [32, 0], sizes = [384, 4], strides = [1, 1]} : vector<456x4xf32> to vector<384x4xf32>
    %30 = arith.truncf %29 : vector<384x4xf32> to vector<384x4xbf16>
    %c4 = arith.constant 4 : index
    %c0_14 = arith.constant 0 : index
    %c0_15 = arith.constant 0 : index
    %31 = vector.load %arg2[%c4, %c0_14, %c0_15] : memref<9x4x32xf32, #tpu.memory_space<vmem>>, vector<1x4x32xf32>
    %32 = vector.shape_cast %31 : vector<1x4x32xf32> to vector<4x32xf32>
    %33 = arith.truncf %32 : vector<4x32xf32> to vector<4x32xbf16>
    %cst_16 = arith.constant dense<0.000000e+00> : vector<384x32xf32>
    %34 = tpu.matmul %30, %33, %cst_16 {dimension_numbers = #tpu.dot_dimension_numbers<[1], [0], [0], [1], [0, 0, 1, 1], [], []>} : vector<384x4xbf16>, vector<4x32xbf16>, vector<384x32xf32> -> vector<384x32xf32>
    %35 = arith.addf %28, %34 : vector<384x32xf32>
    %36 = vector.extract_strided_slice %1 {offsets = [33, 0], sizes = [384, 4], strides = [1, 1]} : vector<456x4xf32> to vector<384x4xf32>
    %37 = arith.truncf %36 : vector<384x4xf32> to vector<384x4xbf16>
    %c5 = arith.constant 5 : index
    %c0_17 = arith.constant 0 : index
    %c0_18 = arith.constant 0 : index
    %38 = vector.load %arg2[%c5, %c0_17, %c0_18] : memref<9x4x32xf32, #tpu.memory_space<vmem>>, vector<1x4x32xf32>
    %39 = vector.shape_cast %38 : vector<1x4x32xf32> to vector<4x32xf32>
    %40 = arith.truncf %39 : vector<4x32xf32> to vector<4x32xbf16>
    %cst_19 = arith.constant dense<0.000000e+00> : vector<384x32xf32>
    %41 = tpu.matmul %37, %40, %cst_19 {dimension_numbers = #tpu.dot_dimension_numbers<[1], [0], [0], [1], [0, 0, 1, 1], [], []>} : vector<384x4xbf16>, vector<4x32xbf16>, vector<384x32xf32> -> vector<384x32xf32>
    %42 = arith.addf %35, %41 : vector<384x32xf32>
    %43 = vector.extract_strided_slice %1 {offsets = [55, 0], sizes = [384, 4], strides = [1, 1]} : vector<456x4xf32> to vector<384x4xf32>
    %44 = arith.truncf %43 : vector<384x4xf32> to vector<384x4xbf16>
    %c6 = arith.constant 6 : index
    %c0_20 = arith.constant 0 : index
    %c0_21 = arith.constant 0 : index
    %45 = vector.load %arg2[%c6, %c0_20, %c0_21] : memref<9x4x32xf32, #tpu.memory_space<vmem>>, vector<1x4x32xf32>
    %46 = vector.shape_cast %45 : vector<1x4x32xf32> to vector<4x32xf32>
    %47 = arith.truncf %46 : vector<4x32xf32> to vector<4x32xbf16>
    %cst_22 = arith.constant dense<0.000000e+00> : vector<384x32xf32>
    %48 = tpu.matmul %44, %47, %cst_22 {dimension_numbers = #tpu.dot_dimension_numbers<[1], [0], [0], [1], [0, 0, 1, 1], [], []>} : vector<384x4xbf16>, vector<4x32xbf16>, vector<384x32xf32> -> vector<384x32xf32>
    %49 = arith.addf %42, %48 : vector<384x32xf32>
    %50 = vector.extract_strided_slice %1 {offsets = [56, 0], sizes = [384, 4], strides = [1, 1]} : vector<456x4xf32> to vector<384x4xf32>
    %51 = arith.truncf %50 : vector<384x4xf32> to vector<384x4xbf16>
    %c7 = arith.constant 7 : index
    %c0_23 = arith.constant 0 : index
    %c0_24 = arith.constant 0 : index
    %52 = vector.load %arg2[%c7, %c0_23, %c0_24] : memref<9x4x32xf32, #tpu.memory_space<vmem>>, vector<1x4x32xf32>
    %53 = vector.shape_cast %52 : vector<1x4x32xf32> to vector<4x32xf32>
    %54 = arith.truncf %53 : vector<4x32xf32> to vector<4x32xbf16>
    %cst_25 = arith.constant dense<0.000000e+00> : vector<384x32xf32>
    %55 = tpu.matmul %51, %54, %cst_25 {dimension_numbers = #tpu.dot_dimension_numbers<[1], [0], [0], [1], [0, 0, 1, 1], [], []>} : vector<384x4xbf16>, vector<4x32xbf16>, vector<384x32xf32> -> vector<384x32xf32>
    %56 = arith.addf %49, %55 : vector<384x32xf32>
    %57 = vector.extract_strided_slice %1 {offsets = [57, 0], sizes = [384, 4], strides = [1, 1]} : vector<456x4xf32> to vector<384x4xf32>
    %58 = arith.truncf %57 : vector<384x4xf32> to vector<384x4xbf16>
    %c8 = arith.constant 8 : index
    %c0_26 = arith.constant 0 : index
    %c0_27 = arith.constant 0 : index
    %59 = vector.load %arg2[%c8, %c0_26, %c0_27] : memref<9x4x32xf32, #tpu.memory_space<vmem>>, vector<1x4x32xf32>
    %60 = vector.shape_cast %59 : vector<1x4x32xf32> to vector<4x32xf32>
    %61 = arith.truncf %60 : vector<4x32xf32> to vector<4x32xbf16>
    %cst_28 = arith.constant dense<0.000000e+00> : vector<384x32xf32>
    %62 = tpu.matmul %58, %61, %cst_28 {dimension_numbers = #tpu.dot_dimension_numbers<[1], [0], [0], [1], [0, 0, 1, 1], [], []>} : vector<384x4xbf16>, vector<4x32xbf16>, vector<384x32xf32> -> vector<384x32xf32>
    %63 = arith.addf %56, %62 : vector<384x32xf32>
    %c0_29 = arith.constant 0 : index
    %c0_30 = arith.constant 0 : index
    %64 = vector.load %arg3[%c0_29, %c0_30] : memref<1x32xf32, #tpu.memory_space<vmem>>, vector<1x32xf32>
    %65 = vector.broadcast %64 : vector<1x32xf32> to vector<384x32xf32>
    %66 = arith.addf %63, %65 : vector<384x32xf32>
    %cst_31 = arith.constant 0.000000e+00 : f32
    %67 = vector.broadcast %cst_31 : f32 to vector<384x32xf32>
    %68 = arith.maximumf %66, %67 : vector<384x32xf32>
    %c0_32 = arith.constant 0 : index
    %c0_33 = arith.constant 0 : index
    %69 = vector.load %arg8[%c0_32, %c0_33] : memref<384x1xf32, #tpu.memory_space<vmem>>, vector<384x1xf32>
    %70 = vector.broadcast %69 : vector<384x1xf32> to vector<384x32xf32>
    %71 = arith.mulf %68, %70 : vector<384x32xf32>
    %cst_34 = arith.constant 0.000000e+00 : f32
    %72 = vector.broadcast %cst_34 : f32 to vector<456x32xf32>
    %c0_35 = arith.constant 0 : index
    %c0_36 = arith.constant 0 : index
    %73 = vector.load %arg10[%c0_35, %c0_36] : memref<456x32xf32, #tpu.memory_space<vmem>>, vector<456x32xf32>
    tpu.vector_store %arg10[%c0_35, %c0_36], %72 {strides = array<i32>} : memref<456x32xf32, #tpu.memory_space<vmem>>, vector<456x32xf32>,
    %c32 = arith.constant 32 : index
    %c0_37 = arith.constant 0 : index
    %74 = vector.load %arg10[%c32, %c0_37] : memref<456x32xf32, #tpu.memory_space<vmem>>, vector<384x32xf32>
    tpu.vector_store %arg10[%c32, %c0_37], %71 {strides = array<i32>} : memref<456x32xf32, #tpu.memory_space<vmem>>, vector<384x32xf32>,
    %c0_38 = arith.constant 0 : index
    %c0_39 = arith.constant 0 : index
    %75 = vector.load %arg10[%c0_38, %c0_39] : memref<456x32xf32, #tpu.memory_space<vmem>>, vector<456x32xf32>
    %76 = vector.extract_strided_slice %75 {offsets = [7, 0], sizes = [384, 32], strides = [1, 1]} : vector<456x32xf32> to vector<384x32xf32>
    %77 = arith.truncf %76 : vector<384x32xf32> to vector<384x32xbf16>
    %c0_40 = arith.constant 0 : index
    %c0_41 = arith.constant 0 : index
    %c0_42 = arith.constant 0 : index
    %78 = vector.load %arg4[%c0_40, %c0_41, %c0_42] : memref<9x32x32xf32, #tpu.memory_space<vmem>>, vector<1x32x32xf32>
    %79 = vector.shape_cast %78 : vector<1x32x32xf32> to vector<32x32xf32>
    %80 = arith.truncf %79 : vector<32x32xf32> to vector<32x32xbf16>
    %cst_43 = arith.constant dense<0.000000e+00> : vector<384x32xf32>
    %81 = tpu.matmul %77, %80, %cst_43 {dimension_numbers = #tpu.dot_dimension_numbers<[1], [0], [0], [1], [0, 0, 1, 1], [], []>} : vector<384x32xbf16>, vector<32x32xbf16>, vector<384x32xf32> -> vector<384x32xf32>
    %82 = vector.extract_strided_slice %75 {offsets = [8, 0], sizes = [384, 32], strides = [1, 1]} : vector<456x32xf32> to vector<384x32xf32>
    %83 = arith.truncf %82 : vector<384x32xf32> to vector<384x32xbf16>
    %c1_44 = arith.constant 1 : index
    %c0_45 = arith.constant 0 : index
    %c0_46 = arith.constant 0 : index
    %84 = vector.load %arg4[%c1_44, %c0_45, %c0_46] : memref<9x32x32xf32, #tpu.memory_space<vmem>>, vector<1x32x32xf32>
    %85 = vector.shape_cast %84 : vector<1x32x32xf32> to vector<32x32xf32>
    %86 = arith.truncf %85 : vector<32x32xf32> to vector<32x32xbf16>
    %cst_47 = arith.constant dense<0.000000e+00> : vector<384x32xf32>
    %87 = tpu.matmul %83, %86, %cst_47 {dimension_numbers = #tpu.dot_dimension_numbers<[1], [0], [0], [1], [0, 0, 1, 1], [], []>} : vector<384x32xbf16>, vector<32x32xbf16>, vector<384x32xf32> -> vector<384x32xf32>
    %88 = arith.addf %81, %87 : vector<384x32xf32>
    %89 = vector.extract_strided_slice %75 {offsets = [9, 0], sizes = [384, 32], strides = [1, 1]} : vector<456x32xf32> to vector<384x32xf32>
    %90 = arith.truncf %89 : vector<384x32xf32> to vector<384x32xbf16>
    %c2_48 = arith.constant 2 : index
    %c0_49 = arith.constant 0 : index
    %c0_50 = arith.constant 0 : index
    %91 = vector.load %arg4[%c2_48, %c0_49, %c0_50] : memref<9x32x32xf32, #tpu.memory_space<vmem>>, vector<1x32x32xf32>
    %92 = vector.shape_cast %91 : vector<1x32x32xf32> to vector<32x32xf32>
    %93 = arith.truncf %92 : vector<32x32xf32> to vector<32x32xbf16>
    %cst_51 = arith.constant dense<0.000000e+00> : vector<384x32xf32>
    %94 = tpu.matmul %90, %93, %cst_51 {dimension_numbers = #tpu.dot_dimension_numbers<[1], [0], [0], [1], [0, 0, 1, 1], [], []>} : vector<384x32xbf16>, vector<32x32xbf16>, vector<384x32xf32> -> vector<384x32xf32>
    %95 = arith.addf %88, %94 : vector<384x32xf32>
    %96 = vector.extract_strided_slice %75 {offsets = [31, 0], sizes = [384, 32], strides = [1, 1]} : vector<456x32xf32> to vector<384x32xf32>
    %97 = arith.truncf %96 : vector<384x32xf32> to vector<384x32xbf16>
    %c3_52 = arith.constant 3 : index
    %c0_53 = arith.constant 0 : index
    %c0_54 = arith.constant 0 : index
    %98 = vector.load %arg4[%c3_52, %c0_53, %c0_54] : memref<9x32x32xf32, #tpu.memory_space<vmem>>, vector<1x32x32xf32>
    %99 = vector.shape_cast %98 : vector<1x32x32xf32> to vector<32x32xf32>
    %100 = arith.truncf %99 : vector<32x32xf32> to vector<32x32xbf16>
    %cst_55 = arith.constant dense<0.000000e+00> : vector<384x32xf32>
    %101 = tpu.matmul %97, %100, %cst_55 {dimension_numbers = #tpu.dot_dimension_numbers<[1], [0], [0], [1], [0, 0, 1, 1], [], []>} : vector<384x32xbf16>, vector<32x32xbf16>, vector<384x32xf32> -> vector<384x32xf32>
    %102 = arith.addf %95, %101 : vector<384x32xf32>
    %103 = vector.extract_strided_slice %75 {offsets = [32, 0], sizes = [384, 32], strides = [1, 1]} : vector<456x32xf32> to vector<384x32xf32>
    %104 = arith.truncf %103 : vector<384x32xf32> to vector<384x32xbf16>
    %c4_56 = arith.constant 4 : index
    %c0_57 = arith.constant 0 : index
    %c0_58 = arith.constant 0 : index
    %105 = vector.load %arg4[%c4_56, %c0_57, %c0_58] : memref<9x32x32xf32, #tpu.memory_space<vmem>>, vector<1x32x32xf32>
    %106 = vector.shape_cast %105 : vector<1x32x32xf32> to vector<32x32xf32>
    %107 = arith.truncf %106 : vector<32x32xf32> to vector<32x32xbf16>
    %cst_59 = arith.constant dense<0.000000e+00> : vector<384x32xf32>
    %108 = tpu.matmul %104, %107, %cst_59 {dimension_numbers = #tpu.dot_dimension_numbers<[1], [0], [0], [1], [0, 0, 1, 1], [], []>} : vector<384x32xbf16>, vector<32x32xbf16>, vector<384x32xf32> -> vector<384x32xf32>
    %109 = arith.addf %102, %108 : vector<384x32xf32>
    %110 = vector.extract_strided_slice %75 {offsets = [33, 0], sizes = [384, 32], strides = [1, 1]} : vector<456x32xf32> to vector<384x32xf32>
    %111 = arith.truncf %110 : vector<384x32xf32> to vector<384x32xbf16>
    %c5_60 = arith.constant 5 : index
    %c0_61 = arith.constant 0 : index
    %c0_62 = arith.constant 0 : index
    %112 = vector.load %arg4[%c5_60, %c0_61, %c0_62] : memref<9x32x32xf32, #tpu.memory_space<vmem>>, vector<1x32x32xf32>
    %113 = vector.shape_cast %112 : vector<1x32x32xf32> to vector<32x32xf32>
    %114 = arith.truncf %113 : vector<32x32xf32> to vector<32x32xbf16>
    %cst_63 = arith.constant dense<0.000000e+00> : vector<384x32xf32>
    %115 = tpu.matmul %111, %114, %cst_63 {dimension_numbers = #tpu.dot_dimension_numbers<[1], [0], [0], [1], [0, 0, 1, 1], [], []>} : vector<384x32xbf16>, vector<32x32xbf16>, vector<384x32xf32> -> vector<384x32xf32>
    %116 = arith.addf %109, %115 : vector<384x32xf32>
    %117 = vector.extract_strided_slice %75 {offsets = [55, 0], sizes = [384, 32], strides = [1, 1]} : vector<456x32xf32> to vector<384x32xf32>
    %118 = arith.truncf %117 : vector<384x32xf32> to vector<384x32xbf16>
    %c6_64 = arith.constant 6 : index
    %c0_65 = arith.constant 0 : index
    %c0_66 = arith.constant 0 : index
    %119 = vector.load %arg4[%c6_64, %c0_65, %c0_66] : memref<9x32x32xf32, #tpu.memory_space<vmem>>, vector<1x32x32xf32>
    %120 = vector.shape_cast %119 : vector<1x32x32xf32> to vector<32x32xf32>
    %121 = arith.truncf %120 : vector<32x32xf32> to vector<32x32xbf16>
    %cst_67 = arith.constant dense<0.000000e+00> : vector<384x32xf32>
    %122 = tpu.matmul %118, %121, %cst_67 {dimension_numbers = #tpu.dot_dimension_numbers<[1], [0], [0], [1], [0, 0, 1, 1], [], []>} : vector<384x32xbf16>, vector<32x32xbf16>, vector<384x32xf32> -> vector<384x32xf32>
    %123 = arith.addf %116, %122 : vector<384x32xf32>
    %124 = vector.extract_strided_slice %75 {offsets = [56, 0], sizes = [384, 32], strides = [1, 1]} : vector<456x32xf32> to vector<384x32xf32>
    %125 = arith.truncf %124 : vector<384x32xf32> to vector<384x32xbf16>
    %c7_68 = arith.constant 7 : index
    %c0_69 = arith.constant 0 : index
    %c0_70 = arith.constant 0 : index
    %126 = vector.load %arg4[%c7_68, %c0_69, %c0_70] : memref<9x32x32xf32, #tpu.memory_space<vmem>>, vector<1x32x32xf32>
    %127 = vector.shape_cast %126 : vector<1x32x32xf32> to vector<32x32xf32>
    %128 = arith.truncf %127 : vector<32x32xf32> to vector<32x32xbf16>
    %cst_71 = arith.constant dense<0.000000e+00> : vector<384x32xf32>
    %129 = tpu.matmul %125, %128, %cst_71 {dimension_numbers = #tpu.dot_dimension_numbers<[1], [0], [0], [1], [0, 0, 1, 1], [], []>} : vector<384x32xbf16>, vector<32x32xbf16>, vector<384x32xf32> -> vector<384x32xf32>
    %130 = arith.addf %123, %129 : vector<384x32xf32>
    %131 = vector.extract_strided_slice %75 {offsets = [57, 0], sizes = [384, 32], strides = [1, 1]} : vector<456x32xf32> to vector<384x32xf32>
    %132 = arith.truncf %131 : vector<384x32xf32> to vector<384x32xbf16>
    %c8_72 = arith.constant 8 : index
    %c0_73 = arith.constant 0 : index
    %c0_74 = arith.constant 0 : index
    %133 = vector.load %arg4[%c8_72, %c0_73, %c0_74] : memref<9x32x32xf32, #tpu.memory_space<vmem>>, vector<1x32x32xf32>
    %134 = vector.shape_cast %133 : vector<1x32x32xf32> to vector<32x32xf32>
    %135 = arith.truncf %134 : vector<32x32xf32> to vector<32x32xbf16>
    %cst_75 = arith.constant dense<0.000000e+00> : vector<384x32xf32>
    %136 = tpu.matmul %132, %135, %cst_75 {dimension_numbers = #tpu.dot_dimension_numbers<[1], [0], [0], [1], [0, 0, 1, 1], [], []>} : vector<384x32xbf16>, vector<32x32xbf16>, vector<384x32xf32> -> vector<384x32xf32>
    %137 = arith.addf %130, %136 : vector<384x32xf32>
    %c0_76 = arith.constant 0 : index
    %c0_77 = arith.constant 0 : index
    %138 = vector.load %arg5[%c0_76, %c0_77] : memref<1x32xf32, #tpu.memory_space<vmem>>, vector<1x32xf32>
    %139 = vector.broadcast %138 : vector<1x32xf32> to vector<384x32xf32>
    %140 = arith.addf %137, %139 : vector<384x32xf32>
    %cst_78 = arith.constant 0.000000e+00 : f32
    %141 = vector.broadcast %cst_78 : f32 to vector<384x32xf32>
    %142 = arith.maximumf %140, %141 : vector<384x32xf32>
    %143 = arith.truncf %142 : vector<384x32xf32> to vector<384x32xbf16>
    %c0_79 = arith.constant 0 : index
    %c0_80 = arith.constant 0 : index
    %144 = vector.load %arg6[%c0_79, %c0_80] : memref<32x5xf32, #tpu.memory_space<vmem>>, vector<32x5xf32>
    %145 = arith.truncf %144 : vector<32x5xf32> to vector<32x5xbf16>
    %cst_81 = arith.constant dense<0.000000e+00> : vector<384x5xf32>
    %146 = tpu.matmul %143, %145, %cst_81 {dimension_numbers = #tpu.dot_dimension_numbers<[1], [0], [0], [1], [0, 0, 1, 1], [], []>} : vector<384x32xbf16>, vector<32x5xbf16>, vector<384x5xf32> -> vector<384x5xf32>
    %c0_82 = arith.constant 0 : index
    %c0_83 = arith.constant 0 : index
    %147 = vector.load %arg7[%c0_82, %c0_83] : memref<1x5xf32, #tpu.memory_space<vmem>>, vector<1x5xf32>
    %148 = vector.broadcast %147 : vector<1x5xf32> to vector<384x5xf32>
    %149 = arith.addf %146, %148 : vector<384x5xf32>
    %c0_84 = arith.constant 0 : index
    %c0_85 = arith.constant 0 : index
    %c0_86 = arith.constant 0 : index
    %150 = vector.load %arg9[%c0_84, %c0_85, %c0_86] : memref<1x384x5xf32, #tpu.memory_space<vmem>>, vector<1x384x5xf32>
    %151 = vector.shape_cast %150 : vector<1x384x5xf32> to vector<384x5xf32>
    %152 = vector.shape_cast %149 : vector<384x5xf32> to vector<1x384x5xf32>
    tpu.vector_store %arg9[%c0_84, %c0_85, %c0_86], %152 {strides = array<i32>} : memref<1x384x5xf32, #tpu.memory_space<vmem>>, vector<1x384x5xf32>,
    return
  }
  func.func @transform_0(%arg0: i32) -> (i32, i32, i32) {
    %c0_i32 = arith.constant 0 : i32
    %c0_i32_0 = arith.constant 0 : i32
    %c0_i32_1 = arith.constant 0 : i32
    return %arg0, %c0_i32, %c0_i32_0 : i32, i32, i32
  }
  func.func @transform_1(%arg0: i32) -> (i32, i32, i32) {
    %c0_i32 = arith.constant 0 : i32
    %c0_i32_0 = arith.constant 0 : i32
    %c0_i32_1 = arith.constant 0 : i32
    %c0_i32_2 = arith.constant 0 : i32
    return %c0_i32, %c0_i32_0, %c0_i32_1 : i32, i32, i32
  }
  func.func @transform_2(%arg0: i32) -> (i32, i32) {
    %c0_i32 = arith.constant 0 : i32
    %c0_i32_0 = arith.constant 0 : i32
    %c0_i32_1 = arith.constant 0 : i32
    return %c0_i32, %c0_i32_0 : i32, i32
  }
  func.func @transform_3(%arg0: i32) -> (i32, i32, i32) {
    %c0_i32 = arith.constant 0 : i32
    %c0_i32_0 = arith.constant 0 : i32
    %c0_i32_1 = arith.constant 0 : i32
    %c0_i32_2 = arith.constant 0 : i32
    return %c0_i32, %c0_i32_0, %c0_i32_1 : i32, i32, i32
  }
  func.func @transform_4(%arg0: i32) -> (i32, i32) {
    %c0_i32 = arith.constant 0 : i32
    %c0_i32_0 = arith.constant 0 : i32
    %c0_i32_1 = arith.constant 0 : i32
    return %c0_i32, %c0_i32_0 : i32, i32
  }
  func.func @transform_5(%arg0: i32) -> (i32, i32) {
    %c0_i32 = arith.constant 0 : i32
    %c0_i32_0 = arith.constant 0 : i32
    %c0_i32_1 = arith.constant 0 : i32
    return %c0_i32, %c0_i32_0 : i32, i32
  }
  func.func @transform_6(%arg0: i32) -> (i32, i32) {
    %c0_i32 = arith.constant 0 : i32
    %c0_i32_0 = arith.constant 0 : i32
    %c0_i32_1 = arith.constant 0 : i32
    return %c0_i32, %c0_i32_0 : i32, i32
  }
  func.func @transform_7(%arg0: i32) -> (i32, i32) {
    %c0_i32 = arith.constant 0 : i32
    %c0_i32_0 = arith.constant 0 : i32
    %c0_i32_1 = arith.constant 0 : i32
    return %c0_i32, %c0_i32_0 : i32, i32
  }
  func.func @transform_8(%arg0: i32) -> (i32, i32, i32) {
    %c0_i32 = arith.constant 0 : i32
    %c0_i32_0 = arith.constant 0 : i32
    %c0_i32_1 = arith.constant 0 : i32
    return %arg0, %c0_i32, %c0_i32_0 : i32, i32, i32
  }
}

</mosaic_0001>

<bundles_post_ra>
// kernel: segmenter_forward.1
= control target key start
LH: loop header
LB: loop body
LE: loop exit
PB: predicated region body
PF: predicated region fallthrough
CT: control target
= control target key end

     0   :  { %s11436_s27 = smov 0   ;;  %s14974_s0 = inlined_call_operand.vmem [shape: f32[2,456,4], index: 0, kind: input, shape index: {}]   ;;  %s14975_s1 = inlined_call_operand.vmem [shape: f32[9,4,32], index: 1, kind: input, shape index: {}]   ;;  %s14976_s2 = inlined_call_operand.vmem [shape: f32[1,32], index: 2, kind: input, shape index: {}]   ;;  %s14977_s3 = inlined_call_operand.vmem [shape: f32[9,32,32], index: 3, kind: input, shape index: {}]   ;;  %s14978_s4 = inlined_call_operand.vmem [shape: f32[1,32], index: 4, kind: input, shape index: {}]   ;;  %s14979_s5 = inlined_call_operand.vmem [shape: f32[32,5], index: 5, kind: input, shape index: {}]   ;;  %s14980_s6 = inlined_call_operand.vmem [shape: f32[1,5], index: 6, kind: input, shape index: {}]   ;;  %s14981_s7 = inlined_call_operand.vmem [shape: f32[384,1], index: 7, kind: input, shape index: {}]   ;;  %s14982_s8 = inlined_call_operand.vmem [shape: f32[2,384,5], index: 8, kind: output, shape index: {}]  }
   0x1 LB: > { %s8624_s28 = sadd.s32 4294967295, %s11387_s27   ;;  %p8628_p0 = scmp.ge.s32.totalorder %s11387_s27, 1  ;;  %s11387_s27 = sphi %s11436_s27, %s18_s27  }
   0x2   : > { %p262_p1 = scmp.lt.s32.totalorder %s11387_s27, 3 }
   0x4   : > { %p263_p2 = pnand %p8628_p0, %p262_p1 }
   0x6   : > { %266 = sbr.rel (%p263_p2) target bundleno = 2271 (0x8df), region = 52 }
   0xd   : > { %v8631_v0 = vld [vmem:[%s14975_s1 + $0x4] sm:$0xf]  ;;  %vm490_vm0 = vcmask 1041408   ;;  %p296_p3 = scmp.lt.s32.totalorder %s8624_s28, 1  ;;  %v388_v2 = vld [vmem:[%s14975_s1] sm:$0xf] }
   0xe   : > { %v416_v1 = vpack.c.bf16 %v8631_v0, %v8631_v0  ;;  %v389_v3 = vpack.c.bf16 %v388_v2, %v388_v2  ;;  %v8680_v5 = vld [vmem:[%s14975_s1 + $0x8] sm:$0xf]  ;;  %vm417_vm1 = vcmask 31744   ;;  %vm719_vm2 = vsmask.f32 4352 }
   0xf   : > { %s15791_s28 = smov (!%p296_p3, %s8624_s28), 1  ;;  %v11476_v15 = vpack.c.bf16 %v8680_v5, %v8680_v5  ;;  %vm1248_vm3 = vsmask.f32 7424  ;;  %vm4359_vm4 = vcmask 261120   ;;  %vm8520_vm5 = vcmask 39936  }
  0x10   : > { %11357 = vmatprep.subr.msk.bf16.mxu0 %vm490_vm0, %v416_v1  ;;  %v492_v4 = vsel %vm490_vm0, %v416_v1, 0  ;;  %11358 = vmatprep.subr.msk.bf16.mxu1 %vm490_vm0, %v416_v1  ;;  %s11367_s11 = smul.u32 456, %s15791_s28  ;;  %v1017_v13 = vsel %vm490_vm0, %v389_v3, 0 }
  0x11   : > { %9618 = vmatpush3.bf16.msra.mxu0 %v492_v4  ;;  %10588 = vmatpush3.bf16.msra.mxu1 %v492_v4  ;;  %s11368_s15 = smul.u32 384, %s15791_s28 }
  0x12   : > { %11359 = vmatprep.subr.msk.bf16.mxu0 %vm490_vm0, %v389_v3  ;;  %s11460_s14 = scalar_lea.vmem %s14974_s0, %s11367_s11 }
  0x13   : > { %v308_v6 = vld [vmem:[%s11460_s14 + $0x8] sm:$0xff]  ;;  %v309_v7 = vld [vmem:[%s11460_s14 + $0x10] sm:$0xff]  ;;  %v310_v8 = vld [vmem:[%s11460_s14 + $0x18] sm:$0xff]  ;;  %s14825_s19 = scalar_lea.vmem %s14982_s8, %s11368_s15 }
  0x14   : > { %v11468_v9 = vpack.c.bf16 %v309_v7, %v308_v6  ;;  %v311_v10 = vld [vmem:[%s11460_s14 + $0x20] sm:$0xff]  ;;  %v312_v11 = vld [vmem:[%s11460_s14 + $0x28] sm:$0xff]  ;;  %v313_v14 = vld [vmem:[%s11460_s14 + $0x30] sm:$0xff]  ;;  %v364_v44 = vpack.c.bf16 %v310_v8, %v309_v7 }
  0x15   : > { %v11472_v12 = vpack.c.bf16 %v311_v10, %v310_v8  ;;  %v11482_v16 = vpack.c.bf16 %v313_v14, %v312_v11  ;;  %v314_v17 = vld [vmem:[%s11460_s14 + $0x38] sm:$0xff]  ;;  %v11486_v18 = vld [vmem:[%s11460_s14 + $0x40] sm:$0xff]  ;;  %v316_v19 = vld [vmem:[%s11460_s14 + $0x48] sm:$0xff]  ;;  %v11585_v55 = vpack.c.bf16 %v312_v11, %v311_v10 }
  0x16   : > { %9619 = vmatprep.mubr.msk.bf16.mxu0 %vm417_vm1, %v11468_v9  ;;  %v11492_v20 = vld [vmem:[%s11460_s14 + $0x50] sm:$0xff]  ;;  %v11497_v21 = vpack.c.bf16 %v11486_v18, %v314_v17  ;;  %v334_v24 = vld [vmem:[%s11460_s14 + $0xd8] sm:$0xff]  ;;  %v11505_v25 = vld [vmem:[%s11460_s14 + $0xc8] sm:$0xff]  ;;  %v729_v49 = vshrl.u32 %v364_v44, 16  ;;  %v732_v50 = vshll.u32 %v364_v44, 16  ;;  %v11591_v60 = vpack.c.bf16 %v314_v17, %v313_v14 }
  0x17   : > { %9620 = vmatmul.mubr.msk.bf16.vlgmr.msra.gmra.mrb[0].mxu0 %vm417_vm1, %v11472_v12  ;;  %v11500_v22 = vpack.c.bf16 %v11492_v20, %v316_v19  ;;  %v333_v23 = vld [vmem:[%s11460_s14 + $0xd0] sm:$0xff]  ;;  %v11508_v26 = vld [vmem:[%s11460_s14 + $0xe0] sm:$0xff]  ;;  %v318_v30 = vld [vmem:[%s11460_s14 + $0x58] sm:$0xff]  ;;  %v15001_v61 = vshrl.u32 %v11585_v55, 16  ;;  %v15002_v62 = vshll.u32 %v11585_v55, 16  ;;  %v11608_v5 = vpack.c.bf16 %v316_v19, %v11486_v18 }
  0x18   : > { %9668 = vmatpush3.bf16.msra.mxu0 %v1017_v13  ;;  %9623 = vmatprep.mubr.msk.bf16.mxu0 %vm417_vm1, %v11482_v16  ;;  %v11510_v27 = vpack.c.bf16 %v334_v24, %v333_v23  ;;  %v11513_v28 = vpack.c.bf16 %v333_v23, %v11505_v25  ;;  %v11518_v29 = vpack.c.bf16 %v11508_v26, %v334_v24  ;;  %v11524_v31 = vld [vmem:[%s11460_s14 + $0x60] sm:$0xff]  ;;  %v11529_v32 = vld [vmem:[%s11460_s14 + $0x68] sm:$0xff]  ;;  %v11532_v33 = vld [vmem:[%s11460_s14 + $0x70] sm:$0xff]  ;;  %v731_v58 = vrot.slane %v729_v49, 3 }
  0x19   : > { %11360 = vmatprep.subr.msk.bf16.mxu0 %vm490_vm0, %v11476_v15  ;;  %15269 = vst [vmem:[#allocation3_spill] sm:$0xff] %v11500_v22  ;;  %v11537_v34 = vpack.c.bf16 %v11524_v31, %v318_v30  ;;  %v11541_v35 = vpack.c.bf16 %v11532_v33, %v11529_v32  ;;  %v322_v36 = vld [vmem:[%s11460_s14 + $0x78] sm:$0xff]  ;;  %v11549_v37 = vld [vmem:[%s11460_s14 + $0x80] sm:$0xff]  ;;  %v11553_v39 = vld [vmem:[%s11460_s14 + $0x88] sm:$0xff]  ;;  %v734_v59 = vrot.slane %v732_v50, 4  ;;  %v14994_v3 = vshrl.u32 %v11591_v60, 16 }
  0x1a   : > { %15270 = vst [vmem:[#allocation4_spill] sm:$0xff] %v11510_v27  ;;  %9643 = vmatprep.mubr.msk.bf16.mxu1 %vm417_vm1, %v11513_v28  ;;  %v307_v38 = vld [vmem:[%s11460_s14] sm:$0xff]  ;;  %v11556_v40 = vld [vmem:[%s11460_s14 + $0x90] sm:$0xff]  ;;  %v11559_v41 = vpack.c.bf16 %v11549_v37, %v322_v36  ;;  %v11570_v46 = vld [vmem:[%s11460_s14 + $0x98] sm:$0xff]  ;;  %v15000_v4 = vshll.u32 %v11591_v60, 16  ;;  %v11612_v7 = vpack.c.bf16 %v318_v30, %v11492_v20  ;;  %v740_v10 = vrot.slane %v15001_v61, 3 }
  0x1b   : > { %9644 = vmatmul.mubr.msk.bf16.vlgmr.msra.gmra.mrb[0].mxu1 %vm417_vm1, %v11518_v29  ;;  %15271 = vst [vmem:[#allocation5_spill] sm:$0xff] %v11541_v35  ;;  %v363_v42 = vpack.c.bf16 %v308_v6, %v307_v38  ;;  %v11563_v43 = vpack.c.bf16 %v11556_v40, %v11553_v39  ;;  %v11573_v47 = vld [vmem:[%s11460_s14 + $0xa0] sm:$0xff]  ;;  %v11576_v51 = vld [vmem:[%s11460_s14 + $0xa8] sm:$0xff]  ;;  %v11579_v52 = vld [vmem:[%s11460_s14 + $0xb0] sm:$0xff]  ;;  %v735_v2 = vor.u32 %v734_v59, %v731_v58  ;;  %v1251_v6 = vshll.u32 %v11468_v9, 16 }
  0x1c   : > { %v11583_v53 = vpack.c.bf16 %v11573_v47, %v11570_v46  ;;  %v11589_v56 = vpack.c.bf16 %v11579_v52, %v11576_v51  ;;  %v11600_v63 = vld [vmem:[%s11460_s14 + $0xb8] sm:$0xff]  ;;  %v11603_v0 = vld [vmem:[%s11460_s14 + $0xc0] sm:$0xff]  ;;  %v743_v11 = vrot.slane %v15002_v62, 4  ;;  %v749_v14 = vrot.slane %v14994_v3, 3  ;;  %v8705_v50 = vld [vmem:[%s14975_s1 + $0xc] sm:$0xf] }
  0x1d   : > { %v721_v45 = vshrl.u32 %v363_v42, 16  ;;  %v724_v48 = vshll.u32 %v363_v42, 16  ;;  %v11616_v8 = vpack.c.bf16 %v11603_v0, %v11600_v63  ;;  %v752_v17 = vrot.slane %v15000_v4, 4 }
  0x1e   : > { %v14993_v18 = vshrl.u32 %v11608_v5, 16  ;;  %v1249_v19 = vshrl.u32 %v11468_v9, 16  ;;  %v1253_v20 = vrot.slane %v1251_v6, 1  ;;  %v14995_v23 = vshll.u32 %v11608_v5, 16 }
  0x1f   : > { %9624 = vmatmul.mubr.msk.bf16.gmra.mrb[4].mxu0 %vm417_vm1, %v11497_v21  ;;  %v723_v54 = vrot.slane %v721_v45, 3  ;;  %v726_v57 = vrot.slane %v724_v48, 4  ;;  %v14990_v24 = vshrl.u32 %v11612_v7, 16  ;;  %v744_v30 = vor.u32 %v743_v11, %v740_v10 }
  0x20   : > { %9627 = vmatprep.mubr.msk.bf16.mxu0 %vm417_vm1, %v11500_v22  ;;  %v14992_v38 = vshll.u32 %v11612_v7, 16  ;;  %v15003_v42 = vshll.u32 %v11482_v16, 16  ;;  %v753_v44 = vor.u32 %v752_v17, %v749_v14  ;;  %v11638_v45 = vpack.c.bf16 %v11529_v32, %v11524_v31 }
  0x21   : > { %v727_v1 = vor.u32 %v726_v57, %v723_v54  ;;  %v11641_v9 = vpack.c.bf16 %v322_v36, %v11532_v33  ;;  %v1494_v48 = vsel %vm490_vm0, %v11476_v15, 0  ;;  %v758_v49 = vrot.slane %v14993_v18, 3 }
  0x22   : > { %v761_v54 = vrot.slane %v14995_v23, 4  ;;  %v767_v31 = vrot.slane %v14990_v24, 3  ;;  %v1254_v32 = vor.u32 %v1253_v20, %v1249_v19  ;;  %v15004_v33 = vshll.u32 %v11472_v12, 16 }
  0x23   : > { %v736_v13 = vsel %vm719_vm2, %v727_v1, %v735_v2  ;;  %v745_v36 = vsel %vm719_vm2, %v735_v2, %v744_v30  ;;  %v770_v15 = vrot.slane %v14992_v38, 4  ;;  %v15005_v57 = vshrl.u32 %v11472_v12, 16 }
  0x24   : > { %v754_v58 = vsel %vm719_vm2, %v744_v30, %v753_v44  ;;  %v1257_v59 = vrot.slane %v15004_v33, 1  ;;  %v11662_v1 = vpack.c.bf16 %v8705_v50, %v8705_v50  ;;  %v11666_v6 = vrot.slane %v15003_v42, 1 }
  0x25   : > { %v762_v11 = vor.u32 %v761_v54, %v758_v49  ;;  %v14991_v14 = vshll.u32 %v11638_v45, 16  ;;  %v771_v17 = vor.u32 %v770_v15, %v767_v31  ;;  %v14983_v19 = vshrl.u32 %v11641_v9, 16 }
  0x26   : > { %v11670_v2 = vsel %vm1248_vm3, %v1254_v32, %v1257_v59  ;;  %v1261_v10 = vor.u32 %v15005_v57, %v1257_v59  ;;  %v14984_v20 = vshll.u32 %v11641_v9, 16  ;;  %v11698_v31 = vpack.c.bf16 %v11570_v46, %v11556_v40 }
  0x27   : > { %9628 = vmatmul.mubr.msk.bf16.gmra.mrb[8].mxu0 %vm417_vm1, %v11537_v34  ;;  %v11690_v49 = vsel %vm719_vm2, %v753_v44, %v762_v11  ;;  %v779_v54 = vrot.slane %v14991_v14, 4  ;;  %v11701_v32 = vsel %vm719_vm2, %v762_v11, %v771_v17  ;;  %v11717_v59 = vpack.c.bf16 %v11576_v51, %v11573_v47  ;;  %v337_v11 = vld [vmem:[%s11460_s14 + $0xf0] sm:$0xff] }
  0x28   : > { %9631 = vmatprep.mubr.msk.bf16.mxu0 %vm417_vm1, %v11541_v35  ;;  %v11683_v30 = vsel %vm1248_vm3, %v1261_v10, %v11666_v6  ;;  %15272 = vst [vmem:[#allocation6_spill] sm:$0xff] %v11690_v49  ;;  %15273 = vst [vmem:[#allocation7_spill] sm:$0xff] %v11698_v31  ;;  %v14987_v15 = vshrl.u32 %v11698_v31, 16  ;;  %v336_v10 = vld [vmem:[%s11460_s14 + $0xe8] sm:$0xff]  ;;  %v15010_v62 = vshrl.u32 %v11510_v27, 16  ;;  %v15011_v42 = vshll.u32 %v11510_v27, 16 }
  0x29   : > { %15274 = vst [vmem:[#allocation8_spill] sm:$0xff] %v11701_v32  ;;  %15275 = vst [vmem:[#allocation9_spill] sm:$0xff] %v11717_v59 }
  0x2a   : > { %v803_v51 = vrot.slane %v14987_v15, 3  ;;  %v14996_v15 = vshrl.u32 %v11717_v59, 16  ;;  %v839_v57 = vrot.slane %v15010_v62, 3 }
  0x2c   : > { %v812_v18 = vrot.slane %v14996_v15, 3  ;;  %v344_v15 = vld [vmem:[%s11460_s14 + $0x128] sm:$0xff] }
  0x2f   : > { %9632 = vmatmul.mubr.msk.bf16.gmra.mrb[12].mxu0 %vm417_vm1, %v11559_v41 }
  0x30   : > { %9635 = vmatprep.mubr.msk.bf16.mxu0 %vm417_vm1, %v11563_v43 }
  0x37   : > { %9636 = vmatmul.mubr.msk.bf16.gmra.mrb[16].mxu0 %vm417_vm1, %v11583_v53 }
  0x38   : > { %9639 = vmatprep.mubr.msk.bf16.mxu0 %vm417_vm1, %v11589_v56 }
  0x3f   : > { %9640 = vmatmul.mubr.msk.bf16.gmra.mrb[20].mxu0 %vm417_vm1, %v11616_v8 }
  0x40   : > { %9669 = vmatprep.mubr.msk.bf16.mxu0 %vm417_vm1, %v736_v13  ;;  %v14989_v13 = vshrl.u32 %v11638_v45, 16 }
  0x42   : > { %v776_v50 = vrot.slane %v14989_v13, 3 }
  0x44   : > { %v780_v44 = vor.u32 %v779_v54, %v776_v50 }
  0x46   : > { %v11722_v50 = vsel %vm719_vm2, %v771_v17, %v780_v44 }
  0x47   : > { %9670 = vmatmul.mubr.msk.bf16.vlgmr.msra.gmra.mrb[0].mxu0 %vm417_vm1, %v745_v36  ;;  %15276 = vst [vmem:[#allocation10_spill] sm:$0xff] %v11722_v50 }
  0x48   : > { %9718 = vmatpush3.bf16.msra.mxu0 %v1494_v48  ;;  %9673 = vmatprep.mubr.msk.bf16.mxu0 %vm417_vm1, %v754_v58  ;;  %v11687_v48 = vpack.c.bf16 %v11553_v39, %v11549_v37  ;;  %v785_v37 = vrot.slane %v14983_v19, 3  ;;  %v788_v39 = vrot.slane %v14984_v20, 4  ;;  %v14988_v58 = vshll.u32 %v11698_v31, 16  ;;  %v338_v20 = vld [vmem:[%s11460_s14 + $0xf8] sm:$0xff] }
  0x49   : > { %11361 = vmatprep.subr.msk.bf16.mxu0 %vm490_vm0, %v11662_v1  ;;  %v11732_v19 = vpack.c.bf16 %v11600_v63, %v11579_v52  ;;  %v340_v52 = vld [vmem:[%s11460_s14 + $0x108] sm:$0xff]  ;;  %v341_v63 = vld [vmem:[%s11460_s14 + $0x110] sm:$0xff] }
  0x4a   : > { %v14985_v36 = vshrl.u32 %v11687_v48, 16  ;;  %v14986_v40 = vshll.u32 %v11687_v48, 16  ;;  %v789_v46 = vor.u32 %v788_v39, %v785_v37  ;;  %v11728_v39 = vpack.c.bf16 %v337_v11, %v336_v10 }
  0x4b   : > { %15277 = vst [vmem:[#allocation11_spill] sm:$0xff] %v11732_v19  ;;  %v806_v17 = vrot.slane %v14988_v58, 4  ;;  %v14997_v58 = vshll.u32 %v11717_v59, 16  ;;  %v11758_v13 = vpack.c.bf16 %v341_v63, %v340_v52  ;;  %v14998_v14 = vshrl.u32 %v11732_v19, 16 }
  0x4c   : > { %v794_v54 = vrot.slane %v14985_v36, 3  ;;  %v797_v37 = vrot.slane %v14986_v40, 4  ;;  %v11735_v47 = vsel %vm719_vm2, %v780_v44, %v789_v46  ;;  %v11743_v36 = vld [vmem:[%s11460_s14 + $0x100] sm:$0xff]  ;;  %9647 = vmatprep.mubr.msk.bf16.mxu1 %vm417_vm1, %v11728_v39  ;;  %v14999_v38 = vshll.u32 %v11732_v19, 16 }
  0x4d   : > { %15278 = vst [vmem:[#allocation12_spill] sm:$0xff] %v11735_v47  ;;  %v11746_v40 = vpack.c.bf16 %v11743_v36, %v338_v20  ;;  %v807_v24 = vor.u32 %v806_v17, %v803_v51  ;;  %v815_v51 = vrot.slane %v14997_v58, 4  ;;  %v821_v3 = vrot.slane %v14998_v14, 3  ;;  %v11795_v58 = vld [vmem:[%s11460_s14 + $0x130] sm:$0xff] }
  0x4e   : > { %v798_v44 = vor.u32 %v797_v37, %v794_v54  ;;  %v11768_v54 = vpack.c.bf16 %v11505_v25, %v11603_v0  ;;  %v824_v23 = vrot.slane %v14999_v38, 4  ;;  %v342_v25 = vld [vmem:[%s11460_s14 + $0x118] sm:$0xff]  ;;  %v11786_v0 = vld [vmem:[%s11460_s14 + $0x120] sm:$0xff]  ;;  %v11802_v4 = vpack.c.bf16 %v11795_v58, %v344_v15 }
  0x4f   : > { %9674 = vmatmul.mubr.msk.bf16.gmra.mrb[4].mxu0 %vm417_vm1, %v11690_v49  ;;  %9648 = vmatmul.mubr.msk.bf16.gmra.mrb[4].mxu1 %vm417_vm1, %v11746_v40 }
  0x50   : > { %9677 = vmatprep.mubr.msk.bf16.mxu0 %vm417_vm1, %v11701_v32  ;;  %9651 = vmatprep.mubr.msk.bf16.mxu1 %vm417_vm1, %v11758_v13  ;;  %15279 = vst [vmem:[#allocation13_spill] sm:$0xff] %v11768_v54  ;;  %v11771_v37 = vsel %vm719_vm2, %v789_v46, %v798_v44  ;;  %v11778_v17 = vsel %vm719_vm2, %v798_v44, %v807_v24  ;;  %v15009_v14 = vshrl.u32 %v11768_v54, 16  ;;  %v15012_v38 = vshll.u32 %v11768_v54, 16  ;;  %v350_v32 = vld [vmem:[%s11460_s14 + $0x158] sm:$0xff] }
  0x51   : > { %15280 = vst [vmem:[#allocation14_spill] sm:$0xff] %v11771_v37  ;;  %15281 = vst [vmem:[#allocation15_spill] sm:$0xff] %v11778_v17  ;;  %v11789_v46 = vpack.c.bf16 %v11786_v0, %v342_v25  ;;  %v816_v44 = vor.u32 %v815_v51, %v812_v18  ;;  %v825_v61 = vor.u32 %v824_v23, %v821_v3 }
  0x52   : > { %v830_v51 = vrot.slane %v15009_v14, 3  ;;  %v833_v33 = vrot.slane %v15012_v38, 4  ;;  %v11818_v3 = vpack.c.bf16 %v336_v10, %v11508_v26  ;;  %v348_v26 = vld [vmem:[%s11460_s14 + $0x148] sm:$0xff]  ;;  %v11837_v10 = vld [vmem:[%s11460_s14 + $0x150] sm:$0xff]  ;;  %v11862_v38 = vpack.c.bf16 %v342_v25, %v341_v63 }
  0x53   : > { %v11811_v18 = vsel %vm719_vm2, %v807_v24, %v816_v44  ;;  %v11821_v23 = vsel %vm719_vm2, %v816_v44, %v825_v61  ;;  %v11827_v24 = vpack.c.bf16 %v338_v20, %v337_v11  ;;  %v11844_v11 = vpack.c.bf16 %v11837_v10, %v348_v26 }
  0x54   : > { %15282 = vst [vmem:[#allocation16_spill] sm:$0xff] %v11811_v18  ;;  %15283 = vst [vmem:[#allocation17_spill] sm:$0xff] %v11818_v3  ;;  %v834_v44 = vor.u32 %v833_v33, %v830_v51  ;;  %v15018_v62 = vshrl.u32 %v11818_v3, 16  ;;  %v11853_v33 = vpack.c.bf16 %v340_v52, %v11743_v36 }
  0x55   : > { %15284 = vst [vmem:[#allocation18_spill] sm:$0xff] %v11821_v23  ;;  %15285 = vst [vmem:[#allocation19_spill] sm:$0xff] %v11827_v24  ;;  %v15292_v36 = vshll.u32 %v11827_v24, 16 }
  0x56   : > { %15286 = vst [vmem:[#allocation20_spill] sm:$0xff] %v11853_v33  ;;  %v11856_v51 = vsel %vm719_vm2, %v825_v61, %v834_v44  ;;  %v848_v20 = vrot.slane %v15018_v62, 3  ;;  %15289 = vst [vmem:[#allocation22_spill] sm:$0xff] %v11862_v38  ;;  %v11873_v61 = vld [vmem:[%s11460_s14 + $0x160] sm:$0xff]  ;;  %v15293_v25 = vshrl.u32 %v11853_v33, 16 }
  0x57   : > { %9678 = vmatmul.mubr.msk.bf16.gmra.mrb[8].mxu0 %vm417_vm1, %v11722_v50  ;;  %9652 = vmatmul.mubr.msk.bf16.gmra.mrb[8].mxu1 %vm417_vm1, %v11789_v46  ;;  %15287 = vst [vmem:[#allocation21_spill] sm:$0xff] %v11856_v51  ;;  %v860_v52 = vrot.slane %v15292_v36, 4  ;;  %v11876_v49 = vpack.c.bf16 %v11873_v61, %v350_v32  ;;  %v15029_v36 = vshrl.u32 %v11862_v38, 16 }
  0x58   : > { %9681 = vmatprep.mubr.msk.bf16.mxu0 %vm417_vm1, %v11735_v47  ;;  %9655 = vmatprep.mubr.msk.bf16.mxu1 %vm417_vm1, %v11802_v4  ;;  %v347_v47 = vld [vmem:[%s11460_s14 + $0x140] sm:$0xff] }
  0x5f   : > { %9682 = vmatmul.mubr.msk.bf16.gmra.mrb[12].mxu0 %vm417_vm1, %v11771_v37  ;;  %v346_v37 = vld [vmem:[%s11460_s14 + $0x138] sm:$0xff] }
  0x60   : > { %9685 = vmatprep.mubr.msk.bf16.mxu0 %vm417_vm1, %v11778_v17  ;;  %v842_v17 = vrot.slane %v15011_v42, 4  ;;  %v11831_v14 = vpack.c.bf16 %v347_v47, %v346_v37 }
  0x62   : > { %9656 = vmatmul.mubr.msk.bf16.gmra.mrb[12].mxu1 %vm417_vm1, %v11831_v14  ;;  %v843_v42 = vor.u32 %v842_v17, %v839_v57  ;;  %v15288_v57 = vshll.u32 %v11818_v3, 16  ;;  %v875_v3 = vrot.slane %v15029_v36, 3  ;;  %v11931_v36 = vpack.c.bf16 %v348_v26, %v347_v47 }
  0x63   : > { %9659 = vmatprep.mubr.msk.bf16.mxu1 %vm417_vm1, %v11844_v11 }
  0x64   : > { %v851_v17 = vrot.slane %v15288_v57, 4  ;;  %v353_v57 = vld [vmem:[%s11460_s14 + $0x170] sm:$0xff] }
  0x67   : > { %9686 = vmatmul.mubr.msk.bf16.gmra.mrb[16].mxu0 %vm417_vm1, %v11811_v18  ;;  %v11865_v18 = vsel %vm719_vm2, %v834_v44, %v843_v42  ;;  %v352_v44 = vld [vmem:[%s11460_s14 + $0x168] sm:$0xff] }
  0x68   : > { %9689 = vmatprep.mubr.msk.bf16.mxu0 %vm417_vm1, %v11821_v23  ;;  %15290 = vst [vmem:[#allocation23_spill] sm:$0xff] %v11865_v18  ;;  %v15291_v23 = vshrl.u32 %v11827_v24, 16  ;;  %v11888_v24 = vpack.c.bf16 %v353_v57, %v352_v44 }
  0x6a   : > { %v857_v50 = vrot.slane %v15291_v23, 3  ;;  %v852_v23 = vor.u32 %v851_v17, %v848_v20  ;;  %9660 = vmatmul.mubr.msk.bf16.gmra.mrb[16].mxu1 %vm417_vm1, %v11876_v49  ;;  %v11899_v17 = vpack.c.bf16 %v344_v15, %v11786_v0 }
  0x6b   : > { %9663 = vmatprep.mubr.msk.bf16.mxu1 %vm417_vm1, %v11888_v24 }
  0x6c   : > { %v861_v63 = vor.u32 %v860_v52, %v857_v50  ;;  %15295 = vst [vmem:[#allocation24_spill] sm:$0xff] %v11899_v17  ;;  %v11902_v62 = vsel %vm719_vm2, %v843_v42, %v852_v23  ;;  %v15297_v50 = vshll.u32 %v11862_v38, 16  ;;  %v15034_v0 = vshrl.u32 %v11899_v17, 16 }
  0x6d   : > { %15296 = vst [vmem:[#allocation25_spill] sm:$0xff] %v11902_v62 }
  0x6e   : > { %v878_v52 = vrot.slane %v15297_v50, 4  ;;  %v11909_v27 = vsel %vm719_vm2, %v852_v23, %v861_v63  ;;  %v15037_v50 = vshll.u32 %v11899_v17, 16 }
  0x6f   : > { %9690 = vmatmul.mubr.msk.bf16.gmra.mrb[20].mxu0 %vm417_vm1, %v11856_v51  ;;  %v866_v51 = vrot.slane %v15293_v25, 3  ;;  %15298 = vst [vmem:[#allocation26_spill] sm:$0xff] %v11909_v27  ;;  %v11912_v25 = vpack.c.bf16 %v346_v37, %v11795_v58 }
  0x70   : > { %9693 = vmatprep.mubr.msk.bf16.mxu0 %vm417_vm1, %v11865_v18  ;;  %v15294_v18 = vshll.u32 %v11853_v33, 16  ;;  %v354_v33 = vld [vmem:[%s11460_s14 + $0x178] sm:$0xff]  ;;  %v879_v23 = vor.u32 %v878_v52, %v875_v3  ;;  %v884_v3 = vrot.slane %v15034_v0, 3  ;;  %v887_v58 = vrot.slane %v15037_v50, 4 }
  0x71   : > { %15299 = vst [vmem:[#allocation27_spill] sm:$0xff] %v11912_v25  ;;  %v15302_v37 = vshrl.u32 %v11912_v25, 16  ;;  %v11954_v0 = vpack.c.bf16 %v350_v32, %v11837_v10  ;;  %v15306_v10 = vshll.u32 %v11482_v16, 16 }
  0x72   : > { %v869_v20 = vrot.slane %v15294_v18, 4  ;;  %v11916_v18 = vld [vmem:[%s11460_s14 + $0x180] sm:$0xff]  ;;  %v888_v32 = vor.u32 %v887_v58, %v884_v3  ;;  %v11980_v58 = vpack.c.bf16 %v354_v33, %v353_v57  ;;  %v1283_v57 = vshll.u32 %v11537_v34, 16 }
  0x73   : > { %v11919_v15 = vpack.c.bf16 %v11916_v18, %v354_v33  ;;  %v1778_v17 = vrot.slane %v15306_v10, 4  ;;  %v15053_v50 = vshrl.u32 %v11954_v0, 16  ;;  %v15054_v19 = vshll.u32 %v11954_v0, 16 }
  0x74   : > { %v870_v42 = vor.u32 %v869_v20, %v866_v51  ;;  %v15038_v51 = vshrl.u32 %v11497_v21, 16  ;;  %15309 = vst [vmem:[#allocation30_spill] sm:$0xff] %v11980_v58  ;;  %v11983_v3 = vsel %vm719_vm2, %v879_v23, %v888_v32  ;;  %v1276_v33 = vshll.u32 %v11500_v22, 16 }
  0x75   : > { %9664 = vmatmul.mubr.msk.bf16.gmra.mrb[20].mxu1 %vm417_vm1, %v11919_v15  ;;  %15310 = vst [vmem:[#allocation31_spill] sm:$0xff] %v11983_v3  ;;  %v1790_v10 = vrot.slane %v1283_v57, 4 }
  0x76   : > { %v11936_v20 = vsel %vm719_vm2, %v861_v63, %v870_v42  ;;  %v11941_v52 = vsel %vm719_vm2, %v870_v42, %v879_v23  ;;  %v1781_v26 = vrot.slane %v15038_v51, 3  ;;  %v15303_v63 = vshll.u32 %v11912_v25, 16 }
  0x77   : > { %9694 = vmatmul.mubr.msk.bf16.gmra.mrb[24].mxu0 %vm417_vm1, %v11902_v62  ;;  %v15039_v62 = vshll.u32 %v11497_v21, 16  ;;  %15300 = vst [vmem:[#allocation28_spill] sm:$0xff] %v11936_v20  ;;  %15301 = vst [vmem:[#allocation29_spill] sm:$0xff] %v11941_v52  ;;  %v15049_v42 = vshrl.u32 %v11482_v16, 16  ;;  %v15304_v51 = vshrl.u32 %v11472_v12, 16 }
  0x78   : > { %9697 = vmatprep.mubr.msk.bf16.mxu0 %vm417_vm1, %v11909_v27  ;;  %v893_v27 = vrot.slane %v15302_v37, 3  ;;  %v896_v38 = vrot.slane %v15303_v63, 4  ;;  %v15305_v37 = vshll.u32 %v11472_v12, 16  ;;  %v15307_v12 = vshrl.u32 %v11931_v36, 16 }
  0x79   : > { %v1782_v47 = vrot.slane %v15039_v62, 4  ;;  %v1774_v62 = vrot.slane %v15304_v51, 3  ;;  %v1777_v63 = vrot.slane %v15049_v42, 3  ;;  %v15308_v42 = vshll.u32 %v11931_v36, 16 }
  0x7a   : > { %v1775_v54 = vrot.slane %v15305_v37, 4  ;;  %v902_v37 = vrot.slane %v15307_v12, 3  ;;  %v15060_v12 = vshll.u32 %v11980_v58, 16 }
  0x7b   : > { %v1783_v25 = vor.u32 %v1782_v47, %v1781_v26  ;;  %v1779_v59 = vor.u32 %v1778_v17, %v1777_v63  ;;  %v905_v31 = vrot.slane %v15308_v42, 4  ;;  %v15056_v17 = vshrl.u32 %v11537_v34, 16 }
  0x7c   : > { %v1776_v51 = vor.u32 %v1775_v54, %v1774_v62  ;;  %v911_v54 = vrot.slane %v15053_v50, 3  ;;  %v1786_v63 = vrot.slane %v1276_v33, 4  ;;  %v387_v26 = vpack.c.bf16 %v11916_v18, %v11916_v18 }
  0x7d   : > { %v11989_v62 = vsel %vm719_vm2, %v1779_v59, %v1783_v25 }
  0x7f   : > { %9698 = vmatmul.mubr.msk.bf16.gmra.mrb[28].mxu0 %vm417_vm1, %v11936_v20  ;;  %v897_v20 = vor.u32 %v896_v38, %v893_v27  ;;  %v11986_v27 = vsel %vm719_vm2, %v1776_v51, %v1779_v59  ;;  %v906_v59 = vor.u32 %v905_v31, %v902_v37 }
  0x80   : > { %9701 = vmatprep.mubr.msk.bf16.mxu0 %vm417_vm1, %v11941_v52  ;;  %v11978_v52 = vpack.c.bf16 %v352_v44, %v11873_v61  ;;  %v914_v61 = vrot.slane %v15054_v19, 4  ;;  %v1280_v44 = vshrl.u32 %v11500_v22, 16 }
  0x81   : > { %v11992_v38 = vsel %vm719_vm2, %v888_v32, %v897_v20  ;;  %v1789_v32 = vrot.slane %v15056_v17, 3  ;;  %v12013_v37 = vsel %vm719_vm2, %v897_v20, %v906_v59  ;;  %v15313_v17 = vshrl.u32 %v11980_v58, 16 }
  0x82   : > { %15311 = vst [vmem:[#allocation32_spill] sm:$0xff] %v11992_v38  ;;  %v15058_v23 = vshrl.u32 %v11978_v52, 16  ;;  %v15059_v47 = vshll.u32 %v11978_v52, 16  ;;  %v1785_v42 = vrot.slane %v1280_v44, 3  ;;  %v915_v51 = vor.u32 %v914_v61, %v911_v54  ;;  %15312 = vst [vmem:[#allocation33_spill] sm:$0xff] %v12013_v37 }
  0x83   : > { %v1791_v31 = vor.u32 %v1790_v10, %v1789_v32  ;;  %v1294_v32 = vshrl.u32 %v11541_v35, 16 }
  0x84   : > { %v1787_v50 = vor.u32 %v1786_v63, %v1785_v42  ;;  %v920_v19 = vrot.slane %v15058_v23, 3  ;;  %v923_v22 = vrot.slane %v15059_v47, 4  ;;  %v12030_v20 = vsel %vm719_vm2, %v906_v59, %v915_v51 }
  0x85   : > { %v932_v42 = vrot.slane %v15060_v12, 4  ;;  %v1290_v63 = vshll.u32 %v11541_v35, 16  ;;  %v939_v23 = vshll.u32 %v387_v26, 16 }
  0x86   : > { %v12024_v54 = vsel %vm719_vm2, %v1783_v25, %v1787_v50  ;;  %v12027_v61 = vsel %vm719_vm2, %v1787_v50, %v1791_v31  ;;  %v924_v25 = vor.u32 %v923_v22, %v920_v19  ;;  %v936_v50 = vshrl.u32 %v387_v26, 16 }
  0x87   : > { %9702 = vmatmul.mubr.msk.bf16.gmra.mrb[32].mxu0 %vm417_vm1, %v11983_v3  ;;  %v1794_v10 = vrot.slane %v1290_v63, 4  ;;  %v941_v3 = vrot.slane %v939_v23, 4  ;;  %v15315_v26 = vshll.u32 %v11497_v21, 16 }
  0x88   : > { %9705 = vmatprep.mubr.msk.bf16.mxu0 %vm417_vm1, %v11992_v38  ;;  %v929_v38 = vrot.slane %v15313_v17, 3  ;;  %v1793_v17 = vrot.slane %v1294_v32, 3  ;;  %v12049_v35 = vsel %vm719_vm2, %v915_v51, %v924_v25 }
  0x89   : > { %v1271_v51 = vrot.slane %v15315_v26, 1 }
  0x8a   : > { %v12040_v59 = vor.u32 %v932_v42, %v929_v38  ;;  %v12042_v47 = vor.u32 %v1794_v10, %v1793_v17  ;;  %v15314_v38 = vshrl.u32 %v11482_v16, 16  ;;  %v15316_v16 = vshrl.u32 %v11497_v21, 16 }
  0x8b   : > { %v1285_v10 = vrot.slane %v1283_v57, 1 }
  0x8c   : > { %v12046_v12 = vsel %vm719_vm2, %v1791_v31, %v12042_v47  ;;  %v12053_v58 = vsel %vm719_vm2, %v924_v25, %v12040_v59  ;;  %v1268_v23 = vor.u32 %v15314_v38, %v11666_v6  ;;  %v8730_v31 = vld [vmem:[%s14975_s1 + $0x10] sm:$0xf]  ;;  %v1275_v6 = vor.u32 %v15316_v16, %v1271_v51 }
  0x8d   : > { %v12075_v42 = vpack.c.bf16 %v8730_v31, %v8730_v31 }
  0x8f   : > { %9706 = vmatmul.mubr.msk.bf16.gmra.mrb[36].mxu0 %vm417_vm1, %v12013_v37  ;;  %v938_v37 = vrot.slane %v936_v50, 3 }
  0x90   : > { %9709 = vmatprep.mubr.msk.bf16.mxu0 %vm417_vm1, %v12030_v20 }
  0x91   : > { %v942_v22 = vor.u32 %v941_v3, %v938_v37  ;;  %v1956_v3 = vsel %vm490_vm0, %v11662_v1, 0  ;;  %v1272_v37 = vsel %vm1248_vm3, %v1268_v23, %v1271_v51  ;;  %v15079_v23 = vshrl.u32 %v11559_v41, 16 }
  0x92   : > { %v15067_v51 = vshll.u32 %v11583_v53, 16 }
  0x93   : > { %v943_v19 = vsel %vm719_vm2, %v12040_v59, %v942_v22 }
  0x97   : > { %9710 = vmatmul.mubr.msk.bf16.gmra.mrb[40].mxu0 %vm417_vm1, %v12049_v35 }
  0x98   : > { %9713 = vmatprep.mubr.msk.bf16.mxu0 %vm417_vm1, %v12053_v58 }
  0x9f   : > { %9714 = vmatmul.mubr.msk.bf16.gmra.mrb[44].mxu0 %vm417_vm1, %v943_v19  ;;  %v15071_v19 = vshll.u32 %v11563_v43, 16 }
  0xa0   : > { %9719 = vmatprep.mubr.msk.bf16.mxu0 %vm417_vm1, %v11670_v2  ;;  %v1278_v2 = vrot.slane %v1276_v33, 1  ;;  %v1292_v33 = vrot.slane %v1290_v63, 1  ;;  %v15073_v63 = vshrl.u32 %v11563_v43, 16 }
  0xa2   : > { %v1282_v17 = vor.u32 %v1280_v44, %v1278_v2  ;;  %v12085_v1 = vsel %vm1248_vm3, %v1275_v6, %v1278_v2  ;;  %v15317_v44 = vshrl.u32 %v11537_v34, 16  ;;  %v1296_v50 = vor.u32 %v1294_v32, %v1292_v33 }
  0xa3   : > { %v1306_v32 = vrot.slane %v15071_v19, 1  ;;  %v15066_v2 = vshll.u32 %v11589_v56, 16  ;;  %v15070_v6 = vshrl.u32 %v11583_v53, 16  ;;  %v15082_v19 = vshrl.u32 %v11518_v29, 16 }
  0xa4   : > { %v12088_v25 = vsel %vm1248_vm3, %v1282_v17, %v1285_v10  ;;  %v1289_v57 = vor.u32 %v15317_v44, %v1285_v10  ;;  %v15069_v10 = vshrl.u32 %v11589_v56, 16 }
  0xa5   : > { %v1320_v44 = vrot.slane %v15066_v2, 1 }
  0xa6   : > { %v12101_v38 = vsel %vm1248_vm3, %v1289_v57, %v1292_v33  ;;  %v15068_v33 = vshll.u32 %v11616_v8, 16 }
  0xa7   : > { %9720 = vmatmul.mubr.msk.bf16.vlgmr.msra.gmra.mrb[0].mxu0 %vm417_vm1, %v11683_v30  ;;  %v15077_v30 = vshll.u32 %v11559_v41, 16  ;;  %15318 = vst [vmem:[#allocation34_spill] sm:$0xff] %v12101_v38 }
  0xa8   : > { %9768 = vmatpush3.bf16.msra.mxu0 %v1956_v3  ;;  %9723 = vmatprep.mubr.msk.bf16.mxu0 %vm417_vm1, %v1272_v37  ;;  %v1310_v3 = vor.u32 %v15073_v63, %v1306_v32  ;;  %v1313_v37 = vrot.slane %v15067_v51, 1  ;;  %v15075_v51 = vshrl.u32 %v11513_v28, 16  ;;  %v15081_v63 = vshrl.u32 %v11728_v39, 16 }
  0xa9   : > { %11362 = vmatprep.subr.msk.bf16.mxu0 %vm490_vm0, %v12075_v42  ;;  %v1299_v22 = vrot.slane %v15077_v30, 1  ;;  %v15088_v30 = vshrl.u32 %v11746_v40, 16 }
  0xaa   : > { %v12127_v17 = vsel %vm1248_vm3, %v1310_v3, %v1313_v37  ;;  %v1317_v57 = vor.u32 %v15070_v6, %v1313_v37  ;;  %v15076_v3 = vshrl.u32 %v11616_v8, 16  ;;  %v15074_v37 = vshll.u32 %v11518_v29, 16 }
  0xab   : > { %v12105_v26 = vsel %vm1248_vm3, %v1296_v50, %v1299_v22  ;;  %v1303_v31 = vor.u32 %v15079_v23, %v1299_v22  ;;  %15321 = vst [vmem:[#allocation37_spill] sm:$0xff] %v12127_v17  ;;  %v1324_v50 = vor.u32 %v15069_v10, %v1320_v44  ;;  %v1327_v22 = vrot.slane %v15068_v33, 1 }
  0xac   : > { %15319 = vst [vmem:[#allocation35_spill] sm:$0xff] %v12105_v26  ;;  %v15078_v10 = vshll.u32 %v11728_v39, 16  ;;  %v15087_v23 = vshrl.u32 %v11758_v13, 16 }
  0xad   : > { %v12123_v16 = vsel %vm1248_vm3, %v1303_v31, %v1306_v32  ;;  %v15072_v32 = vshll.u32 %v11513_v28, 16  ;;  %v12145_v31 = vsel %vm1248_vm3, %v1317_v57, %v1320_v44  ;;  %v12149_v2 = vsel %vm1248_vm3, %v1324_v50, %v1327_v22 }
  0xae   : > { %15320 = vst [vmem:[#allocation36_spill] sm:$0xff] %v12123_v16  ;;  %15322 = vst [vmem:[#allocation38_spill] sm:$0xff] %v12145_v31  ;;  %v1331_v44 = vor.u32 %v15076_v3, %v1327_v22  ;;  %v1341_v50 = vrot.slane %v15074_v37, 1  ;;  %v15080_v22 = vshll.u32 %v11746_v40, 16  ;;  %v1348_v37 = vrot.slane %v15078_v10, 1 }
  0xaf   : > { %9724 = vmatmul.mubr.msk.bf16.gmra.mrb[4].mxu0 %vm417_vm1, %v12085_v1  ;;  %15323 = vst [vmem:[#allocation39_spill] sm:$0xff] %v12149_v2  ;;  %v1334_v33 = vrot.slane %v15072_v32, 1 }
  0xb0   : > { %9727 = vmatprep.mubr.msk.bf16.mxu0 %vm417_vm1, %v12088_v25 }
  0xb1   : > { %v1338_v57 = vor.u32 %v15075_v51, %v1334_v33  ;;  %v12167_v6 = vsel %vm1248_vm3, %v1331_v44, %v1334_v33  ;;  %v1345_v33 = vor.u32 %v15082_v19, %v1341_v50  ;;  %v1352_v44 = vor.u32 %v15081_v63, %v1348_v37 }
  0xb2   : > { %15324 = vst [vmem:[#allocation40_spill] sm:$0xff] %v12167_v6  ;;  %v15084_v51 = vshll.u32 %v11758_v13, 16  ;;  %v15090_v63 = vshll.u32 %v11802_v4, 16 }
  0xb3   : > { %v12171_v32 = vsel %vm1248_vm3, %v1338_v57, %v1341_v50  ;;  %v1355_v57 = vrot.slane %v15080_v22, 1  ;;  %v12189_v3 = vsel %vm1248_vm3, %v1345_v33, %v1348_v37  ;;  %v15086_v50 = vshll.u32 %v11789_v46, 16 }
  0xb4   : > { %15325 = vst [vmem:[#allocation41_spill] sm:$0xff] %v12171_v32  ;;  %15326 = vst [vmem:[#allocation42_spill] sm:$0xff] %v12189_v3  ;;  %v1362_v22 = vrot.slane %v15084_v51, 1 }
  0xb5   : > { %v12193_v10 = vsel %vm1248_vm3, %v1352_v44, %v1355_v57  ;;  %v1359_v37 = vor.u32 %v15088_v30, %v1355_v57  ;;  %v1369_v44 = vrot.slane %v15086_v50, 1  ;;  %v15092_v57 = vshll.u32 %v11831_v14, 16 }
  0xb6   : > { %15327 = vst [vmem:[#allocation43_spill] sm:$0xff] %v12193_v10  ;;  %v1366_v33 = vor.u32 %v15087_v23, %v1362_v22  ;;  %v1376_v50 = vrot.slane %v15090_v63, 1  ;;  %v15096_v23 = vshll.u32 %v11844_v11, 16 }
  0xb7   : > { %9728 = vmatmul.mubr.msk.bf16.gmra.mrb[8].mxu0 %vm417_vm1, %v12101_v38  ;;  %v12211_v19 = vsel %vm1248_vm3, %v1359_v37, %v1362_v22 }
  0xb8   : > { %9731 = vmatprep.mubr.msk.bf16.mxu0 %vm417_vm1, %v12105_v26  ;;  %15328 = vst [vmem:[#allocation44_spill] sm:$0xff] %v12211_v19  ;;  %v12215_v51 = vsel %vm1248_vm3, %v1366_v33, %v1369_v44  ;;  %v1383_v33 = vrot.slane %v15092_v57, 1  ;;  %v1390_v57 = vrot.slane %v15096_v23, 1 }
  0xb9   : > { %15329 = vst [vmem:[#allocation45_spill] sm:$0xff] %v12215_v51 }
  0xbf   : > { %9732 = vmatmul.mubr.msk.bf16.gmra.mrb[12].mxu0 %vm417_vm1, %v12123_v16  ;;  %v15387_v16 = vshrl.u32 %v11591_v60, 16 }
  0xc0   : > { %9735 = vmatprep.mubr.msk.bf16.mxu0 %vm417_vm1, %v12127_v17 }
  0xc7   : > { %9736 = vmatmul.mubr.msk.bf16.gmra.mrb[16].mxu0 %vm417_vm1, %v12145_v31 }
  0xc8   : > { %9739 = vmatprep.mubr.msk.bf16.mxu0 %vm417_vm1, %v12149_v2 }
  0xcf   : > { %9740 = vmatmul.mubr.msk.bf16.gmra.mrb[20].mxu0 %vm417_vm1, %v12167_v6 }
  0xd0   : > { %9743 = vmatprep.mubr.msk.bf16.mxu0 %vm417_vm1, %v12171_v32 }
  0xd7   : > { %9744 = vmatmul.mubr.msk.bf16.gmra.mrb[24].mxu0 %vm417_vm1, %v12189_v3  ;;  %v15094_v3 = vshrl.u32 %v11789_v46, 16 }
  0xd8   : > { %9747 = vmatprep.mubr.msk.bf16.mxu0 %vm417_vm1, %v12193_v10  ;;  %v15093_v10 = vshrl.u32 %v11802_v4, 16 }
  0xd9   : > { %v1373_v22 = vor.u32 %v15094_v3, %v1369_v44  ;;  %v15099_v44 = vshll.u32 %v11876_v49, 16 }
  0xda   : > { %v1380_v37 = vor.u32 %v15093_v10, %v1376_v50  ;;  %v15102_v10 = vshll.u32 %v11888_v24, 16 }
  0xdb   : > { %v12233_v30 = vsel %vm1248_vm3, %v1373_v22, %v1376_v50 }
  0xdc   : > { %15330 = vst [vmem:[#allocation46_spill] sm:$0xff] %v12233_v30  ;;  %v12237_v63 = vsel %vm1248_vm3, %v1380_v37, %v1383_v33  ;;  %v1397_v37 = vrot.slane %v15099_v44, 1  ;;  %v1404_v44 = vrot.slane %v15102_v10, 1  ;;  %v15106_v10 = vshrl.u32 %v11919_v15, 16 }
  0xdd   : > { %15331 = vst [vmem:[#allocation47_spill] sm:$0xff] %v12237_v63 }
  0xdf   : > { %9748 = vmatmul.mubr.msk.bf16.gmra.mrb[28].mxu0 %vm417_vm1, %v12211_v19  ;;  %v15098_v19 = vshrl.u32 %v11831_v14, 16 }
  0xe0   : > { %9751 = vmatprep.mubr.msk.bf16.mxu0 %vm417_vm1, %v12215_v51  ;;  %v15100_v51 = vshrl.u32 %v11844_v11, 16 }
  0xe1   : > { %v1387_v50 = vor.u32 %v15098_v19, %v1383_v33  ;;  %v15105_v33 = vshll.u32 %v11919_v15, 16  ;;  %v12264_v19 = vld [vmem:[%s11460_s14 + $0x188] sm:$0xff] }
  0xe2   : > { %v1394_v22 = vor.u32 %v15100_v51, %v1390_v57 }
  0xe3   : > { %v12255_v3 = vsel %vm1248_vm3, %v1387_v50, %v1390_v57  ;;  %v1244_v50 = vpack.c.bf16 %v12264_v19, %v12264_v19  ;;  %v1411_v51 = vrot.slane %v15105_v33, 1 }
  0xe4   : > { %15332 = vst [vmem:[#allocation48_spill] sm:$0xff] %v12255_v3  ;;  %v12259_v23 = vsel %vm1248_vm3, %v1394_v22, %v1397_v37 }
  0xe5   : > { %15333 = vst [vmem:[#allocation49_spill] sm:$0xff] %v12259_v23  ;;  %v1417_v32 = vshll.u32 %v1244_v50, 16  ;;  %v2287_v50 = vsel %vm490_vm0, %v12075_v42, 0  ;;  %v15339_v42 = vshrl.u32 %v11563_v43, 16 }
  0xe7   : > { %9752 = vmatmul.mubr.msk.bf16.gmra.mrb[32].mxu0 %vm417_vm1, %v12233_v30  ;;  %v15108_v30 = vshrl.u32 %v11876_v49, 16  ;;  %v1419_v33 = vrot.slane %v1417_v32, 1  ;;  %v15338_v32 = vshll.u32 %v11559_v41, 16 }
  0xe8   : > { %9755 = vmatprep.mubr.msk.bf16.mxu0 %vm417_vm1, %v12237_v63  ;;  %v15107_v63 = vshrl.u32 %v11888_v24, 16 }
  0xe9   : > { %v1401_v57 = vor.u32 %v15108_v30, %v1397_v37  ;;  %v12293_v37 = vor.u32 %v15106_v10, %v1411_v51 }
  0xea   : > { %v1408_v22 = vor.u32 %v15107_v63, %v1404_v44  ;;  %v15342_v63 = vshll.u32 %v11583_v53, 16 }
  0xeb   : > { %15336 = vst [vmem:[#allocation52_spill] sm:$0xff] %v12293_v37 }
  0xef   : > { %9756 = vmatmul.mubr.msk.bf16.gmra.mrb[36].mxu0 %vm417_vm1, %v12255_v3  ;;  %v12281_v3 = vsel %vm1248_vm3, %v1401_v57, %v1404_v44  ;;  %v1420_v44 = vsel %vm1248_vm3, %v12293_v37, %v1419_v33  ;;  %v8755_v57 = vld [vmem:[%s14975_s1 + $0x14] sm:$0xf]  ;;  %v1798_v33 = vrot.slane %v15338_v32, 4 }
  0xf0   : > { %9759 = vmatprep.mubr.msk.bf16.mxu0 %vm417_vm1, %v12259_v23  ;;  %15334 = vst [vmem:[#allocation50_spill] sm:$0xff] %v12281_v3  ;;  %v12285_v23 = vsel %vm1248_vm3, %v1408_v22, %v1411_v51  ;;  %v12305_v22 = vpack.c.bf16 %v8755_v57, %v8755_v57  ;;  %v15340_v57 = vshll.u32 %v11563_v43, 16 }
  0xf1   : > { %15335 = vst [vmem:[#allocation51_spill] sm:$0xff] %v12285_v23 }
  0xf2   : > { %v1802_v10 = vrot.slane %v15340_v57, 4  ;;  %v15343_v57 = vshrl.u32 %v11589_v56, 16 }
  0xf7   : > { %9760 = vmatmul.mubr.msk.bf16.gmra.mrb[40].mxu0 %vm417_vm1, %v12281_v3  ;;  %v15370_v3 = vshll.u32 %v11919_v15, 16 }
  0xf8   : > { %9763 = vmatprep.mubr.msk.bf16.mxu0 %vm417_vm1, %v12285_v23  ;;  %v1809_v23 = vrot.slane %v15343_v57, 3 }
  0xff   : > { %9764 = vmatmul.mubr.msk.bf16.gmra.mrb[44].mxu0 %vm417_vm1, %v1420_v44  ;;  %v1801_v44 = vrot.slane %v15339_v42, 3  ;;  %v1806_v42 = vrot.slane %v15342_v63, 4  ;;  %v15346_v63 = vshll.u32 %v11616_v8, 16 }
 0x100   : > { %9769 = vmatprep.mubr.msk.bf16.mxu0 %vm417_vm1, %v11986_v27  ;;  %v15337_v27 = vshrl.u32 %v11559_v41, 16 }
 0x102   : > { %v1797_v51 = vrot.slane %v15337_v27, 3  ;;  %v15341_v27 = vshrl.u32 %v11583_v53, 16 }
 0x104   : > { %v1805_v32 = vrot.slane %v15341_v27, 3  ;;  %v15347_v27 = vshrl.u32 %v11513_v28, 16 }
 0x106   : > { %v1817_v57 = vrot.slane %v15347_v27, 3 }
 0x107   : > { %9770 = vmatmul.mubr.msk.bf16.vlgmr.msra.gmra.mrb[0].mxu0 %vm417_vm1, %v11989_v62  ;;  %v1799_v62 = vor.u32 %v1798_v33, %v1797_v51  ;;  %v15345_v51 = vshrl.u32 %v11616_v8, 16 }
 0x108   : > { %9818 = vmatpush3.bf16.msra.mxu0 %v2287_v50  ;;  %9773 = vmatprep.mubr.msk.bf16.mxu0 %vm417_vm1, %v12024_v54  ;;  %v1803_v54 = vor.u32 %v1802_v10, %v1801_v44  ;;  %v1814_v44 = vrot.slane %v15346_v63, 4  ;;  %v15351_v63 = vshrl.u32 %v11728_v39, 16 }
 0x109   : > { %11363 = vmatprep.subr.msk.bf16.mxu0 %vm490_vm0, %v12305_v22  ;;  %v1800_v50 = vsel %vm719_vm2, %v12042_v47, %v1799_v62  ;;  %v1813_v33 = vrot.slane %v15345_v51, 3 }
 0x10a   : > { %v1804_v30 = vsel %vm719_vm2, %v1799_v62, %v1803_v54  ;;  %v1825_v27 = vrot.slane %v15351_v63, 3 }
 0x10f   : > { %9774 = vmatmul.mubr.msk.bf16.gmra.mrb[4].mxu0 %vm417_vm1, %v12027_v61  ;;  %v15344_v61 = vshll.u32 %v11589_v56, 16 }
 0x110   : > { %9777 = vmatprep.mubr.msk.bf16.mxu0 %vm417_vm1, %v12046_v12  ;;  %v1807_v12 = vor.u32 %v1806_v42, %v1805_v32  ;;  %v15350_v42 = vshll.u32 %v11518_v29, 16 }
 0x111   : > { %v1810_v37 = vrot.slane %v15344_v61, 4  ;;  %v15348_v61 = vshll.u32 %v11513_v28, 16 }
 0x112   : > { %v1808_v10 = vsel %vm719_vm2, %v1803_v54, %v1807_v12  ;;  %v15349_v54 = vshrl.u32 %v11518_v29, 16 }
 0x113   : > { %v1811_v47 = vor.u32 %v1810_v37, %v1809_v23 }
 0x114   : > { %v1821_v32 = vrot.slane %v15349_v54, 3 }
 0x115   : > { %v1812_v62 = vsel %vm719_vm2, %v1807_v12, %v1811_v47  ;;  %v1822_v12 = vrot.slane %v15350_v42, 4  ;;  %v15355_v42 = vshrl.u32 %v11758_v13, 16 }
 0x117   : > { %9778 = vmatmul.mubr.msk.bf16.gmra.mrb[8].mxu0 %vm417_vm1, %v1800_v50  ;;  %v1818_v50 = vrot.slane %v15348_v61, 4  ;;  %v15352_v61 = vshll.u32 %v11728_v39, 16  ;;  %v1833_v63 = vrot.slane %v15355_v42, 3 }
 0x118   : > { %9781 = vmatprep.mubr.msk.bf16.mxu0 %vm417_vm1, %v1804_v30  ;;  %v1815_v30 = vor.u32 %v1814_v44, %v1813_v33  ;;  %v1823_v33 = vor.u32 %v1822_v12, %v1821_v32 }
 0x119   : > { %v1819_v23 = vor.u32 %v1818_v50, %v1817_v57  ;;  %v15354_v50 = vshll.u32 %v11746_v40, 16 }
 0x11a   : > { %v1816_v37 = vsel %vm719_vm2, %v1811_v47, %v1815_v30 }
 0x11b   : > { %v1820_v51 = vsel %vm719_vm2, %v1815_v30, %v1819_v23  ;;  %v1824_v44 = vsel %vm719_vm2, %v1819_v23, %v1823_v33  ;;  %v1830_v30 = vrot.slane %v15354_v50, 4  ;;  %v15359_v50 = vshrl.u32 %v11802_v4, 16 }
 0x11d   : > { %v1841_v42 = vrot.slane %v15359_v50, 3 }
 0x11f   : > { %9782 = vmatmul.mubr.msk.bf16.gmra.mrb[12].mxu0 %vm417_vm1, %v1808_v10  ;;  %v1826_v10 = vrot.slane %v15352_v61, 4  ;;  %v15356_v61 = vshll.u32 %v11758_v13, 16 }
 0x120   : > { %9785 = vmatprep.mubr.msk.bf16.mxu0 %vm417_vm1, %v1812_v62  ;;  %v15353_v62 = vshrl.u32 %v11746_v40, 16 }
 0x121   : > { %v1827_v47 = vor.u32 %v1826_v10, %v1825_v27  ;;  %v15358_v10 = vshll.u32 %v11789_v46, 16 }
 0x122   : > { %v1829_v57 = vrot.slane %v15353_v62, 3 }
 0x123   : > { %v1828_v54 = vsel %vm719_vm2, %v1823_v33, %v1827_v47  ;;  %v1838_v33 = vrot.slane %v15358_v10, 4  ;;  %v15363_v10 = vshrl.u32 %v11844_v11, 16 }
 0x124   : > { %v1831_v32 = vor.u32 %v1830_v30, %v1829_v57 }
 0x125   : > { %v1849_v50 = vrot.slane %v15363_v10, 3 }
 0x126   : > { %v1832_v12 = vsel %vm719_vm2, %v1827_v47, %v1831_v32 }
 0x127   : > { %9786 = vmatmul.mubr.msk.bf16.gmra.mrb[16].mxu0 %vm417_vm1, %v1816_v37  ;;  %v1834_v37 = vrot.slane %v15356_v61, 4  ;;  %v15360_v61 = vshll.u32 %v11802_v4, 16 }
 0x128   : > { %9789 = vmatprep.mubr.msk.bf16.mxu0 %vm417_vm1, %v1820_v51  ;;  %v15357_v51 = vshrl.u32 %v11789_v46, 16 }
 0x129   : > { %v1835_v23 = vor.u32 %v1834_v37, %v1833_v63  ;;  %v15362_v37 = vshll.u32 %v11831_v14, 16 }
 0x12a   : > { %v1837_v27 = vrot.slane %v15357_v51, 3 }
 0x12b   : > { %v1836_v62 = vsel %vm719_vm2, %v1831_v32, %v1835_v23  ;;  %v1846_v32 = vrot.slane %v15362_v37, 4 }
 0x12c   : > { %v1839_v47 = vor.u32 %v1838_v33, %v1837_v27  ;;  %v12399_v33 = vld [vmem:[%s11460_s14 + $0x190] sm:$0xff] }
 0x12d   : > { %v12408_v37 = vpack.c.bf16 %v12399_v33, %v12264_v19 }
 0x12e   : > { %v1840_v30 = vsel %vm719_vm2, %v1835_v23, %v1839_v47 }
 0x12f   : > { %9790 = vmatmul.mubr.msk.bf16.gmra.mrb[20].mxu0 %vm417_vm1, %v1824_v44  ;;  %v1842_v44 = vrot.slane %v15360_v61, 4  ;;  %v15364_v61 = vshll.u32 %v11844_v11, 16 }
 0x130   : > { %9793 = vmatprep.mubr.msk.bf16.mxu0 %vm417_vm1, %v1828_v54  ;;  %v15361_v54 = vshrl.u32 %v11831_v14, 16 }
 0x131   : > { %v1843_v57 = vor.u32 %v1842_v44, %v1841_v42  ;;  %v15365_v42 = vshrl.u32 %v11876_v49, 16 }
 0x132   : > { %v1845_v63 = vrot.slane %v15361_v54, 3 }
 0x133   : > { %v1844_v51 = vsel %vm719_vm2, %v1839_v47, %v1843_v57  ;;  %v1853_v44 = vrot.slane %v15365_v42, 3  ;;  %v15366_v47 = vshll.u32 %v11876_v49, 16  ;;  %v12420_v42 = vld [vmem:[%s11460_s14 + $0x198] sm:$0xff] }
 0x134   : > { %v1847_v27 = vor.u32 %v1846_v32, %v1845_v63  ;;  %v15367_v63 = vshrl.u32 %v11888_v24, 16  ;;  %v12506_v17 = vpack.c.bf16 %v12420_v42, %v12399_v33 }
 0x135   : > { %v1854_v54 = vrot.slane %v15366_v47, 4  ;;  %v15369_v47 = vshrl.u32 %v11919_v15, 16 }
 0x136   : > { %v1857_v32 = vrot.slane %v15367_v63, 3 }
 0x137   : > { %9794 = vmatmul.mubr.msk.bf16.gmra.mrb[24].mxu0 %vm417_vm1, %v1832_v12  ;;  %v1850_v12 = vrot.slane %v15364_v61, 4  ;;  %v15114_v61 = vshrl.u32 %v12408_v37, 16  ;;  %v1861_v63 = vrot.slane %v15369_v47, 3 }
 0x138   : > { %9797 = vmatprep.mubr.msk.bf16.mxu0 %vm417_vm1, %v1836_v62  ;;  %v1848_v62 = vsel %vm719_vm2, %v1843_v57, %v1847_v27  ;;  %v1855_v57 = vor.u32 %v1854_v54, %v1853_v44 }
 0x139   : > { %v1851_v23 = vor.u32 %v1850_v12, %v1849_v50  ;;  %v15115_v12 = vshll.u32 %v12408_v37, 16  ;;  %v1868_v54 = vrot.slane %v15114_v61, 3 }
 0x13f   : > { %9798 = vmatmul.mubr.msk.bf16.gmra.mrb[28].mxu0 %vm417_vm1, %v1840_v30  ;;  %v1852_v30 = vsel %vm719_vm2, %v1847_v27, %v1851_v23  ;;  %v1856_v27 = vsel %vm719_vm2, %v1851_v23, %v1855_v57 }
 0x140   : > { %9801 = vmatprep.mubr.msk.bf16.mxu0 %vm417_vm1, %v1844_v51  ;;  %v15368_v51 = vshll.u32 %v11888_v24, 16 }
 0x142   : > { %v1858_v10 = vrot.slane %v15368_v51, 4  ;;  %v1862_v51 = vrot.slane %v15370_v3, 4 }
 0x144   : > { %v1859_v50 = vor.u32 %v1858_v10, %v1857_v32  ;;  %v1863_v23 = vor.u32 %v1862_v51, %v1861_v63  ;;  %v15376_v51 = vld [vmem:[#allocation17_spill] sm:$0xff] }
 0x146   : > { %v1860_v44 = vsel %vm719_vm2, %v1855_v57, %v1859_v50  ;;  %v1864_v3 = vsel %vm719_vm2, %v1859_v50, %v1863_v23  ;;  %v8780_v50 = vld [vmem:[%s14975_s1 + $0x18] sm:$0xf] }
 0x147   : > { %9802 = vmatmul.mubr.msk.bf16.gmra.mrb[32].mxu0 %vm417_vm1, %v1848_v62  ;;  %v1770_v62 = vpack.c.bf16 %v12420_v42, %v12420_v42  ;;  %v3002_v63 = vpack.c.bf16 %v8780_v50, %v8780_v50 }
 0x148   : > { %9805 = vmatprep.mubr.msk.bf16.mxu0 %vm417_vm1, %v1852_v30  ;;  %v1871_v30 = vrot.slane %v15115_v12, 4 }
 0x149   : > { %v1875_v32 = vshrl.u32 %v1770_v62, 16  ;;  %v1878_v10 = vshll.u32 %v1770_v62, 16  ;;  %v15377_v62 = vld [vmem:[#allocation19_spill] sm:$0xff]  ;;  %v3042_v38 = vsel %vm490_vm0, %v3002_v63, 0 }
 0x14a   : > { %v1872_v47 = vor.u32 %v1871_v30, %v1868_v54  ;;  %v15379_v54 = vld [vmem:[#allocation22_spill] sm:$0xff]  ;;  %v15380_v30 = vld [vmem:[#allocation24_spill] sm:$0xff] }
 0x14b   : > { %v1877_v6 = vrot.slane %v1875_v32, 3  ;;  %v1880_v2 = vrot.slane %v1878_v10, 4  ;;  %v12492_v32 = vpack.c.bf16 %v12264_v19, %v11916_v18  ;;  %v15382_v10 = vshll.u32 %v11585_v55, 16 }
 0x14c   : > { %v1873_v57 = vsel %vm719_vm2, %v1863_v23, %v1872_v47  ;;  %v15381_v23 = vld [vmem:[#allocation27_spill] sm:$0xff]  ;;  %v15386_v19 = vshll.u32 %v11608_v5, 16 }
 0x14d   : > { %v1881_v61 = vor.u32 %v1880_v2, %v1877_v6  ;;  %v15371_v2 = vld [vmem:[#allocation7_spill] sm:$0xff]  ;;  %v15372_v6 = vld [vmem:[#allocation9_spill] sm:$0xff] }
 0x14f   : > { %9806 = vmatmul.mubr.msk.bf16.gmra.mrb[36].mxu0 %vm417_vm1, %v1856_v27  ;;  %v1882_v12 = vsel %vm719_vm2, %v1872_v47, %v1881_v61  ;;  %v2723_v27 = vsel %vm490_vm0, %v12305_v22, 0  ;;  %v15373_v22 = vld [vmem:[#allocation11_spill] sm:$0xff]  ;;  %v15374_v61 = vld [vmem:[#allocation13_spill] sm:$0xff]  ;;  %v2566_v47 = vrot.slane %v15382_v10, 1  ;;  %v2571_v10 = vrot.slane %v15386_v19, 1 }
 0x150   : > { %9809 = vmatprep.mubr.msk.bf16.mxu0 %vm417_vm1, %v1860_v44  ;;  %v15378_v44 = vld [vmem:[#allocation20_spill] sm:$0xff] }
 0x157   : > { %9810 = vmatmul.mubr.msk.bf16.gmra.mrb[40].mxu0 %vm417_vm1, %v1864_v3  ;;  %v15383_v3 = vld [vmem:[#allocation30_spill] sm:$0xff] }
 0x158   : > { %9813 = vmatprep.mubr.msk.bf16.mxu0 %vm417_vm1, %v1873_v57  ;;  %v15384_v57 = vshrl.u32 %v11585_v55, 16 }
 0x15a   : > { %v2567_v50 = vor.u32 %v2566_v47, %v15384_v57  ;;  %v15389_v57 = vshll.u32 %v11612_v7, 16 }
 0x15c   : > { %v2574_v33 = vrot.slane %v15389_v57, 1 }
 0x15f   : > { %9814 = vmatmul.mubr.msk.bf16.gmra.mrb[44].mxu0 %vm417_vm1, %v1882_v12  ;;  %v15375_v12 = vld [vmem:[#allocation4_spill] sm:$0xff] }
 0x160   : > { %9819 = vmatprep.mubr.msk.bf16.mxu0 %vm417_vm1, %v11585_v55  ;;  %v15388_v55 = vshrl.u32 %v11608_v5, 16 }
 0x162   : > { %v2573_v47 = vor.u32 %v2571_v10, %v15388_v55  ;;  %v15392_v55 = vshrl.u32 %v11638_v45, 16 }
 0x164   : > { %v2575_v19 = vsel %vm1248_vm3, %v2573_v47, %v2574_v33 }
 0x167   : > { %9820 = vmatmul.mubr.msk.bf16.vlgmr.msra.gmra.mrb[0].mxu0 %vm417_vm1, %v11591_v60 }
 0x168   : > { %9868 = vmatpush3.bf16.msra.mxu0 %v2723_v27  ;;  %9823 = vmatprep.mubr.msk.bf16.mxu0 %vm417_vm1, %v11608_v5  ;;  %v15385_v27 = vshll.u32 %v11591_v60, 16  ;;  %v15390_v5 = vshll.u32 %v11638_v45, 16 }
 0x169   : > { %11364 = vmatprep.subr.msk.bf16.mxu0 %vm490_vm0, %v3002_v63  ;;  %v15393_v63 = vshll.u32 %v11641_v9, 16 }
 0x16a   : > { %v2568_v31 = vrot.slane %v15385_v27, 1 }
 0x16c   : > { %v2569_v18 = vsel %vm1248_vm3, %v2567_v50, %v2568_v31  ;;  %v2570_v26 = vor.u32 %v2568_v31, %v15387_v16  ;;  %v8805_v50 = vld [vmem:[%s14975_s1 + $0x1c] sm:$0xf]  ;;  %v2577_v16 = vrot.slane %v15390_v5, 1  ;;  %v15391_v31 = vshrl.u32 %v11612_v7, 16 }
 0x16d   : > { %v12526_v60 = vpack.c.bf16 %v8805_v50, %v8805_v50 }
 0x16e   : > { %v2572_v27 = vsel %vm1248_vm3, %v2570_v26, %v2571_v10  ;;  %v2579_v26 = vor.u32 %v2577_v16, %v15392_v55  ;;  %v2580_v10 = vrot.slane %v15393_v63, 1 }
 0x16f   : > { %9824 = vmatmul.mubr.msk.bf16.gmra.mrb[4].mxu0 %vm417_vm1, %v11612_v7  ;;  %v15395_v7 = vshrl.u32 %v11641_v9, 16 }
 0x170   : > { %9827 = vmatprep.mubr.msk.bf16.mxu0 %vm417_vm1, %v11638_v45  ;;  %v2581_v57 = vsel %vm1248_vm3, %v2579_v26, %v2580_v10 }
 0x171   : > { %v2582_v45 = vor.u32 %v2580_v10, %v15395_v7  ;;  %v15401_v10 = vshll.u32 %v15373_v22, 16 }
 0x177   : > { %9828 = vmatmul.mubr.msk.bf16.gmra.mrb[8].mxu0 %vm417_vm1, %v11641_v9  ;;  %v15399_v9 = vshrl.u32 %v15371_v2, 16 }
 0x178   : > { %9831 = vmatprep.mubr.msk.bf16.mxu0 %vm417_vm1, %v11687_v48 }
 0x17f   : > { %9832 = vmatmul.mubr.msk.bf16.gmra.mrb[12].mxu0 %vm417_vm1, %v15371_v2 }
 0x180   : > { %9835 = vmatprep.mubr.msk.bf16.mxu0 %vm417_vm1, %v15372_v6 }
 0x187   : > { %9836 = vmatmul.mubr.msk.bf16.gmra.mrb[16].mxu0 %vm417_vm1, %v15373_v22 }
 0x188   : > { %9839 = vmatprep.mubr.msk.bf16.mxu0 %vm417_vm1, %v15374_v61 }
 0x18f   : > { %9840 = vmatmul.mubr.msk.bf16.gmra.mrb[20].mxu0 %vm417_vm1, %v15375_v12 }
 0x190   : > { %9843 = vmatprep.mubr.msk.bf16.mxu0 %vm417_vm1, %v15376_v51 }
 0x197   : > { %9844 = vmatmul.mubr.msk.bf16.gmra.mrb[24].mxu0 %vm417_vm1, %v15377_v62 }
 0x198   : > { %9847 = vmatprep.mubr.msk.bf16.mxu0 %vm417_vm1, %v15378_v44 }
 0x19f   : > { %9848 = vmatmul.mubr.msk.bf16.gmra.mrb[28].mxu0 %vm417_vm1, %v15379_v54 }
 0x1a0   : > { %9851 = vmatprep.mubr.msk.bf16.mxu0 %vm417_vm1, %v15380_v30 }
 0x1a7   : > { %9852 = vmatmul.mubr.msk.bf16.gmra.mrb[32].mxu0 %vm417_vm1, %v15381_v23 }
 0x1a8   : > { %9855 = vmatprep.mubr.msk.bf16.mxu0 %vm417_vm1, %v11931_v36 }
 0x1af   : > { %9856 = vmatmul.mubr.msk.bf16.gmra.mrb[36].mxu0 %vm417_vm1, %v11954_v0 }
 0x1b0   : > { %9859 = vmatprep.mubr.msk.bf16.mxu0 %vm417_vm1, %v11978_v52 }
 0x1b7   : > { %9860 = vmatmul.mubr.msk.bf16.gmra.mrb[40].mxu0 %vm417_vm1, %v15383_v3 }
 0x1b8   : > { %9863 = vmatprep.mubr.msk.bf16.mxu0 %vm417_vm1, %v12492_v32 }
 0x1bf   : > { %9864 = vmatmul.mubr.msk.bf16.gmra.mrb[44].mxu0 %vm417_vm1, %v12506_v17 }
 0x1c0   : > { %9869 = vmatprep.mubr.msk.bf16.mxu0 %vm417_vm1, %v2569_v18  ;;  %v2576_v18 = vor.u32 %v2574_v33, %v15391_v31  ;;  %v15396_v33 = vshrl.u32 %v11687_v48, 16 }
 0x1c2   : > { %v2578_v47 = vsel %vm1248_vm3, %v2576_v18, %v2577_v16  ;;  %v15398_v18 = vshll.u32 %v15372_v6, 16 }
 0x1c4   : > { %v2589_v55 = vrot.slane %v15398_v18, 1 }
 0x1c7   : > { %9870 = vmatmul.mubr.msk.bf16.vlgmr.msra.gmra.mrb[0].mxu0 %vm417_vm1, %v2572_v27 }
 0x1c8   : > { %9918 = vmatpush3.bf16.msra.mxu0 %v3042_v38  ;;  %9873 = vmatprep.mubr.msk.bf16.mxu0 %vm417_vm1, %v2575_v19  ;;  %v15394_v38 = vshll.u32 %v11687_v48, 16  ;;  %v15397_v19 = vshll.u32 %v15371_v2, 16  ;;  %v15400_v48 = vshrl.u32 %v15372_v6, 16  ;;  %v15403_v2 = vshrl.u32 %v15373_v22, 16 }
 0x1c9   : > { %11365 = vmatprep.subr.msk.bf16.mxu0 %vm490_vm0, %v12526_v60  ;;  %v15404_v6 = vshrl.u32 %v15374_v61, 16  ;;  %v15407_v22 = vshrl.u32 %v15375_v12, 16 }
 0x1ca   : > { %v2583_v50 = vrot.slane %v15394_v38, 1  ;;  %v2586_v5 = vrot.slane %v15397_v19, 1  ;;  %v2591_v63 = vor.u32 %v2589_v55, %v15400_v48 }
 0x1cc   : > { %v2585_v27 = vor.u32 %v2583_v50, %v15396_v33  ;;  %v2584_v16 = vsel %vm1248_vm3, %v2582_v45, %v2583_v50  ;;  %v2588_v26 = vor.u32 %v2586_v5, %v15399_v9  ;;  %v15402_v50 = vshll.u32 %v15374_v61, 16 }
 0x1cd   : > { %v15408_v61 = vshrl.u32 %v15376_v51, 16 }
 0x1ce   : > { %v2587_v31 = vsel %vm1248_vm3, %v2585_v27, %v2586_v5  ;;  %v2595_v7 = vrot.slane %v15402_v50, 1  ;;  %v15405_v27 = vshll.u32 %v15375_v12, 16  ;;  %v15411_v12 = vshrl.u32 %v15377_v62, 16 }
 0x1cf   : > { %9874 = vmatmul.mubr.msk.bf16.gmra.mrb[4].mxu0 %vm417_vm1, %v2578_v47  ;;  %v2592_v47 = vrot.slane %v15401_v10, 1 }
 0x1d0   : > { %9877 = vmatprep.mubr.msk.bf16.mxu0 %vm417_vm1, %v2581_v57  ;;  %v2590_v57 = vsel %vm1248_vm3, %v2588_v26, %v2589_v55  ;;  %v2597_v33 = vor.u32 %v2595_v7, %v15404_v6  ;;  %v2598_v19 = vrot.slane %v15405_v27, 1  ;;  %v15409_v26 = vshll.u32 %v15377_v62, 16 }
 0x1d1   : > { %v2593_v38 = vsel %vm1248_vm3, %v2591_v63, %v2592_v47  ;;  %v2594_v45 = vor.u32 %v2592_v47, %v15403_v2  ;;  %v15410_v47 = vshll.u32 %v15378_v44, 16  ;;  %v15415_v62 = vshrl.u32 %v15379_v54, 16 }
 0x1d2   : > { %v2600_v55 = vor.u32 %v2598_v19, %v15407_v22  ;;  %v2604_v48 = vrot.slane %v15409_v26, 1 }
 0x1d3   : > { %v2596_v5 = vsel %vm1248_vm3, %v2594_v45, %v2595_v7  ;;  %v15413_v7 = vshll.u32 %v15379_v54, 16  ;;  %v15419_v54 = vshrl.u32 %v15381_v23, 16 }
 0x1d5   : > { %v2610_v2 = vrot.slane %v15413_v7, 1 }
 0x1d7   : > { %9878 = vmatmul.mubr.msk.bf16.gmra.mrb[8].mxu0 %vm417_vm1, %v2584_v16  ;;  %v2599_v16 = vsel %vm1248_vm3, %v2597_v33, %v2598_v19  ;;  %v15414_v33 = vshll.u32 %v15380_v30, 16  ;;  %v2612_v19 = vor.u32 %v2610_v2, %v15415_v62  ;;  %v12642_v62 = vld [vmem:[%s11460_s14 + $0x1a0] sm:$0xff] }
 0x1d8   : > { %9881 = vmatprep.mubr.msk.bf16.mxu0 %vm417_vm1, %v2587_v31  ;;  %v15406_v31 = vshll.u32 %v15376_v51, 16  ;;  %v15412_v51 = vshrl.u32 %v15378_v44, 16  ;;  %v15416_v44 = vshrl.u32 %v15380_v30, 16  ;;  %v15420_v30 = vshrl.u32 %v11931_v36, 16 }
 0x1d9   : > { %v2613_v27 = vrot.slane %v15414_v33, 1  ;;  %v2635_v33 = vshrl.u32 %v12492_v32, 16 }
 0x1da   : > { %v2601_v18 = vrot.slane %v15406_v31, 1 }
 0x1dc   : > { %v2603_v9 = vor.u32 %v2601_v18, %v15408_v61  ;;  %v2602_v63 = vsel %vm1248_vm3, %v2600_v55, %v2601_v18  ;;  %v2614_v18 = vsel %vm1248_vm3, %v2612_v19, %v2613_v27  ;;  %v15418_v55 = vshll.u32 %v11931_v36, 16 }
 0x1dd   : > { %v15424_v36 = vshrl.u32 %v11978_v52, 16 }
 0x1de   : > { %v2605_v10 = vsel %vm1248_vm3, %v2603_v9, %v2604_v48  ;;  %v2619_v61 = vrot.slane %v15418_v55, 1 }
 0x1df   : > { %9882 = vmatmul.mubr.msk.bf16.gmra.mrb[12].mxu0 %vm417_vm1, %v2590_v57  ;;  %v2607_v57 = vrot.slane %v15410_v47, 1 }
 0x1e0   : > { %9885 = vmatprep.mubr.msk.bf16.mxu0 %vm417_vm1, %v2593_v38  ;;  %v2606_v38 = vor.u32 %v2604_v48, %v15411_v12  ;;  %v2621_v26 = vor.u32 %v2619_v61, %v15420_v30  ;;  %v15421_v48 = vshll.u32 %v11954_v0, 16 }
 0x1e1   : > { %v2609_v50 = vor.u32 %v2607_v57, %v15412_v51 }
 0x1e2   : > { %v2608_v45 = vsel %vm1248_vm3, %v2606_v38, %v2607_v57  ;;  %v15422_v57 = vshll.u32 %v11978_v52, 16  ;;  %v15426_v52 = vshrl.u32 %v15383_v3, 16 }
 0x1e3   : > { %v2611_v6 = vsel %vm1248_vm3, %v2609_v50, %v2610_v2  ;;  %v15425_v50 = vshll.u32 %v15383_v3, 16  ;;  %v2631_v2 = vshll.u32 %v12492_v32, 16  ;;  %v2642_v32 = vshrl.u32 %v12506_v17, 16 }
 0x1e4   : > { %v2625_v12 = vrot.slane %v15422_v57, 1  ;;  %v15434_v57 = vld [vmem:[#allocation18_spill] sm:$0xff] }
 0x1e5   : > { %v2628_v7 = vrot.slane %v15425_v50, 1  ;;  %v15440_v50 = vld [vmem:[#allocation29_spill] sm:$0xff] }
 0x1e6   : > { %v2627_v51 = vor.u32 %v2625_v12, %v15424_v36  ;;  %v15438_v36 = vld [vmem:[#allocation26_spill] sm:$0xff] }
 0x1e7   : > { %9886 = vmatmul.mubr.msk.bf16.gmra.mrb[16].mxu0 %vm417_vm1, %v2596_v5  ;;  %v2615_v5 = vor.u32 %v2613_v27, %v15416_v44  ;;  %v2638_v27 = vshll.u32 %v12506_v17, 16  ;;  %v2630_v19 = vor.u32 %v2628_v7, %v15426_v52  ;;  %v2562_v44 = vpack.c.bf16 %v12642_v62, %v12642_v62  ;;  %v8830_v17 = vld [vmem:[%s14975_s1 + $0x20] sm:$0xf] }
 0x1e8   : > { %9889 = vmatprep.mubr.msk.bf16.mxu0 %vm417_vm1, %v2599_v16  ;;  %v15417_v16 = vshll.u32 %v15381_v23, 16  ;;  %v15423_v23 = vshrl.u32 %v11954_v0, 16  ;;  %v2633_v0 = vrot.slane %v2631_v2, 1  ;;  %v12664_v30 = vpack.c.bf16 %v8830_v17, %v8830_v17 }
 0x1e9   : > { %v11389_v52 = vmov 0  }
 0x1ea   : > { %v2616_v31 = vrot.slane %v15417_v16, 1  ;;  %v2640_v16 = vrot.slane %v2638_v27, 1  ;;  %11379 = vset.pattern.permute.xlu0 %v11389_v52  ;;  %11380 = vset.pattern.permute.xlu1 %v11389_v52  ;;  %v4038_v52 = vld [vmem:[%s14981_s7 + $0x78] sm:$0xff] }
 0x1ec   : > { %v2617_v22 = vsel %vm1248_vm3, %v2615_v5, %v2616_v31  ;;  %v2618_v9 = vor.u32 %v2616_v31, %v15419_v54  ;;  %v2637_v5 = vor.u32 %v2635_v33, %v2633_v0  ;;  %v2634_v31 = vsel %vm1248_vm3, %v2630_v19, %v2633_v0  ;;  %v15427_v54 = vld [vmem:[#allocation6_spill] sm:$0xff]  ;;  %v15443_v0 = vld [vmem:[#allocation33_spill] sm:$0xff]  ;;  %v12704_v19 = vld [vmem:[%s11460_s14 + $0x1a8] sm:$0xff] }
 0x1ed   : > { %v2644_v55 = vor.u32 %v2642_v32, %v2640_v16 }
 0x1ef   : > { %9890 = vmatmul.mubr.msk.bf16.gmra.mrb[20].mxu0 %vm417_vm1, %v2602_v63  ;;  %v2622_v63 = vrot.slane %v15421_v48, 1  ;;  %v15429_v48 = vld [vmem:[#allocation10_spill] sm:$0xff] }
 0x1f0   : > { %9893 = vmatprep.mubr.msk.bf16.mxu0 %vm417_vm1, %v2605_v10  ;;  %v2620_v10 = vsel %vm1248_vm3, %v2618_v9, %v2619_v61  ;;  %v3331_v9 = vsel %vm490_vm0, %v12526_v60, 0  ;;  %v15433_v60 = vld [vmem:[#allocation16_spill] sm:$0xff] }
 0x1f1   : > { %v2623_v47 = vsel %vm1248_vm3, %v2621_v26, %v2622_v63  ;;  %v2624_v38 = vor.u32 %v2622_v63, %v15423_v23  ;;  %v15428_v26 = vld [vmem:[#allocation8_spill] sm:$0xff]  ;;  %v15436_v23 = vld [vmem:[#allocation23_spill] sm:$0xff] }
 0x1f2   : > { %v15430_v63 = vld [vmem:[#allocation12_spill] sm:$0xff] }
 0x1f7   : > { %9894 = vmatmul.mubr.msk.bf16.gmra.mrb[24].mxu0 %vm417_vm1, %v2608_v45  ;;  %v2626_v45 = vsel %vm1248_vm3, %v2624_v38, %v2625_v12  ;;  %v15435_v12 = vld [vmem:[#allocation21_spill] sm:$0xff] }
 0x1f8   : > { %9897 = vmatprep.mubr.msk.bf16.mxu0 %vm417_vm1, %v2611_v6  ;;  %v2629_v6 = vsel %vm1248_vm3, %v2627_v51, %v2628_v7  ;;  %v15437_v38 = vld [vmem:[#allocation25_spill] sm:$0xff]  ;;  %v15439_v51 = vld [vmem:[#allocation28_spill] sm:$0xff]  ;;  %v15441_v7 = vld [vmem:[#allocation31_spill] sm:$0xff] }
 0x1ff   : > { %9898 = vmatmul.mubr.msk.bf16.gmra.mrb[28].mxu0 %vm417_vm1, %v2614_v18  ;;  %v2646_v18 = vshll.u32 %v2562_v44, 16  ;;  %v3003_v44 = vrot.slane %v2635_v33, 3 }
 0x200   : > { %9901 = vmatprep.mubr.msk.bf16.mxu0 %vm417_vm1, %v2617_v22  ;;  %v2641_v22 = vsel %vm1248_vm3, %v2637_v5, %v2640_v16  ;;  %v3004_v5 = vrot.slane %v2631_v2, 4  ;;  %v2998_v16 = vpack.c.bf16 %v12704_v19, %v12642_v62 }
 0x201   : > { %v2648_v61 = vrot.slane %v2646_v18, 1  ;;  %v4024_v18 = vld [vmem:[%s14981_s7 + $0x8] sm:$0xff] }
 0x202   : > { %v3005_v33 = vor.u32 %v3004_v5, %v3003_v44  ;;  %v3012_v2 = vshrl.u32 %v2998_v16, 16  ;;  %v4039_v44 = vld [vmem:[%s14981_s7 + $0x80] sm:$0xff]  ;;  %v3645_v5 = vsel %vm490_vm0, %v12664_v30, 0 }
 0x203   : > { %v2649_v3 = vsel %vm1248_vm3, %v2644_v55, %v2648_v61  ;;  %v12719_v55 = vld [vmem:[%s11460_s14 + $0x1b0] sm:$0xff]  ;;  %v4027_v61 = vld [vmem:[%s14981_s7 + $0x20] sm:$0xff] }
 0x204   : > { %v3006_v17 = vsel %vm719_vm2, %v12040_v59, %v3005_v33 }
 0x207   : > { %9902 = vmatmul.mubr.msk.bf16.gmra.mrb[32].mxu0 %vm417_vm1, %v2620_v10  ;;  %v15431_v10 = vld [vmem:[#allocation14_spill] sm:$0xff] }
 0x208   : > { %9905 = vmatprep.mubr.msk.bf16.mxu0 %vm417_vm1, %v2623_v47  ;;  %v15432_v47 = vld [vmem:[#allocation15_spill] sm:$0xff] }
 0x20f   : > { %9906 = vmatmul.mubr.msk.bf16.gmra.mrb[36].mxu0 %vm417_vm1, %v2626_v45  ;;  %v15442_v45 = vld [vmem:[#allocation32_spill] sm:$0xff] }
 0x210   : > { %9909 = vmatprep.mubr.msk.bf16.mxu0 %vm417_vm1, %v2629_v6  ;;  %v4023_v6 = vld [vmem:[%s14981_s7] sm:$0xff] }
 0x211   : > { %4073 = vperm.xlu0 %11379, %v4023_v6   ;;  %v4036_v6 = vld [vmem:[%s14981_s7 + $0x68] sm:$0xff] }
 0x215   : > { %4078 = vperm.xlu0 %11379, %v4024_v18   ;;  %v4043_v18 = vld [vmem:[%s14981_s7 + $0xa0] sm:$0xff] }
 0x217   : > { %9910 = vmatmul.mubr.msk.bf16.gmra.mrb[40].mxu0 %vm417_vm1, %v2634_v31  ;;  %v4025_v31 = vld [vmem:[%s14981_s7 + $0x10] sm:$0xff] }
 0x218   : > { %9913 = vmatprep.mubr.msk.bf16.mxu0 %vm417_vm1, %v2641_v22  ;;  %4083 = vperm.xlu1 %11380, %v4025_v31   ;;  %v3015_v22 = vshll.u32 %v2998_v16, 16  ;;  %v15444_v16 = vld [vmem:[#allocation3_spill] sm:$0xff]  ;;  %v4041_v31 = vld [vmem:[%s14981_s7 + $0x90] sm:$0xff] }
 0x219   : > { %4093 = vperm.xlu0 %11379, %v4027_v61   ;;  %v4048_v61 = vld [vmem:[%s14981_s7 + $0xc8] sm:$0xff] }
 0x21f   : > { %9914 = vmatmul.mubr.msk.bf16.gmra.mrb[44].mxu0 %vm417_vm1, %v2649_v3  ;;  %v3007_v3 = vrot.slane %v2642_v32, 3 }
 0x220   : > { %9919 = vmatprep.mubr.msk.bf16.mxu0 %vm417_vm1, %v15427_v54  ;;  %v3008_v54 = vrot.slane %v2638_v27, 4  ;;  %v4029_v27 = vld [vmem:[%s14981_s7 + $0x30] sm:$0xff] }
 0x221   : > { %4103 = vperm.xlu0 %11379, %v4029_v27   ;;  %v4063_v27 = vld [vmem:[%s14981_s7 + $0x140] sm:$0xff] }
 0x222   : > { %v3009_v32 = vor.u32 %v3008_v54, %v3007_v3  ;;  %v4050_v3 = vld [vmem:[%s14981_s7 + $0xd8] sm:$0xff]  ;;  %v4052_v54 = vld [vmem:[%s14981_s7 + $0xe8] sm:$0xff] }
 0x227   : > { %9920 = vmatmul.mubr.msk.bf16.vlgmr.msra.gmra.mrb[0].mxu0 %vm417_vm1, %v15428_v26  ;;  %v3017_v26 = vrot.slane %v3015_v22, 4  ;;  %v4046_v22 = vld [vmem:[%s14981_s7 + $0xb8] sm:$0xff] }
 0x228   : > { %9968 = vmatpush3.bf16.msra.mxu0 %v3331_v9  ;;  %9923 = vmatprep.mubr.msk.bf16.mxu0 %vm417_vm1, %v15429_v48  ;;  %v3014_v9 = vrot.slane %v3012_v2, 3  ;;  %v4028_v48 = vld [vmem:[%s14981_s7 + $0x28] sm:$0xff] }
 0x229   : > { %11366 = vmatprep.subr.msk.bf16.mxu0 %vm490_vm0, %v12664_v30  ;;  %v4042_v30 = vld [vmem:[%s14981_s7 + $0x98] sm:$0xff]  ;;  %v4044_v2 = vld [vmem:[%s14981_s7 + $0xa8] sm:$0xff] }
 0x22a   : > { %v3018_v59 = vor.u32 %v3017_v26, %v3014_v9  ;;  %v4058_v9 = vld [vmem:[%s14981_s7 + $0x118] sm:$0xff]  ;;  %v4060_v26 = vld [vmem:[%s14981_s7 + $0x128] sm:$0xff] }
 0x22f   : > { %9924 = vmatmul.mubr.msk.bf16.gmra.mrb[4].mxu0 %vm417_vm1, %v15430_v63 }
 0x230   : > { %9927 = vmatprep.mubr.msk.bf16.mxu0 %vm417_vm1, %v15431_v10 }
 0x237   : > { %9928 = vmatmul.mubr.msk.bf16.gmra.mrb[8].mxu0 %vm417_vm1, %v15432_v47  ;;  %v4031_v47 = vld [vmem:[%s14981_s7 + $0x40] sm:$0xff] }
 0x238   : > { %9931 = vmatprep.mubr.msk.bf16.mxu0 %vm417_vm1, %v15433_v60  ;;  %v3010_v60 = vsel %vm719_vm2, %v3005_v33, %v3009_v32  ;;  %4113 = vperm.xlu0 %11379, %v4031_v47   ;;  %v15445_v33 = vld [vmem:[#allocation5_spill] sm:$0xff] }
 0x23f   : > { %9932 = vmatmul.mubr.msk.bf16.gmra.mrb[12].mxu0 %vm417_vm1, %v15434_v57 }
 0x240   : > { %9935 = vmatprep.mubr.msk.bf16.mxu0 %vm417_vm1, %v15435_v12 }
 0x247   : > { %9936 = vmatmul.mubr.msk.bf16.gmra.mrb[16].mxu0 %vm417_vm1, %v15436_v23  ;;  %v3019_v23 = vsel %vm719_vm2, %v3009_v32, %v3018_v59 }
 0x248   : > { %9939 = vmatprep.mubr.msk.bf16.mxu0 %vm417_vm1, %v15437_v38  ;;  %v4032_v38 = vld [vmem:[%s14981_s7 + $0x48] sm:$0xff] }
 0x24f   : > { %9940 = vmatmul.mubr.msk.bf16.gmra.mrb[20].mxu0 %vm417_vm1, %v15438_v36  ;;  %v4033_v36 = vld [vmem:[%s14981_s7 + $0x50] sm:$0xff] }
 0x250   : > { %9943 = vmatprep.mubr.msk.bf16.mxu0 %vm417_vm1, %v15439_v51  ;;  %4123 = vperm.xlu0 %11379, %v4033_v36  }
 0x257   : > { %9944 = vmatmul.mubr.msk.bf16.gmra.mrb[24].mxu0 %vm417_vm1, %v15440_v50  ;;  %v4034_v50 = vld [vmem:[%s14981_s7 + $0x58] sm:$0xff] }
 0x258   : > { %9947 = vmatprep.mubr.msk.bf16.mxu0 %vm417_vm1, %v15441_v7  ;;  %v4035_v7 = vld [vmem:[%s14981_s7 + $0x60] sm:$0xff] }
 0x259   : > { %4133 = vperm.xlu0 %11379, %v4035_v7   ;;  %v15454_v7 = vld [vmem:[#allocation42_spill] sm:$0xff] }
 0x25f   : > { %9948 = vmatmul.mubr.msk.bf16.gmra.mrb[28].mxu0 %vm417_vm1, %v15442_v45 }
 0x260   : > { %9951 = vmatprep.mubr.msk.bf16.mxu0 %vm417_vm1, %v15443_v0  ;;  %v4037_v0 = vld [vmem:[%s14981_s7 + $0x70] sm:$0xff] }
 0x261   : > { %4143 = vperm.xlu0 %11379, %v4037_v0   ;;  %v15457_v0 = vld [vmem:[#allocation45_spill] sm:$0xff] }
 0x265   : > { %4153 = vperm.xlu0 %11379, %v4039_v44   ;;  %v15459_v44 = vld [vmem:[#allocation47_spill] sm:$0xff] }
 0x267   : > { %9952 = vmatmul.mubr.msk.bf16.gmra.mrb[32].mxu0 %vm417_vm1, %v12030_v20  ;;  %v4026_v20 = vld [vmem:[%s14981_s7 + $0x18] sm:$0xff] }
 0x268   : > { %9955 = vmatprep.mubr.msk.bf16.mxu0 %vm417_vm1, %v12049_v35  ;;  %v2999_v35 = vpack.c.bf16 %v12719_v55, %v12719_v55  ;;  %4088 = vperm.xlu1 %11380, %v4026_v20   ;;  %v4047_v20 = vld [vmem:[%s14981_s7 + $0xc0] sm:$0xff] }
 0x269   : > { %4163 = vperm.xlu0 %11379, %v4041_v31   ;;  %v15463_v31 = vshll.u32 %v12408_v37, 16 }
 0x26a   : > { %v3021_v63 = vshrl.u32 %v2999_v35, 16  ;;  %v3024_v10 = vshll.u32 %v2999_v35, 16  ;;  %v4054_v35 = vld [vmem:[%s14981_s7 + $0xf8] sm:$0xff] }
 0x26c   : > { %4098 = vperm.xlu1 %11380, %v4028_v48   ;;  %v3023_v57 = vrot.slane %v3021_v63, 3  ;;  %v3026_v12 = vrot.slane %v3024_v10, 4  ;;  %v3317_v48 = vpack.c.bf16 %v12642_v62, %v12420_v42  ;;  %v12880_v63 = vpack.c.bf16 %v12719_v55, %v12704_v19  ;;  %v4064_v42 = vld [vmem:[%s14981_s7 + $0x148] sm:$0xff]  ;;  %v4065_v62 = vld [vmem:[%s14981_s7 + $0x150] sm:$0xff]  ;;  %v4066_v55 = vld [vmem:[%s14981_s7 + $0x158] sm:$0xff] }
 0x26d   : > { %4173 = vperm.xlu0 %11379, %v4043_v18   ;;  %v15464_v18 = vld [vmem:[#allocation52_spill] sm:$0xff] }
 0x26e   : > { %v3027_v51 = vor.u32 %v3026_v12, %v3023_v57  ;;  %v3613_v32 = vshll.u32 %v3317_v48, 16  ;;  %v3617_v10 = vshrl.u32 %v3317_v48, 16  ;;  %v8856_v57 = vld [vmem:[%s14977_s3 + $0x20] sm:$0xff]  ;;  %v8857_v12 = vld [vmem:[%s14977_s3 + $0x28] sm:$0xff] }
 0x26f   : > { %9956 = vmatmul.mubr.msk.bf16.gmra.mrb[36].mxu0 %vm417_vm1, %v12053_v58  ;;  %v4030_v58 = vld [vmem:[%s14981_s7 + $0x38] sm:$0xff] }
 0x270   : > { %9959 = vmatprep.mubr.msk.bf16.mxu0 %vm417_vm1, %v3006_v17  ;;  %4108 = vperm.xlu1 %11380, %v4030_v58   ;;  %v3028_v45 = vsel %vm719_vm2, %v3018_v59, %v3027_v51  ;;  %v4056_v17 = vld [vmem:[%s14981_s7 + $0x108] sm:$0xff]  ;;  %v3620_v59 = vshll.u32 %v12880_v63, 16  ;;  %v4067_v58 = vld [vmem:[%s14981_s7 + $0x160] sm:$0xff] }
 0x271   : > { %v15450_v51 = vld [vmem:[#allocation38_spill] sm:$0xff] }
 0x272   : > { %v3622_v19 = vrot.slane %v3620_v59, 1 }
 0x274   : > { %4118 = vperm.xlu1 %11380, %v4032_v38   ;;  %v8859_v38 = vld [vmem:[%s14977_s3 + $0x38] sm:$0xff] }
 0x277   : > { %9960 = vmatmul.mubr.msk.bf16.gmra.mrb[40].mxu0 %vm417_vm1, %v3010_v60  ;;  %v4069_v60 = vld [vmem:[%s14981_s7 + $0x170] sm:$0xff] }
 0x278   : > { %9963 = vmatprep.mubr.msk.bf16.mxu0 %vm417_vm1, %v3019_v23  ;;  %4128 = vperm.xlu1 %11380, %v4034_v50   ;;  %v4581_v23 = vpack.c.bf16 %v8857_v12, %v8856_v57  ;;  %v15453_v50 = vld [vmem:[#allocation41_spill] sm:$0xff] }
 0x27a   : > { %10067 = vmatprep.subr.bf16.mxu1 %v4581_v23 }
 0x27b   : > { %10068 = vmatpush3.bf16.msra.mxu1 %v4581_v23 }
 0x27c   : > { %4138 = vperm.xlu1 %11380, %v4036_v6   ;;  %v15456_v6 = vld [vmem:[#allocation44_spill] sm:$0xff] }
 0x27f   : > { %9964 = vmatmul.mubr.msk.bf16.gmra.mrb[44].mxu0 %vm417_vm1, %v3028_v45  ;;  %v15455_v45 = vld [vmem:[#allocation43_spill] sm:$0xff] }
 0x280   : > { %9969 = vmatprep.mubr.msk.bf16.mxu0 %vm417_vm1, %v11497_v21  ;;  %4148 = vperm.xlu1 %11380, %v4038_v52   ;;  %v4040_v21 = vld [vmem:[%s14981_s7 + $0x88] sm:$0xff]  ;;  %v15458_v52 = vld [vmem:[#allocation46_spill] sm:$0xff] }
 0x284   : > { %4158 = vperm.xlu1 %11380, %v4040_v21   ;;  %v15462_v21 = vld [vmem:[#allocation50_spill] sm:$0xff] }
 0x287   : > { %9970 = vmatmul.mubr.msk.bf16.vlgmr.msra.gmra.mrb[0].mxu0 %vm417_vm1, %v15444_v16  ;;  %v15461_v16 = vld [vmem:[#allocation49_spill] sm:$0xff] }
 0x288   : > { %10018 = vmatpush3.bf16.msra.mxu0 %v3645_v5  ;;  %9973 = vmatprep.mubr.msk.bf16.mxu0 %vm417_vm1, %v11537_v34  ;;  %v4045_v34 = vld [vmem:[%s14981_s7 + $0xb0] sm:$0xff] }
 0x289   : > { %4168 = vperm.xlu1 %11380, %v4042_v30   ;;  %4183 = vperm.xlu0 %11379, %v4045_v34   ;;  %v15460_v5 = vld [vmem:[#allocation48_spill] sm:$0xff]  ;;  %v3610_v30 = vrot.slane %v15463_v31, 1  ;;  %v15465_v34 = vld [vmem:[#allocation51_spill] sm:$0xff] }
 0x28d   : > { %4178 = vperm.xlu1 %11380, %v4044_v2   ;;  %4193 = vperm.xlu0 %11379, %v4047_v20   ;;  %v362_v2 = vld [vmem:[%s11460_s14 + $0x1b8] sm:$0xff] }
 0x28f   : > { %9974 = vmatmul.mubr.msk.bf16.gmra.mrb[4].mxu0 %vm417_vm1, %v15445_v33  ;;  %v3611_v33 = vsel %vm1248_vm3, %v15464_v18, %v3610_v30 }
 0x290   : > { %9977 = vmatprep.mubr.msk.bf16.mxu0 %vm417_vm1, %v11559_v41  ;;  %v4049_v41 = vld [vmem:[%s14981_s7 + $0xd0] sm:$0xff] }
 0x291   : > { %4188 = vperm.xlu1 %11380, %v4046_v22   ;;  %4203 = vperm.xlu0 %11379, %v4049_v41   ;;  %v15466_v22 = vshrl.u32 %v12408_v37, 16 }
 0x293   : > { %v3612_v20 = vor.u32 %v3610_v30, %v15466_v22 }
 0x295   : > { %4198 = vperm.xlu1 %11380, %v4048_v61   ;;  %v3606_v61 = vpack.c.bf16 %v362_v2, %v362_v2 }
 0x297   : > { %9978 = vmatmul.mubr.msk.bf16.gmra.mrb[8].mxu0 %vm417_vm1, %v11563_v43  ;;  %v4051_v43 = vld [vmem:[%s14981_s7 + $0xe0] sm:$0xff]  ;;  %v4084_v23 = vpop.permute.xlu1 %4083 }
 0x298   : > { %9981 = vmatprep.mubr.msk.bf16.mxu0 %vm417_vm1, %v11583_v53  ;;  %4213 = vperm.xlu0 %11379, %v4051_v43   ;;  %v4053_v53 = vld [vmem:[%s14981_s7 + $0xf0] sm:$0xff]  ;;  %v3628_v43 = vshll.u32 %v3606_v61, 16 }
 0x299   : > { %4208 = vperm.xlu1 %11380, %v4050_v3   ;;  %v3624_v3 = vshrl.u32 %v12880_v63, 16 }
 0x29c   : > { %4223 = vperm.xlu0 %11379, %v4053_v53   ;;  %v3630_v53 = vrot.slane %v3628_v43, 1 }
 0x29d   : > { %4218 = vperm.xlu1 %11380, %v4052_v54   ;;  %v3626_v54 = vor.u32 %v3624_v3, %v3622_v19 }
 0x29f   : > { %9982 = vmatmul.mubr.msk.bf16.gmra.mrb[12].mxu0 %vm417_vm1, %v11589_v56  ;;  %v4055_v56 = vld [vmem:[%s14981_s7 + $0x100] sm:$0xff] }
 0x2a0   : > { %9985 = vmatprep.mubr.msk.bf16.mxu0 %vm417_vm1, %v11616_v8  ;;  %4233 = vperm.xlu0 %11379, %v4055_v56   ;;  %v4057_v8 = vld [vmem:[%s14981_s7 + $0x110] sm:$0xff] }
 0x2a1   : > { %4228 = vperm.xlu1 %11380, %v4054_v35   ;;  %v3631_v35 = vsel %vm1248_vm3, %v3626_v54, %v3630_v53  ;;  %v13145_v54 = vld [vmem:[%s14976_s2] ss:$0 sm:$0xff] }
 0x2a4   : > { %4243 = vperm.xlu0 %11379, %v4057_v8  }
 0x2a5   : > { %4238 = vperm.xlu1 %11380, %v4056_v17  }
 0x2a7   : > { %9986 = vmatmul.mubr.msk.bf16.gmra.mrb[16].mxu0 %vm417_vm1, %v11513_v28  ;;  %v4059_v28 = vld [vmem:[%s14981_s7 + $0x120] sm:$0xff] }
 0x2a8   : > { %9989 = vmatprep.mubr.msk.bf16.mxu0 %vm417_vm1, %v11518_v29  ;;  %4253 = vperm.xlu0 %11379, %v4059_v28   ;;  %v4061_v29 = vld [vmem:[%s14981_s7 + $0x130] sm:$0xff]  ;;  %v4547_v28 = vld [vmem:[%s14977_s3 + $0x8] sm:$0xff] }
 0x2a9   : > { %4248 = vperm.xlu1 %11380, %v4058_v9   ;;  %v4546_v9 = vld [vmem:[%s14977_s3] sm:$0xff] }
 0x2ac   : > { %4263 = vperm.xlu0 %11379, %v4061_v29   ;;  %v13065_v29 = vpop.f32.mrb[0].mxu1 }
 0x2ad   : > { %4258 = vperm.xlu1 %11380, %v4060_v26   ;;  %v13062_v26 = vpack.c.bf16 %v4547_v28, %v4546_v9 }
 0x2af   : > { %9990 = vmatmul.mubr.msk.bf16.gmra.mrb[20].mxu0 %vm417_vm1, %v11728_v39  ;;  %v4062_v39 = vld [vmem:[%s14981_s7 + $0x138] sm:$0xff] }
 0x2b0   : > { %9993 = vmatprep.mubr.msk.bf16.mxu0 %vm417_vm1, %v11746_v40  ;;  %4273 = vperm.xlu0 %11379, %v4063_v27   ;;  %v12884_v40 = vrot.slane %v3613_v32, 1 }
 0x2b1   : > { %4268 = vperm.xlu1 %11380, %v4062_v39  }
 0x2b2   : > { %v3616_v41 = vsel %vm1248_vm3, %v3612_v20, %v12884_v40 }
 0x2b4   : > { %4283 = vperm.xlu0 %11379, %v4065_v62  }
 0x2b5   : > { %4278 = vperm.xlu1 %11380, %v4064_v42  }
 0x2b7   : > { %9994 = vmatmul.mubr.msk.bf16.gmra.mrb[24].mxu0 %vm417_vm1, %v11758_v13  ;;  %v3619_v13 = vor.u32 %v3617_v10, %v12884_v40 }
 0x2b8   : > { %9997 = vmatprep.mubr.msk.bf16.mxu0 %vm417_vm1, %v11789_v46  ;;  %4293 = vperm.xlu0 %11379, %v4067_v58   ;;  %v4068_v46 = vld [vmem:[%s14981_s7 + $0x168] sm:$0xff] }
 0x2b9   : > { %v3623_v47 = vsel %vm1248_vm3, %v3619_v13, %v3622_v19  ;;  %4288 = vperm.xlu1 %11380, %v4066_v55  }
 0x2bc   : > { %4303 = vperm.xlu0 %11379, %v4069_v60  }
 0x2bd   : > { %4298 = vperm.xlu1 %11380, %v4068_v46  }
 0x2bf   : > { %9998 = vmatmul.mubr.msk.bf16.gmra.mrb[28].mxu0 %vm417_vm1, %v11802_v4  ;;  %v8858_v4 = vld [vmem:[%s14977_s3 + $0x30] sm:$0xff] }
 0x2c0   : > { %10001 = vmatprep.mubr.msk.bf16.mxu0 %vm417_vm1, %v11831_v14  ;;  %v4070_v14 = vld [vmem:[%s14981_s7 + $0x178] sm:$0xff]  ;;  %v4582_v36 = vpack.c.bf16 %v8859_v38, %v8858_v4  ;;  %v4074_v4 = vpop.permute.xlu0 %4073 }
 0x2c1   : > { %4308 = vperm.xlu1 %11380, %v4070_v14  }
 0x2c2   : > { %10069 = vmatprep.subr.bf16.mxu1 %v4582_v36 }
 0x2c3   : > { %10070 = vmatpush3.bf16.msra.mxu1 %v4582_v36 }
 0x2c4   : > { %10119 = vmatprep.subr.bf16.mxu1 %v13062_v26 }
 0x2c7   : > { %10002 = vmatmul.mubr.msk.bf16.gmra.mrb[32].mxu0 %vm417_vm1, %v11844_v11  ;;  %v15448_v11 = vld [vmem:[#allocation36_spill] sm:$0xff] }
 0x2c8   : > { %10005 = vmatprep.mubr.msk.bf16.mxu0 %vm417_vm1, %v11876_v49  ;;  %v15446_v49 = vld [vmem:[#allocation34_spill] sm:$0xff] }
 0x2cf   : > { %10006 = vmatmul.mubr.msk.bf16.gmra.mrb[36].mxu0 %vm417_vm1, %v11888_v24  ;;  %v15447_v24 = vld [vmem:[#allocation35_spill] sm:$0xff] }
 0x2d0   : > { %10009 = vmatprep.mubr.msk.bf16.mxu0 %vm417_vm1, %v11919_v15  ;;  %v15449_v15 = vld [vmem:[#allocation37_spill] sm:$0xff] }
 0x2d7   : > { %10010 = vmatmul.mubr.msk.bf16.gmra.mrb[40].mxu0 %vm417_vm1, %v12408_v37  ;;  %v11390_v37 = vmov 0.0  }
 0x2d8   : > { %10013 = vmatprep.mubr.msk.bf16.mxu0 %vm417_vm1, %v3317_v48  ;;  %4366 = vst.msk [vmem:[#allocation2 + $0x30] sm:$0xff] %vm4359_vm4, %v11390_v37  ;;  %4360 = vst.msk [vmem:[#allocation2] sm:$0xff] %vm4359_vm4, %v11390_v37  ;;  %v13067_v48 = vpop.f32.mrb[1].mxu1 }
 0x2d9   : > { %4361 = vst.msk [vmem:[#allocation2 + $0x8] sm:$0xff] %vm4359_vm4, %v11390_v37  ;;  %4362 = vst.msk [vmem:[#allocation2 + $0x10] sm:$0xff] %vm4359_vm4, %v11390_v37  ;;  %v13069_v39 = vpop.f32.mrb[2].mxu1 }
 0x2da   : > { %4363 = vst.msk [vmem:[#allocation2 + $0x18] sm:$0xff] %vm4359_vm4, %v11390_v37  ;;  %4364 = vst.msk [vmem:[#allocation2 + $0x20] sm:$0xff] %vm4359_vm4, %v11390_v37  ;;  %v13071_v27 = vpop.f32.mrb[3].mxu1 }
 0x2db   : > { %4365 = vst.msk [vmem:[#allocation2 + $0x28] sm:$0xff] %vm4359_vm4, %v11390_v37  ;;  %4367 = vst.msk [vmem:[#allocation2 + $0x38] sm:$0xff] %vm4359_vm4, %v11390_v37  ;;  %v13073_v32 = vpop.f32.mrb[4].mxu1 }
 0x2dc   : > { %4368 = vst.msk [vmem:[#allocation2 + $0x40] sm:$0xff] %vm4359_vm4, %v11390_v37  ;;  %4369 = vst.msk [vmem:[#allocation2 + $0x48] sm:$0xff] %vm4359_vm4, %v11390_v37 }
 0x2dd   : > { %4370 = vst.msk [vmem:[#allocation2 + $0x50] sm:$0xff] %vm4359_vm4, %v11390_v37  ;;  %4371 = vst.msk [vmem:[#allocation2 + $0x58] sm:$0xff] %vm4359_vm4, %v11390_v37 }
 0x2de   : > { %4372 = vst.msk [vmem:[#allocation2 + $0x60] sm:$0xff] %vm4359_vm4, %v11390_v37  ;;  %4373 = vst.msk [vmem:[#allocation2 + $0x68] sm:$0xff] %vm4359_vm4, %v11390_v37 }
 0x2df   : > { %10014 = vmatmul.mubr.msk.bf16.gmra.mrb[44].mxu0 %vm417_vm1, %v12880_v63  ;;  %4374 = vst.msk [vmem:[#allocation2 + $0x70] sm:$0xff] %vm4359_vm4, %v11390_v37  ;;  %4375 = vst.msk [vmem:[#allocation2 + $0x78] sm:$0xff] %vm4359_vm4, %v11390_v37  ;;  %v13075_v63 = vpop.f32.mrb[5].mxu1 }
 0x2e0   : > { %10019 = vmatprep.mubr.msk.bf16.mxu0 %vm417_vm1, %v12085_v1  ;;  %v15451_v1 = vld [vmem:[#allocation39_spill] sm:$0xff]  ;;  %4376 = vst.msk [vmem:[#allocation2 + $0x80] sm:$0xff] %vm4359_vm4, %v11390_v37  ;;  %4377 = vst.msk [vmem:[#allocation2 + $0x88] sm:$0xff] %vm4359_vm4, %v11390_v37  ;;  %v4467_v17 = vld [vmem:[#allocation2 + $0x10] sm:$0xff]  ;;  %v13077_v40 = vpop.f32.mrb[6].mxu1 }
 0x2e1   : > { %4378 = vst.msk [vmem:[#allocation2 + $0x90] sm:$0xff] %vm4359_vm4, %v11390_v37  ;;  %4379 = vst.msk [vmem:[#allocation2 + $0x98] sm:$0xff] %vm4359_vm4, %v11390_v37  ;;  %v4466_v56 = vld [vmem:[#allocation2 + $0x8] sm:$0xff]  ;;  %v13079_v42 = vpop.f32.mrb[7].mxu1 }
 0x2e2   : > { %4380 = vst.msk [vmem:[#allocation2 + $0xa0] sm:$0xff] %vm4359_vm4, %v11390_v37  ;;  %4381 = vst.msk [vmem:[#allocation2 + $0xa8] sm:$0xff] %vm4359_vm4, %v11390_v37  ;;  %v13052_v8 = vpack.c.bf16 %v4467_v17, %v4466_v56  ;;  %v13081_v62 = vpop.f32.mrb[8].mxu1 }
 0x2e3   : > { %4382 = vst.msk [vmem:[#allocation2 + $0xb0] sm:$0xff] %vm4359_vm4, %v11390_v37  ;;  %4383 = vst.msk [vmem:[#allocation2 + $0xb8] sm:$0xff] %vm4359_vm4, %v11390_v37  ;;  %v13083_v10 = vpop.f32.mrb[9].mxu1 }
 0x2e4   : > { %4384 = vst.msk [vmem:[#allocation2 + $0xc0] sm:$0xff] %vm4359_vm4, %v11390_v37  ;;  %4385 = vst.msk [vmem:[#allocation2 + $0xc8] sm:$0xff] %vm4359_vm4, %v11390_v37  ;;  %10071 = vmatprep.mubr.msk.bf16.mxu1 %vm4359_vm4, %v13052_v8  ;;  %v13085_v59 = vpop.f32.mrb[10].mxu1 }
 0x2e5   : > { %4386 = vst.msk [vmem:[#allocation2 + $0xd0] sm:$0xff] %vm4359_vm4, %v11390_v37  ;;  %4387 = vst.msk [vmem:[#allocation2 + $0xd8] sm:$0xff] %vm4359_vm4, %v11390_v37  ;;  %v13087_v13 = vpop.f32.mrb[11].mxu1 }
 0x2e6   : > { %4388 = vst.msk [vmem:[#allocation2 + $0xe0] sm:$0xff] %vm4359_vm4, %v11390_v37  ;;  %4389 = vst.msk [vmem:[#allocation2 + $0xe8] sm:$0xff] %vm4359_vm4, %v11390_v37  ;;  %v13089_v19 = vpop.f32.mrb[12].mxu1 }
 0x2e7   : > { %10020 = vmatmul.mubr.msk.bf16.vlgmr.msra.gmra.mrb[0].mxu0 %vm417_vm1, %v12088_v25  ;;  %v15452_v25 = vld [vmem:[#allocation40_spill] sm:$0xff]  ;;  %4390 = vst.msk [vmem:[#allocation2 + $0xf0] sm:$0xff] %vm4359_vm4, %v11390_v37  ;;  %4391 = vst.msk [vmem:[#allocation2 + $0xf8] sm:$0xff] %vm4359_vm4, %v11390_v37  ;;  %v13091_v55 = vpop.f32.mrb[13].mxu1 }
 0x2e8   : > { %10023 = vmatprep.mubr.msk.bf16.mxu0 %vm417_vm1, %v15446_v49  ;;  %4392 = vst.msk [vmem:[#allocation2 + $0x100] sm:$0xff] %vm4359_vm4, %v11390_v37  ;;  %4393 = vst.msk [vmem:[#allocation2 + $0x108] sm:$0xff] %vm4359_vm4, %v11390_v37  ;;  %v13093_v58 = vpop.f32.mrb[14].mxu1 }
 0x2e9   : > { %4394 = vst.msk [vmem:[#allocation2 + $0x110] sm:$0xff] %vm4359_vm4, %v11390_v37  ;;  %4395 = vst.msk [vmem:[#allocation2 + $0x118] sm:$0xff] %vm4359_vm4, %v11390_v37 }
 0x2ea   : > { %4396 = vst.msk [vmem:[#allocation2 + $0x120] sm:$0xff] %vm4359_vm4, %v11390_v37  ;;  %4397 = vst.msk [vmem:[#allocation2 + $0x128] sm:$0xff] %vm4359_vm4, %v11390_v37 }
 0x2eb   : > { %4398 = vst.msk [vmem:[#allocation2 + $0x130] sm:$0xff] %vm4359_vm4, %v11390_v37  ;;  %4399 = vst.msk [vmem:[#allocation2 + $0x138] sm:$0xff] %vm4359_vm4, %v11390_v37 }
 0x2ec   : > { %4400 = vst.msk [vmem:[#allocation2 + $0x140] sm:$0xff] %vm4359_vm4, %v11390_v37  ;;  %4401 = vst.msk [vmem:[#allocation2 + $0x148] sm:$0xff] %vm4359_vm4, %v11390_v37 }
 0x2ed   : > { %4402 = vst.msk [vmem:[#allocation2 + $0x150] sm:$0xff] %vm4359_vm4, %v11390_v37  ;;  %4403 = vst.msk [vmem:[#allocation2 + $0x158] sm:$0xff] %vm4359_vm4, %v11390_v37 }
 0x2ee   : > { %4404 = vst.msk [vmem:[#allocation2 + $0x160] sm:$0xff] %vm4359_vm4, %v11390_v37  ;;  %4405 = vst.msk [vmem:[#allocation2 + $0x168] sm:$0xff] %vm4359_vm4, %v11390_v37 }
 0x2ef   : > { %10024 = vmatmul.mubr.msk.bf16.gmra.mrb[4].mxu0 %vm417_vm1, %v15447_v24  ;;  %4406 = vst.msk [vmem:[#allocation2 + $0x170] sm:$0xff] %vm4359_vm4, %v11390_v37  ;;  %4407 = vst.msk [vmem:[#allocation2 + $0x178] sm:$0xff] %vm4359_vm4, %v11390_v37  ;;  %v4079_v24 = vpop.permute.xlu0 %4078 }
 0x2f0   : > { %10027 = vmatprep.mubr.msk.bf16.mxu0 %vm417_vm1, %v15448_v11  ;;  %4408 = vst.msk [vmem:[#allocation2 + $0x180] sm:$0xff] %vm4359_vm4, %v11390_v37  ;;  %4409 = vst.msk [vmem:[#allocation2 + $0x188] sm:$0xff] %vm4359_vm4, %v11390_v37  ;;  %v4089_v11 = vpop.permute.xlu1 %4088 }
 0x2f1   : > { %4410 = vst.msk [vmem:[#allocation2 + $0x190] sm:$0xff] %vm4359_vm4, %v11390_v37  ;;  %4411 = vst.msk [vmem:[#allocation2 + $0x198] sm:$0xff] %vm4359_vm4, %v11390_v37 }
 0x2f2   : > { %4412 = vst.msk [vmem:[#allocation2 + $0x1a0] sm:$0xff] %vm4359_vm4, %v11390_v37  ;;  %4413 = vst.msk [vmem:[#allocation2 + $0x1a8] sm:$0xff] %vm4359_vm4, %v11390_v37 }
 0x2f3   : > { %4414 = vst.msk [vmem:[#allocation2 + $0x1b0] sm:$0xff] %vm4359_vm4, %v11390_v37  ;;  %4415 = vst.msk [vmem:[#allocation2 + $0x1b8] sm:$0xff] %vm4359_vm4, %v11390_v37 }
 0x2f4   : > { %15467 = vst [vmem:[#allocation7_spill] sm:$0xff] %v13052_v8 }
 0x2f7   : > { %10028 = vmatmul.mubr.msk.bf16.gmra.mrb[8].mxu0 %vm417_vm1, %v15449_v15  ;;  %v13113_v15 = vpop.permute.xlu0 %4093 }
 0x2f8   : > { %10031 = vmatprep.mubr.msk.bf16.mxu0 %vm417_vm1, %v15450_v51  ;;  %v13115_v51 = vpop.permute.xlu1 %4098 }
 0x2ff   : > { %10032 = vmatmul.mubr.msk.bf16.gmra.mrb[12].mxu0 %vm417_vm1, %v15451_v1  ;;  %v13117_v1 = vld [vmem:[#allocation2 + $0x18] sm:$0xff] }
 0x300   : > { %10035 = vmatprep.mubr.msk.bf16.mxu0 %vm417_vm1, %v15452_v25  ;;  %v4522_v25 = vpack.c.bf16 %v13117_v1, %v4467_v17 }
 0x307   : > { %10036 = vmatmul.mubr.msk.bf16.gmra.mrb[16].mxu0 %vm417_vm1, %v15453_v50  ;;  %v4465_v50 = vld [vmem:[#allocation2] sm:$0xff] }
 0x308   : > { %10039 = vmatprep.mubr.msk.bf16.mxu0 %vm417_vm1, %v15454_v7  ;;  %v4104_v7 = vpop.permute.xlu0 %4103 }
 0x30f   : > { %10040 = vmatmul.mubr.msk.bf16.gmra.mrb[20].mxu0 %vm417_vm1, %v15455_v45  ;;  %v13120_v45 = vpop.permute.xlu1 %4108 }
 0x310   : > { %10043 = vmatprep.mubr.msk.bf16.mxu0 %vm417_vm1, %v15456_v6  ;;  %v4521_v6 = vpack.c.bf16 %v4466_v56, %v4465_v50 }
 0x313   : > { %v13124_v30 = vpop.permute.xlu1 %4118 }
 0x317   : > { %10044 = vmatmul.mubr.msk.bf16.gmra.mrb[24].mxu0 %vm417_vm1, %v15457_v0  ;;  %v4889_v0 = vshrl.u32 %v4522_v25, 16  ;;  %v13134_v61 = vpop.permute.xlu1 %4128 }
 0x318   : > { %10047 = vmatprep.mubr.msk.bf16.mxu0 %vm417_vm1, %v15458_v52  ;;  %v4892_v52 = vshll.u32 %v4522_v25, 16 }
 0x31a   : > { %v4894_v31 = vrot.slane %v4892_v52, 4 }
 0x31b   : > { %v13138_v3 = vpop.permute.xlu1 %4138 }
 0x31f   : > { %10048 = vmatmul.mubr.msk.bf16.gmra.mrb[28].mxu0 %vm417_vm1, %v15459_v44  ;;  %v13122_v44 = vpop.permute.xlu0 %4113  ;;  %v13147_v53 = vpop.permute.xlu1 %4148 }
 0x320   : > { %10051 = vmatprep.mubr.msk.bf16.mxu0 %vm417_vm1, %v15460_v5  ;;  %v4881_v5 = vshrl.u32 %v4521_v6, 16 }
 0x322   : > { %v4883_v18 = vrot.slane %v4881_v5, 3 }
 0x323   : > { %v13128_v22 = vpop.permute.xlu0 %4123 }
 0x327   : > { %10052 = vmatmul.mubr.msk.bf16.gmra.mrb[32].mxu0 %vm417_vm1, %v15461_v16  ;;  %v4884_v16 = vshll.u32 %v4521_v6, 16 }
 0x328   : > { %10055 = vmatprep.mubr.msk.bf16.mxu0 %vm417_vm1, %v15462_v21  ;;  %v4891_v21 = vrot.slane %v4889_v0, 3 }
 0x32f   : > { %10056 = vmatmul.mubr.msk.bf16.gmra.mrb[36].mxu0 %vm417_vm1, %v15465_v34  ;;  %v13126_v34 = vor.u32 %v4894_v31, %v4891_v21  ;;  %v13155_v21 = vpop.permute.xlu1 %4158 }
 0x330   : > { %10059 = vmatprep.mubr.msk.bf16.mxu0 %vm417_vm1, %v3611_v33  ;;  %v4886_v33 = vrot.slane %v4884_v16, 4 }
 0x332   : > { %v4887_v2 = vor.u32 %v4886_v33, %v4883_v18 }
 0x334   : > { %v13132_v20 = vsel %vm719_vm2, %v4887_v2, %v13126_v34 }
 0x337   : > { %10060 = vmatmul.mubr.msk.bf16.gmra.mrb[40].mxu0 %vm417_vm1, %v3616_v41  ;;  %v13136_v41 = vpop.permute.xlu0 %4133 }
 0x338   : > { %10063 = vmatprep.mubr.msk.bf16.mxu0 %vm417_vm1, %v3623_v47  ;;  %v13095_v47 = vpop.f32.mrb[15].mxu1 }
 0x339   : > { %v13097_v46 = vpop.f32.mrb[16].mxu1 }
 0x33a   : > { %v13099_v60 = vpop.f32.mrb[17].mxu1 }
 0x33b   : > { %v13101_v57 = vpop.f32.mrb[18].mxu1  ;;  %v13140_v43 = vpop.permute.xlu0 %4143 }
 0x33c   : > { %v13103_v12 = vpop.f32.mrb[19].mxu1 }
 0x33d   : > { %v13105_v38 = vpop.f32.mrb[20].mxu1 }
 0x33e   : > { %v13107_v14 = vpop.f32.mrb[21].mxu1 }
 0x33f   : > { %10064 = vmatmul.mubr.msk.bf16.gmra.mrb[44].mxu0 %vm417_vm1, %v3631_v35  ;;  %v13109_v36 = vpop.f32.mrb[22].mxu1  ;;  %v13152_v6 = vpop.permute.xlu0 %4153 }
 0x340   : > { %v13111_v49 = vpop.f32.mrb[23].mxu1 }
 0x3ba   : > { %v10021_v35 = vpop.f32.mrb[0].mxu0 }
 0x3bb   : > { %v3929_v37 = vadd.f32 %v10021_v35, %v13145_v54  ;;  %v3681_v56 = vpop.f32.mrb[1].mxu0 }
 0x3bc   : > { %v3927_v17 = vadd.f32 %v13145_v54, %v3681_v56  ;;  %v10022_v9 = vpop.f32.mrb[2].mxu0 }
 0x3bd   : > { %v3977_v28 = vmax.f32 %v3929_v37, 0.0  ;;  %v3930_v25 = vadd.f32 %v10022_v9, %v13145_v54  ;;  %v3684_v50 = vpop.f32.mrb[3].mxu0 }
 0x3be   : > { %v3975_v0 = vmax.f32 %v3927_v17, 0.0  ;;  %v3928_v52 = vadd.f32 %v13145_v54, %v3684_v50  ;;  %v13161_v17 = vpop.permute.xlu0 %4163 }
 0x3bf   : > { %v4313_v5 = vmul.f32 %v4084_v23, %v3977_v28  ;;  %v3978_v16 = vmax.f32 %v3930_v25, 0.0  ;;  %v13166_v25 = vpop.permute.xlu1 %4168 }
 0x3c0   : > { %v4311_v31 = vmul.f32 %v4074_v4, %v3975_v0  ;;  %v3976_v18 = vmax.f32 %v3928_v52, 0.0 }
 0x3c1   : > { %4419 = vst.msk [vmem:[#allocation2 + $0x30] sm:$0xff] %vm4359_vm4, %v4313_v5  ;;  %v4314_v33 = vmul.f32 %v4089_v11, %v3978_v16  ;;  %v4548_v5 = vld [vmem:[%s14977_s3 + $0x10] sm:$0xff]  ;;  %v4549_v16 = vld [vmem:[%s14977_s3 + $0x18] sm:$0xff] }
 0x3c2   : > { %4417 = vst.msk [vmem:[#allocation2 + $0x20] sm:$0xff] %vm4359_vm4, %v4311_v31  ;;  %v4312_v2 = vmul.f32 %v4079_v24, %v3976_v18  ;;  %v10025_v35 = vpop.f32.mrb[4].mxu0 }
 0x3c3   : > { %4420 = vst.msk [vmem:[#allocation2 + $0x38] sm:$0xff] %vm4359_vm4, %v4314_v33  ;;  %v3933_v37 = vadd.f32 %v10025_v35, %v13145_v54  ;;  %v3697_v56 = vpop.f32.mrb[5].mxu0  ;;  %v13178_v35 = vpop.permute.xlu0 %4173 }
 0x3c4   : > { %4418 = vst.msk [vmem:[#allocation2 + $0x28] sm:$0xff] %vm4359_vm4, %v4312_v2  ;;  %v3931_v23 = vadd.f32 %v13145_v54, %v3697_v56  ;;  %v10026_v4 = vpop.f32.mrb[6].mxu0 }
 0x3c5   : > { %v3981_v9 = vmax.f32 %v3933_v37, 0.0  ;;  %v3934_v28 = vadd.f32 %v10026_v4, %v13145_v54  ;;  %v3700_v11 = vpop.f32.mrb[7].mxu0 }
 0x3c6   : > { %v3979_v24 = vmax.f32 %v3931_v23, 0.0  ;;  %v3932_v50 = vadd.f32 %v13145_v54, %v3700_v11 }
 0x3c7   : > { %v4317_v0 = vmul.f32 %v4104_v7, %v3981_v9  ;;  %v3982_v52 = vmax.f32 %v3934_v28, 0.0  ;;  %v4551_v9 = vpack.c.bf16 %v4549_v16, %v4548_v5 }
 0x3c8   : > { %v4315_v31 = vmul.f32 %v13113_v15, %v3979_v24  ;;  %v3980_v18 = vmax.f32 %v3932_v50, 0.0  ;;  %v4471_v23 = vld [vmem:[#allocation2 + $0x30] sm:$0xff]  ;;  %v8908_v24 = vld [vmem:[%s14977_s3 + $0x40] sm:$0xff] }
 0x3c9   : > { %4423 = vst.msk [vmem:[#allocation2 + $0x50] sm:$0xff] %vm4359_vm4, %v4317_v0  ;;  %v4318_v33 = vmul.f32 %v13120_v45, %v3982_v52  ;;  %v4469_v2 = vld [vmem:[#allocation2 + $0x20] sm:$0xff] }
 0x3ca   : > { %4421 = vst.msk [vmem:[#allocation2 + $0x40] sm:$0xff] %vm4359_vm4, %v4315_v31  ;;  %v4316_v7 = vmul.f32 %v13115_v51, %v3980_v18  ;;  %v10029_v37 = vpop.f32.mrb[8].mxu0  ;;  %v13183_v56 = vpack.c.bf16 %v4469_v2, %v13117_v1  ;;  %v4472_v4 = vld [vmem:[#allocation2 + $0x38] sm:$0xff]  ;;  %v8909_v51 = vld [vmem:[%s14977_s3 + $0x48] sm:$0xff]  ;;  %v13195_v1 = vpop.permute.xlu1 %4178 }
 0x3cb   : > { %4424 = vst.msk [vmem:[#allocation2 + $0x58] sm:$0xff] %vm4359_vm4, %v4318_v33  ;;  %v3937_v15 = vadd.f32 %v10029_v37, %v13145_v54  ;;  %v3713_v28 = vpop.f32.mrb[9].mxu0  ;;  %v4470_v45 = vld [vmem:[#allocation2 + $0x28] sm:$0xff]  ;;  %v13187_v11 = vpack.c.bf16 %v4472_v4, %v4471_v23 }
 0x3cc   : > { %15468 = vst [vmem:[#allocation9_spill] sm:$0xff] %v13183_v56  ;;  %4422 = vst.msk [vmem:[#allocation2 + $0x48] sm:$0xff] %vm4359_vm4, %v4316_v7  ;;  %v3935_v50 = vadd.f32 %v13145_v54, %v3713_v28  ;;  %v10030_v0 = vpop.f32.mrb[10].mxu0  ;;  %10072 = vmatmul.mubr.msk.bf16.vlgmr.msra.gmra.mrb[24].mxu1 %vm4359_vm4, %v13183_v56  ;;  %v13201_v52 = vpack.c.bf16 %v4470_v45, %v4469_v2  ;;  %v13203_v5 = vpack.c.bf16 %v4471_v23, %v4470_v45  ;;  %v13213_v23 = vpop.permute.xlu0 %4183 }
 0x3cd   : > { %15469 = vst [vmem:[#allocation11_spill] sm:$0xff] %v13187_v11  ;;  %v3985_v16 = vmax.f32 %v3937_v15, 0.0  ;;  %v3938_v31 = vadd.f32 %v10030_v0, %v13145_v54  ;;  %v3716_v18 = vpop.f32.mrb[11].mxu0  ;;  %10120 = vmatpush3.bf16.msra.mxu1 %v13062_v26  ;;  %v13210_v7 = vpack.c.bf16 %v8909_v51, %v8908_v24 }
 0x3ce   : > { %15470 = vst [vmem:[#allocation13_spill] sm:$0xff] %v13201_v52  ;;  %15471 = vst [vmem:[#allocation4_spill] sm:$0xff] %v13203_v5  ;;  %v3983_v33 = vmax.f32 %v3935_v50, 0.0  ;;  %v3936_v37 = vadd.f32 %v13145_v54, %v3716_v18  ;;  %10075 = vmatprep.mubr.msk.bf16.mxu1 %vm4359_vm4, %v13203_v5  ;;  %10121 = vmatprep.subr.bf16.mxu1 %v4551_v9  ;;  %v13218_v0 = vpop.permute.xlu1 %4188 }
 0x3cf   : > { %v4321_v2 = vmul.f32 %v13128_v22, %v3985_v16  ;;  %v3986_v28 = vmax.f32 %v3938_v31, 0.0 }
 0x3d0   : > { %v4319_v15 = vmul.f32 %v13122_v44, %v3983_v33  ;;  %v3984_v45 = vmax.f32 %v3936_v37, 0.0  ;;  %v4475_v16 = vld [vmem:[#allocation2 + $0x50] sm:$0xff] }
 0x3d1   : > { %4427 = vst.msk [vmem:[#allocation2 + $0x70] sm:$0xff] %vm4359_vm4, %v4321_v2  ;;  %v4322_v26 = vmul.f32 %v13134_v61, %v3986_v28  ;;  %v4473_v50 = vld [vmem:[#allocation2 + $0x40] sm:$0xff]  ;;  %10122 = vmatpush3.bf16.msra.mxu1 %v4551_v9 }
 0x3d2   : > { %4425 = vst.msk [vmem:[#allocation2 + $0x60] sm:$0xff] %vm4359_vm4, %v4319_v15  ;;  %v4320_v24 = vmul.f32 %v13124_v30, %v3984_v45  ;;  %v10033_v51 = vpop.f32.mrb[12].mxu0  ;;  %v13222_v22 = vpack.c.bf16 %v4473_v50, %v4472_v4  ;;  %v4476_v31 = vld [vmem:[#allocation2 + $0x58] sm:$0xff]  ;;  %10171 = vmatprep.subr.bf16.mxu1 %v13210_v7  ;;  %v13238_v45 = vpop.permute.xlu0 %4193 }
 0x3d3   : > { %4428 = vst.msk [vmem:[#allocation2 + $0x78] sm:$0xff] %vm4359_vm4, %v4322_v26  ;;  %v3941_v44 = vadd.f32 %v10033_v51, %v13145_v54  ;;  %v3729_v61 = vpop.f32.mrb[13].mxu0  ;;  %v4474_v18 = vld [vmem:[#allocation2 + $0x48] sm:$0xff]  ;;  %v13227_v9 = vpack.c.bf16 %v4476_v31, %v4475_v16  ;;  %v13244_v5 = vpop.permute.xlu1 %4198 }
 0x3d4   : > { %4426 = vst.msk [vmem:[#allocation2 + $0x68] sm:$0xff] %vm4359_vm4, %v4320_v24  ;;  %v3939_v33 = vadd.f32 %v13145_v54, %v3729_v61  ;;  %v10034_v30 = vpop.f32.mrb[14].mxu0  ;;  %10076 = vmatmul.mubr.msk.bf16.gmra.mrb[28].mxu1 %vm4359_vm4, %v13222_v22  ;;  %v13233_v4 = vpack.c.bf16 %v4474_v18, %v4473_v50  ;;  %v13235_v37 = vpack.c.bf16 %v4475_v16, %v4474_v18 }
 0x3d5   : > { %15472 = vst [vmem:[#allocation17_spill] sm:$0xff] %v13227_v9  ;;  %v3989_v2 = vmax.f32 %v3941_v44, 0.0  ;;  %v3942_v28 = vadd.f32 %v10034_v30, %v13145_v54  ;;  %v3732_v15 = vpop.f32.mrb[15].mxu0 }
 0x3d6   : > { %15473 = vst [vmem:[#allocation19_spill] sm:$0xff] %v13233_v4  ;;  %15474 = vst [vmem:[#allocation20_spill] sm:$0xff] %v13235_v37  ;;  %v3987_v26 = vmax.f32 %v3939_v33, 0.0  ;;  %v3940_v51 = vadd.f32 %v13145_v54, %v3732_v15  ;;  %10079 = vmatprep.mubr.msk.bf16.mxu1 %vm4359_vm4, %v13235_v37 }
 0x3d7   : > { %v4325_v24 = vmul.f32 %v13140_v43, %v3989_v2  ;;  %v3990_v61 = vmax.f32 %v3942_v28, 0.0 }
 0x3d8   : > { %v4323_v50 = vmul.f32 %v13136_v41, %v3987_v26  ;;  %v3988_v16 = vmax.f32 %v3940_v51, 0.0  ;;  %v4479_v56 = vld [vmem:[#allocation2 + $0x70] sm:$0xff]  ;;  %v13257_v51 = vpop.permute.xlu0 %4203 }
 0x3d9   : > { %4431 = vst.msk [vmem:[#allocation2 + $0x90] sm:$0xff] %vm4359_vm4, %v4325_v24  ;;  %v4326_v44 = vmul.f32 %v13147_v53, %v3990_v61  ;;  %v4477_v18 = vld [vmem:[#allocation2 + $0x60] sm:$0xff] }
 0x3da   : > { %4429 = vst.msk [vmem:[#allocation2 + $0x80] sm:$0xff] %vm4359_vm4, %v4323_v50  ;;  %v4324_v33 = vmul.f32 %v13138_v3, %v3988_v16  ;;  %v10037_v30 = vpop.f32.mrb[16].mxu0  ;;  %v13251_v15 = vpack.c.bf16 %v4477_v18, %v4476_v31  ;;  %v4480_v43 = vld [vmem:[#allocation2 + $0x78] sm:$0xff] }
 0x3db   : > { %4432 = vst.msk [vmem:[#allocation2 + $0x98] sm:$0xff] %vm4359_vm4, %v4326_v44  ;;  %v3945_v2 = vadd.f32 %v10037_v30, %v13145_v54  ;;  %v3745_v41 = vpop.f32.mrb[17].mxu0  ;;  %v4478_v28 = vld [vmem:[#allocation2 + $0x68] sm:$0xff]  ;;  %v13255_v26 = vpack.c.bf16 %v4480_v43, %v4479_v56  ;;  %v13268_v44 = vpop.permute.xlu1 %4208 }
 0x3dc   : > { %15475 = vst [vmem:[#allocation22_spill] sm:$0xff] %v13251_v15  ;;  %4430 = vst.msk [vmem:[#allocation2 + $0x88] sm:$0xff] %vm4359_vm4, %v4324_v33  ;;  %v3943_v53 = vadd.f32 %v13145_v54, %v3745_v41  ;;  %v10038_v3 = vpop.f32.mrb[18].mxu0  ;;  %10080 = vmatmul.mubr.msk.bf16.gmra.mrb[32].mxu1 %vm4359_vm4, %v13251_v15  ;;  %v13263_v31 = vpack.c.bf16 %v4478_v28, %v4477_v18  ;;  %v13265_v24 = vpack.c.bf16 %v4479_v56, %v4478_v28  ;;  %v13277_v28 = vpop.permute.xlu0 %4213 }
 0x3dd   : > { %15476 = vst [vmem:[#allocation24_spill] sm:$0xff] %v13255_v26  ;;  %v3993_v61 = vmax.f32 %v3945_v2, 0.0  ;;  %v3946_v50 = vadd.f32 %v10038_v3, %v13145_v54  ;;  %v3748_v16 = vpop.f32.mrb[19].mxu0 }
 0x3de   : > { %15477 = vst [vmem:[#allocation27_spill] sm:$0xff] %v13263_v31  ;;  %15478 = vst [vmem:[#allocation30_spill] sm:$0xff] %v13265_v24  ;;  %v3991_v30 = vmax.f32 %v3943_v53, 0.0  ;;  %v3944_v8 = vadd.f32 %v13145_v54, %v3748_v16  ;;  %10083 = vmatprep.mubr.msk.bf16.mxu1 %vm4359_vm4, %v13265_v24 }
 0x3df   : > { %v4329_v33 = vmul.f32 %v13161_v17, %v3993_v61  ;;  %v3994_v41 = vmax.f32 %v3946_v50, 0.0 }
 0x3e0   : > { %v4327_v18 = vmul.f32 %v13152_v6, %v3991_v30  ;;  %v3992_v15 = vmax.f32 %v3944_v8, 0.0  ;;  %v4483_v24 = vld [vmem:[#allocation2 + $0x90] sm:$0xff]  ;;  %v13302_v37 = vpop.permute.xlu0 %4223 }
 0x3e1   : > { %4435 = vst.msk [vmem:[#allocation2 + $0xb0] sm:$0xff] %vm4359_vm4, %v4329_v33  ;;  %v4330_v56 = vmul.f32 %v13166_v25, %v3994_v41  ;;  %v4481_v2 = vld [vmem:[#allocation2 + $0x80] sm:$0xff]  ;;  %v13287_v25 = vpop.permute.xlu1 %4218 }
 0x3e2   : > { %4433 = vst.msk [vmem:[#allocation2 + $0xa0] sm:$0xff] %vm4359_vm4, %v4327_v18  ;;  %v4328_v53 = vmul.f32 %v13155_v21, %v3992_v15  ;;  %v10041_v3 = vpop.f32.mrb[20].mxu0  ;;  %v13281_v16 = vpack.c.bf16 %v4481_v2, %v4480_v43  ;;  %v4484_v17 = vld [vmem:[#allocation2 + $0x98] sm:$0xff] }
 0x3e3   : > { %4436 = vst.msk [vmem:[#allocation2 + $0xb8] sm:$0xff] %vm4359_vm4, %v4330_v56  ;;  %v3949_v8 = vadd.f32 %v10041_v3, %v13145_v54  ;;  %v3761_v6 = vpop.f32.mrb[21].mxu0  ;;  %v4482_v61 = vld [vmem:[#allocation2 + $0x88] sm:$0xff]  ;;  %v13285_v50 = vpack.c.bf16 %v4484_v17, %v4483_v24 }
 0x3e4   : > { %15479 = vst [vmem:[#allocation6_spill] sm:$0xff] %v13281_v16  ;;  %4434 = vst.msk [vmem:[#allocation2 + $0xa8] sm:$0xff] %vm4359_vm4, %v4328_v53  ;;  %v3947_v30 = vadd.f32 %v13145_v54, %v3761_v6  ;;  %v10042_v21 = vpop.f32.mrb[22].mxu0  ;;  %10084 = vmatmul.mubr.msk.bf16.gmra.mrb[36].mxu1 %vm4359_vm4, %v13281_v16  ;;  %v13293_v15 = vpack.c.bf16 %v4482_v61, %v4481_v2  ;;  %v13295_v43 = vpack.c.bf16 %v4483_v24, %v4482_v61 }
 0x3e5   : > { %15480 = vst [vmem:[#allocation8_spill] sm:$0xff] %v13285_v50  ;;  %v3997_v33 = vmax.f32 %v3949_v8, 0.0  ;;  %v3950_v41 = vadd.f32 %v10042_v21, %v13145_v54  ;;  %v3764_v18 = vpop.f32.mrb[23].mxu0  ;;  %v13307_v61 = vpop.permute.xlu1 %4228 }
 0x3e6   : > { %15481 = vst [vmem:[#allocation10_spill] sm:$0xff] %v13293_v15  ;;  %15482 = vst [vmem:[#allocation12_spill] sm:$0xff] %v13295_v43  ;;  %v3995_v56 = vmax.f32 %v3947_v30, 0.0  ;;  %v3948_v3 = vadd.f32 %v13145_v54, %v3764_v18  ;;  %10087 = vmatprep.mubr.msk.bf16.mxu1 %vm4359_vm4, %v13295_v43 }
 0x3e7   : > { %v4333_v53 = vmul.f32 %v13213_v23, %v3997_v33  ;;  %v3998_v6 = vmax.f32 %v3950_v41, 0.0 }
 0x3e8   : > { %v4331_v2 = vmul.f32 %v13178_v35, %v3995_v56  ;;  %v3996_v16 = vmax.f32 %v3948_v3, 0.0  ;;  %v4487_v23 = vld [vmem:[#allocation2 + $0xb0] sm:$0xff] }
 0x3e9   : > { %4439 = vst.msk [vmem:[#allocation2 + $0xd0] sm:$0xff] %vm4359_vm4, %v4333_v53  ;;  %v4334_v24 = vmul.f32 %v13218_v0, %v3998_v6  ;;  %v4485_v8 = vld [vmem:[#allocation2 + $0xa0] sm:$0xff] }
 0x3ea   : > { %4437 = vst.msk [vmem:[#allocation2 + $0xc0] sm:$0xff] %vm4359_vm4, %v4331_v2  ;;  %v4332_v30 = vmul.f32 %v13195_v1, %v3996_v16  ;;  %v10045_v21 = vpop.f32.mrb[24].mxu0  ;;  %v13311_v18 = vpack.c.bf16 %v4485_v8, %v4484_v17  ;;  %v4488_v33 = vld [vmem:[#allocation2 + $0xb8] sm:$0xff]  ;;  %v13327_v2 = vpop.permute.xlu0 %4233 }
 0x3eb   : > { %4440 = vst.msk [vmem:[#allocation2 + $0xd8] sm:$0xff] %vm4359_vm4, %v4334_v24  ;;  %v10589_v35 = vadd.f32 %v10045_v21, %v13065_v29  ;;  %v3777_v41 = vpop.f32.mrb[25].mxu0  ;;  %v4486_v56 = vld [vmem:[#allocation2 + $0xa8] sm:$0xff]  ;;  %v13315_v3 = vpack.c.bf16 %v4488_v33, %v4487_v23  ;;  %v13334_v21 = vpop.permute.xlu1 %4238 }
 0x3ec   : > { %15483 = vst [vmem:[#allocation14_spill] sm:$0xff] %v13311_v18  ;;  %4438 = vst.msk [vmem:[#allocation2 + $0xc8] sm:$0xff] %vm4359_vm4, %v4332_v30  ;;  %v10590_v0 = vadd.f32 %v3777_v41, %v13067_v48  ;;  %v10046_v53 = vpop.f32.mrb[26].mxu0  ;;  %10088 = vmatmul.mubr.msk.bf16.gmra.mrb[40].mxu1 %vm4359_vm4, %v13311_v18  ;;  %v13321_v1 = vpack.c.bf16 %v4486_v56, %v4485_v8  ;;  %v13323_v16 = vpack.c.bf16 %v4487_v23, %v4486_v56 }
 0x3ed   : > { %15484 = vst [vmem:[#allocation15_spill] sm:$0xff] %v13315_v3  ;;  %v3953_v17 = vadd.f32 %v10589_v35, %v13145_v54  ;;  %v10591_v29 = vadd.f32 %v10046_v53, %v13069_v39  ;;  %v3780_v6 = vpop.f32.mrb[27].mxu0 }
 0x3ee   : > { %15485 = vst [vmem:[#allocation16_spill] sm:$0xff] %v13321_v1  ;;  %15486 = vst [vmem:[#allocation18_spill] sm:$0xff] %v13323_v16  ;;  %v3951_v24 = vadd.f32 %v10590_v0, %v13145_v54  ;;  %v10592_v30 = vadd.f32 %v3780_v6, %v13071_v27  ;;  %10091 = vmatprep.mubr.msk.bf16.mxu1 %vm4359_vm4, %v13323_v16 }
 0x3ef   : > { %v4001_v48 = vmax.f32 %v3953_v17, 0.0  ;;  %v3954_v8 = vadd.f32 %v10591_v29, %v13145_v54 }
 0x3f0   : > { %v3999_v23 = vmax.f32 %v3951_v24, 0.0  ;;  %v3952_v35 = vadd.f32 %v10592_v30, %v13145_v54  ;;  %v4491_v6 = vld [vmem:[#allocation2 + $0xd0] sm:$0xff] }
 0x3f1   : > { %v4337_v39 = vmul.f32 %v13257_v51, %v4001_v48  ;;  %v4002_v41 = vmax.f32 %v3954_v8, 0.0  ;;  %v4489_v56 = vld [vmem:[#allocation2 + $0xc0] sm:$0xff]  ;;  %v4244_v51 = vpop.permute.xlu0 %4243 }
 0x3f2   : > { %v4335_v53 = vmul.f32 %v13238_v45, %v3999_v23  ;;  %v4000_v0 = vmax.f32 %v3952_v35, 0.0  ;;  %v10049_v18 = vpop.f32.mrb[28].mxu0  ;;  %v13339_v27 = vpack.c.bf16 %v4489_v56, %v4488_v33  ;;  %v4492_v16 = vld [vmem:[#allocation2 + $0xd8] sm:$0xff]  ;;  %v4249_v35 = vpop.permute.xlu1 %4248 }
 0x3f3   : > { %4443 = vst.msk [vmem:[#allocation2 + $0xf0] sm:$0xff] %vm4359_vm4, %v4337_v39  ;;  %v4338_v17 = vmul.f32 %v13268_v44, %v4002_v41  ;;  %v10593_v29 = vadd.f32 %v10049_v18, %v13073_v32  ;;  %v3793_v24 = vpop.f32.mrb[29].mxu0  ;;  %v4490_v30 = vld [vmem:[#allocation2 + $0xc8] sm:$0xff]  ;;  %v13344_v43 = vpack.c.bf16 %v4492_v16, %v4491_v6 }
 0x3f4   : > { %4441 = vst.msk [vmem:[#allocation2 + $0xe0] sm:$0xff] %vm4359_vm4, %v4335_v53  ;;  %v4336_v45 = vmul.f32 %v13244_v5, %v4000_v0  ;;  %v10594_v33 = vadd.f32 %v3793_v24, %v13075_v63  ;;  %v10050_v48 = vpop.f32.mrb[30].mxu0  ;;  %10092 = vmatmul.mubr.msk.bf16.gmra.mrb[44].mxu1 %vm4359_vm4, %v13339_v27  ;;  %v13351_v8 = vpack.c.bf16 %v4490_v30, %v4489_v56 }
 0x3f5   : > { %15487 = vst [vmem:[#allocation21_spill] sm:$0xff] %v13344_v43  ;;  %v13353_v44 = vpack.c.bf16 %v4491_v6, %v4490_v30  ;;  %4444 = vst.msk [vmem:[#allocation2 + $0xf8] sm:$0xff] %vm4359_vm4, %v4338_v17  ;;  %v3957_v32 = vadd.f32 %v10593_v29, %v13145_v54  ;;  %v10595_v18 = vadd.f32 %v10050_v48, %v13077_v40  ;;  %v3796_v23 = vpop.f32.mrb[31].mxu0  ;;  %v13366_v6 = vpop.permute.xlu0 %4253 }
 0x3f6   : > { %15488 = vst [vmem:[#allocation23_spill] sm:$0xff] %v13351_v8  ;;  %4442 = vst.msk [vmem:[#allocation2 + $0xe8] sm:$0xff] %vm4359_vm4, %v4336_v45  ;;  %v3955_v63 = vadd.f32 %v10594_v33, %v13145_v54  ;;  %v10596_v5 = vadd.f32 %v3796_v23, %v13079_v42  ;;  %v13372_v48 = vpop.permute.xlu1 %4258 }
 0x3f7   : > { %10095 = vmatprep.mubr.msk.bf16.mxu1 %vm4359_vm4, %v13353_v44  ;;  %v4005_v39 = vmax.f32 %v3957_v32, 0.0  ;;  %v3958_v41 = vadd.f32 %v10595_v18, %v13145_v54 }
 0x3f8   : > { %v4003_v56 = vmax.f32 %v3955_v63, 0.0  ;;  %v3956_v53 = vadd.f32 %v10596_v5, %v13145_v54 }
 0x3f9   : > { %v4341_v0 = vmul.f32 %v13302_v37, %v4005_v39  ;;  %v4006_v40 = vmax.f32 %v3958_v41, 0.0 }
 0x3fa   : > { %v4339_v17 = vmul.f32 %v13277_v28, %v4003_v56  ;;  %v4004_v29 = vmax.f32 %v3956_v53, 0.0  ;;  %v10053_v24 = vpop.f32.mrb[32].mxu0  ;;  %v4495_v23 = vld [vmem:[#allocation2 + $0xf0] sm:$0xff] }
 0x3fb   : > { %4447 = vst.msk [vmem:[#allocation2 + $0x110] sm:$0xff] %vm4359_vm4, %v4341_v0  ;;  %v4342_v42 = vmul.f32 %v13307_v61, %v4006_v40  ;;  %v10597_v30 = vadd.f32 %v10053_v24, %v13081_v62  ;;  %v3809_v45 = vpop.f32.mrb[33].mxu0  ;;  %v4493_v33 = vld [vmem:[#allocation2 + $0xe0] sm:$0xff]  ;;  %v4264_v0 = vpop.permute.xlu0 %4263 }
 0x3fc   : > { %4445 = vst.msk [vmem:[#allocation2 + $0x100] sm:$0xff] %vm4359_vm4, %v4339_v17  ;;  %v4340_v37 = vmul.f32 %v13287_v25, %v4004_v29  ;;  %v10598_v32 = vadd.f32 %v3809_v45, %v13083_v10  ;;  %v10054_v18 = vpop.f32.mrb[34].mxu0  ;;  %v13377_v28 = vpack.c.bf16 %v4493_v33, %v4492_v16  ;;  %v4496_v63 = vld [vmem:[#allocation2 + $0xf8] sm:$0xff] }
 0x3fd   : > { %4448 = vst.msk [vmem:[#allocation2 + $0x118] sm:$0xff] %vm4359_vm4, %v4342_v42  ;;  %v3961_v61 = vadd.f32 %v10597_v30, %v13145_v54  ;;  %v10599_v62 = vadd.f32 %v10054_v18, %v13085_v59  ;;  %v3812_v5 = vpop.f32.mrb[35].mxu0  ;;  %v4494_v39 = vld [vmem:[#allocation2 + $0xe8] sm:$0xff]  ;;  %v13382_v41 = vpack.c.bf16 %v4496_v63, %v4495_v23 }
 0x3fe   : > { %4446 = vst.msk [vmem:[#allocation2 + $0x108] sm:$0xff] %vm4359_vm4, %v4340_v37  ;;  %v3959_v25 = vadd.f32 %v10598_v32, %v13145_v54  ;;  %v10600_v10 = vadd.f32 %v3812_v5, %v13087_v13  ;;  %10096 = vmatmul.mubr.msk.bf16.gmra.mrb[48].mxu1 %vm4359_vm4, %v13377_v28  ;;  %v13389_v16 = vpack.c.bf16 %v4494_v39, %v4493_v33  ;;  %v4269_v13 = vpop.permute.xlu1 %4268 }
 0x3ff   : > { %15489 = vst [vmem:[#allocation25_spill] sm:$0xff] %v13382_v41  ;;  %v13391_v56 = vpack.c.bf16 %v4495_v23, %v4494_v39  ;;  %v4009_v53 = vmax.f32 %v3961_v61, 0.0  ;;  %v3962_v59 = vadd.f32 %v10599_v62, %v13145_v54 }
 0x400   : > { %15490 = vst [vmem:[#allocation26_spill] sm:$0xff] %v13389_v16  ;;  %v4007_v40 = vmax.f32 %v3959_v25, 0.0  ;;  %v3960_v17 = vadd.f32 %v10600_v10, %v13145_v54 }
 0x401   : > { %10099 = vmatprep.mubr.msk.bf16.mxu1 %vm4359_vm4, %v13391_v56  ;;  %v4345_v29 = vmul.f32 %v4244_v51, %v4009_v53  ;;  %v4010_v24 = vmax.f32 %v3962_v59, 0.0  ;;  %v4274_v53 = vpop.permute.xlu0 %4273 }
 0x402   : > { %v4343_v42 = vmul.f32 %v13327_v2, %v4007_v40  ;;  %v4008_v30 = vmax.f32 %v3960_v17, 0.0  ;;  %v10057_v45 = vpop.f32.mrb[36].mxu0  ;;  %v4499_v5 = vld [vmem:[#allocation2 + $0x110] sm:$0xff]  ;;  %v4279_v17 = vpop.permute.xlu1 %4278 }
 0x403   : > { %4451 = vst.msk [vmem:[#allocation2 + $0x130] sm:$0xff] %vm4359_vm4, %v4345_v29  ;;  %v4346_v33 = vmul.f32 %v4249_v35, %v4010_v24  ;;  %v10601_v37 = vadd.f32 %v10057_v45, %v13089_v19  ;;  %v3825_v32 = vpop.f32.mrb[37].mxu0  ;;  %v4497_v18 = vld [vmem:[#allocation2 + $0x100] sm:$0xff] }
 0x404   : > { %4449 = vst.msk [vmem:[#allocation2 + $0x120] sm:$0xff] %vm4359_vm4, %v4343_v42  ;;  %v4344_v23 = vmul.f32 %v13334_v21, %v4008_v30  ;;  %v10602_v61 = vadd.f32 %v3825_v32, %v13091_v55  ;;  %v10058_v51 = vpop.f32.mrb[38].mxu0  ;;  %v13403_v62 = vpack.c.bf16 %v4497_v18, %v4496_v63  ;;  %v4500_v2 = vld [vmem:[#allocation2 + $0x118] sm:$0xff] }
 0x405   : > { %4452 = vst.msk [vmem:[#allocation2 + $0x138] sm:$0xff] %vm4359_vm4, %v4346_v33  ;;  %v3965_v39 = vadd.f32 %v10601_v37, %v13145_v54  ;;  %v10603_v35 = vadd.f32 %v10058_v51, %v13093_v58  ;;  %v3828_v19 = vpop.f32.mrb[39].mxu0  ;;  %v4498_v25 = vld [vmem:[#allocation2 + $0x108] sm:$0xff]  ;;  %v13408_v10 = vpack.c.bf16 %v4500_v2, %v4499_v5 }
 0x406   : > { %4450 = vst.msk [vmem:[#allocation2 + $0x128] sm:$0xff] %vm4359_vm4, %v4344_v23  ;;  %v3963_v55 = vadd.f32 %v10602_v61, %v13145_v54  ;;  %v10604_v21 = vadd.f32 %v3828_v19, %v13095_v47  ;;  %10100 = vmatmul.mubr.msk.bf16.gmra.mrb[52].mxu1 %vm4359_vm4, %v13403_v62  ;;  %v13415_v63 = vpack.c.bf16 %v4498_v25, %v4497_v18  ;;  %v4284_v61 = vpop.permute.xlu0 %4283 }
 0x407   : > { %15491 = vst [vmem:[#allocation28_spill] sm:$0xff] %v13408_v10  ;;  %v13417_v59 = vpack.c.bf16 %v4499_v5, %v4498_v25  ;;  %v4013_v40 = vmax.f32 %v3965_v39, 0.0  ;;  %v3966_v58 = vadd.f32 %v10603_v35, %v13145_v54 }
 0x408   : > { %15492 = vst [vmem:[#allocation29_spill] sm:$0xff] %v13415_v63  ;;  %v4011_v29 = vmax.f32 %v3963_v55, 0.0  ;;  %v3964_v24 = vadd.f32 %v10604_v21, %v13145_v54  ;;  %v4289_v21 = vpop.permute.xlu1 %4288 }
 0x409   : > { %10103 = vmatprep.mubr.msk.bf16.mxu1 %vm4359_vm4, %v13417_v59  ;;  %v4349_v42 = vmul.f32 %v4264_v0, %v4013_v40  ;;  %v4014_v30 = vmax.f32 %v3966_v58, 0.0 }
 0x40a   : > { %v4347_v47 = vmul.f32 %v13366_v6, %v4011_v29  ;;  %v4012_v45 = vmax.f32 %v3964_v24, 0.0  ;;  %v10061_v33 = vpop.f32.mrb[40].mxu0  ;;  %v4503_v6 = vld [vmem:[#allocation2 + $0x130] sm:$0xff] }
 0x40b   : > { %4455 = vst.msk [vmem:[#allocation2 + $0x150] sm:$0xff] %vm4359_vm4, %v4349_v42  ;;  %v4350_v37 = vmul.f32 %v4269_v13, %v4014_v30  ;;  %v10605_v32 = vadd.f32 %v10061_v33, %v13097_v46  ;;  %v3841_v18 = vpop.f32.mrb[41].mxu0  ;;  %v4501_v23 = vld [vmem:[#allocation2 + $0x120] sm:$0xff] }
 0x40c   : > { %4453 = vst.msk [vmem:[#allocation2 + $0x140] sm:$0xff] %vm4359_vm4, %v4347_v47  ;;  %v4348_v51 = vmul.f32 %v13372_v48, %v4012_v45  ;;  %v10606_v5 = vadd.f32 %v3841_v18, %v13099_v60  ;;  %v10062_v0 = vpop.f32.mrb[42].mxu0  ;;  %v13429_v39 = vpack.c.bf16 %v4501_v23, %v4500_v2  ;;  %v4504_v35 = vld [vmem:[#allocation2 + $0x138] sm:$0xff]  ;;  %v4294_v47 = vpop.permute.xlu0 %4293 }
 0x40d   : > { %4456 = vst.msk [vmem:[#allocation2 + $0x158] sm:$0xff] %vm4359_vm4, %v4350_v37  ;;  %v3969_v13 = vadd.f32 %v10605_v32, %v13145_v54  ;;  %v10607_v46 = vadd.f32 %v10062_v0, %v13101_v57  ;;  %v3844_v19 = vpop.f32.mrb[43].mxu0  ;;  %v4502_v25 = vld [vmem:[#allocation2 + $0x128] sm:$0xff]  ;;  %v13434_v55 = vpack.c.bf16 %v4504_v35, %v4503_v6 }
 0x40e   : > { %4454 = vst.msk [vmem:[#allocation2 + $0x148] sm:$0xff] %vm4359_vm4, %v4348_v51  ;;  %v3967_v60 = vadd.f32 %v10606_v5, %v13145_v54  ;;  %v10608_v48 = vadd.f32 %v3844_v19, %v13103_v12  ;;  %10104 = vmatmul.mubr.msk.bf16.gmra.mrb[56].mxu1 %vm4359_vm4, %v13429_v39  ;;  %v13441_v2 = vpack.c.bf16 %v4502_v25, %v4501_v23  ;;  %v4299_v51 = vpop.permute.xlu1 %4298 }
 0x40f   : > { %15493 = vst [vmem:[#allocation31_spill] sm:$0xff] %v13434_v55  ;;  %v13443_v40 = vpack.c.bf16 %v4503_v6, %v4502_v25  ;;  %v4017_v58 = vmax.f32 %v3969_v13, 0.0  ;;  %v3970_v57 = vadd.f32 %v10607_v46, %v13145_v54 }
 0x410   : > { %15494 = vst [vmem:[#allocation32_spill] sm:$0xff] %v13441_v2  ;;  %v4015_v29 = vmax.f32 %v3967_v60, 0.0  ;;  %v3968_v24 = vadd.f32 %v10608_v48, %v13145_v54 }
 0x411   : > { %10107 = vmatprep.mubr.msk.bf16.mxu1 %vm4359_vm4, %v13443_v40  ;;  %v4353_v42 = vmul.f32 %v4284_v61, %v4017_v58  ;;  %v4018_v30 = vmax.f32 %v3970_v57, 0.0  ;;  %v4304_v58 = vpop.permute.xlu0 %4303 }
 0x412   : > { %v4351_v12 = vmul.f32 %v4274_v53, %v4015_v29  ;;  %v4016_v45 = vmax.f32 %v3968_v24, 0.0  ;;  %v10065_v33 = vpop.f32.mrb[44].mxu0  ;;  %v4507_v13 = vld [vmem:[#allocation2 + $0x150] sm:$0xff]  ;;  %v15143_v24 = vshrl.u32 %v13201_v52, 16 }
 0x413   : > { %4459 = vst.msk [vmem:[#allocation2 + $0x170] sm:$0xff] %vm4359_vm4, %v4353_v42  ;;  %v4354_v37 = vmul.f32 %v4289_v21, %v4018_v30  ;;  %v10609_v32 = vadd.f32 %v10065_v33, %v13105_v38  ;;  %v3857_v18 = vpop.f32.mrb[45].mxu0  ;;  %v4505_v23 = vld [vmem:[#allocation2 + $0x140] sm:$0xff]  ;;  %v15141_v30 = vshrl.u32 %v13187_v11, 16 }
 0x414   : > { %4457 = vst.msk [vmem:[#allocation2 + $0x160] sm:$0xff] %vm4359_vm4, %v4351_v12  ;;  %v4352_v5 = vmul.f32 %v4279_v17, %v4016_v45  ;;  %v10610_v0 = vadd.f32 %v3857_v18, %v13107_v14  ;;  %v10066_v6 = vpop.f32.mrb[46].mxu0  ;;  %v13453_v61 = vpack.c.bf16 %v4505_v23, %v4504_v35  ;;  %v4508_v53 = vld [vmem:[#allocation2 + $0x158] sm:$0xff]  ;;  %v4309_v12 = vpop.permute.xlu1 %4308  ;;  %v15144_v45 = vshll.u32 %v13201_v52, 16 }
 0x415   : > { %4460 = vst.msk [vmem:[#allocation2 + $0x178] sm:$0xff] %vm4359_vm4, %v4354_v37  ;;  %v3973_v46 = vadd.f32 %v10609_v32, %v13145_v54  ;;  %v10611_v19 = vadd.f32 %v10066_v6, %v13109_v36  ;;  %v3860_v38 = vpop.f32.mrb[47].mxu0  ;;  %v4506_v25 = vld [vmem:[#allocation2 + $0x148] sm:$0xff]  ;;  %v13458_v21 = vpack.c.bf16 %v4508_v53, %v4507_v13  ;;  %v15142_v32 = vshll.u32 %v13187_v11, 16 }
 0x416   : > { %4458 = vst.msk [vmem:[#allocation2 + $0x168] sm:$0xff] %vm4359_vm4, %v4352_v5  ;;  %v3971_v17 = vadd.f32 %v10610_v0, %v13145_v54  ;;  %v10612_v14 = vadd.f32 %v3860_v38, %v13111_v49  ;;  %10108 = vmatmul.mubr.msk.bf16.gmra.mrb[60].mxu1 %vm4359_vm4, %v13453_v61  ;;  %v13465_v35 = vpack.c.bf16 %v4506_v25, %v4505_v23  ;;  %v4903_v38 = vrot.slane %v15144_v45, 4 }
 0x417   : > { %v13467_v60 = vpack.c.bf16 %v4507_v13, %v4506_v25  ;;  %v4021_v48 = vmax.f32 %v3973_v46, 0.0  ;;  %v3974_v36 = vadd.f32 %v10611_v19, %v13145_v54  ;;  %v4909_v19 = vrot.slane %v15141_v30, 3 }
 0x418   : > { %v4019_v57 = vmax.f32 %v3971_v17, 0.0  ;;  %v3972_v29 = vadd.f32 %v10612_v14, %v13145_v54  ;;  %v4912_v25 = vrot.slane %v15142_v32, 4 }
 0x419   : > { %10111 = vmatprep.mubr.msk.bf16.mxu1 %vm4359_vm4, %v13467_v60  ;;  %v4357_v49 = vmul.f32 %v4304_v58, %v4021_v48  ;;  %v4022_v42 = vmax.f32 %v3974_v36, 0.0  ;;  %v15147_v48 = vshrl.u32 %v13227_v9, 16  ;;  %v15145_v58 = vshrl.u32 %v13233_v4, 16 }
 0x41a   : > { %v4355_v33 = vmul.f32 %v4294_v47, %v4019_v57  ;;  %v4020_v37 = vmax.f32 %v3972_v29, 0.0  ;;  %v4511_v0 = vld [vmem:[#allocation2 + $0x170] sm:$0xff]  ;;  %v4900_v47 = vrot.slane %v15143_v24, 3  ;;  %v13501_v14 = vor.u32 %v4912_v25, %v4909_v19 }
 0x41b   : > { %4463 = vst.msk [vmem:[#allocation2 + $0x190] sm:$0xff] %vm4359_vm4, %v4357_v49  ;;  %v4358_v18 = vmul.f32 %v4309_v12, %v4022_v42  ;;  %v4509_v54 = vld [vmem:[#allocation2 + $0x160] sm:$0xff]  ;;  %v15146_v57 = vshll.u32 %v13233_v4, 16  ;;  %v15148_v29 = vshll.u32 %v13227_v9, 16  ;;  %v15151_v49 = vshrl.u32 %v13255_v26, 16 }
 0x41c   : > { %4461 = vst.msk [vmem:[#allocation2 + $0x180] sm:$0xff] %vm4359_vm4, %v4355_v33  ;;  %v4356_v23 = vmul.f32 %v4299_v51, %v4020_v37  ;;  %v13479_v5 = vpack.c.bf16 %v4509_v54, %v4508_v53  ;;  %v4512_v6 = vld [vmem:[#allocation2 + $0x178] sm:$0xff]  ;;  %v4904_v17 = vor.u32 %v4903_v38, %v4900_v47  ;;  %v15149_v12 = vshrl.u32 %v13263_v31, 16 }
 0x41d   : > { %4464 = vst.msk [vmem:[#allocation2 + $0x198] sm:$0xff] %vm4359_vm4, %v4358_v18  ;;  %v4510_v13 = vld [vmem:[#allocation2 + $0x168] sm:$0xff]  ;;  %v13482_v46 = vpack.c.bf16 %v4512_v6, %v4511_v0  ;;  %v15150_v33 = vshll.u32 %v13263_v31, 16  ;;  %v15156_v37 = vshll.u32 %v13255_v26, 16  ;;  %v15152_v18 = vshrl.u32 %v13293_v15, 16 }
 0x41e   : > { %15495 = vst [vmem:[#allocation33_spill] sm:$0xff] %v13479_v5  ;;  %4462 = vst.msk [vmem:[#allocation2 + $0x188] sm:$0xff] %vm4359_vm4, %v4356_v23  ;;  %10112 = vmatmul.mubr.msk.bf16.gmra.mrb[64].mxu1 %vm4359_vm4, %v13479_v5  ;;  %v13491_v51 = vpack.c.bf16 %v4510_v13, %v4509_v54  ;;  %v13493_v53 = vpack.c.bf16 %v4511_v0, %v4510_v13  ;;  %v15153_v54 = vshll.u32 %v13293_v15, 16  ;;  %v15154_v23 = vshrl.u32 %v13285_v50, 16 }
 0x41f   : > { %v15155_v0 = vshll.u32 %v13285_v50, 16  ;;  %v15168_v13 = vshll.u32 %v13321_v1, 16  ;;  %v15171_v47 = vshrl.u32 %v13315_v3, 16  ;;  %v15172_v19 = vshll.u32 %v13315_v3, 16 }
 0x420   : > { %15496 = vst [vmem:[#allocation3_spill] sm:$0xff] %v13493_v53  ;;  %10115 = vmatprep.mubr.msk.bf16.mxu1 %vm4359_vm4, %v13493_v53  ;;  %v4918_v38 = vrot.slane %v15145_v58, 3  ;;  %v4921_v25 = vrot.slane %v15146_v57, 4  ;;  %v4927_v30 = vrot.slane %v15147_v48, 3  ;;  %v4930_v32 = vrot.slane %v15148_v29, 4 }
 0x421   : > { %v4936_v24 = vrot.slane %v15149_v12, 3  ;;  %v4939_v45 = vrot.slane %v15150_v33, 4  ;;  %v4948_v58 = vrot.slane %v15156_v37, 4  ;;  %v4954_v57 = vrot.slane %v15152_v18, 3  ;;  %v8910_v33 = vld [vmem:[%s14977_s3 + $0x50] sm:$0xff] }
 0x422   : > { %v4957_v48 = vrot.slane %v15153_v54, 4  ;;  %v4963_v29 = vrot.slane %v15154_v23, 3  ;;  %v4966_v12 = vrot.slane %v15155_v0, 4  ;;  %v4975_v54 = vrot.slane %v15168_v13, 4 }
 0x423   : > { %v13504_v36 = vld [vmem:[#allocation2 + $0x180] sm:$0xff]  ;;  %v4981_v23 = vrot.slane %v15171_v47, 3  ;;  %v4984_v0 = vrot.slane %v15172_v19, 4  ;;  %v4905_v15 = vsel %vm719_vm2, %v13126_v34, %v4904_v17  ;;  %v4914_v26 = vsel %vm719_vm2, %v4904_v17, %v13501_v14  ;;  %v8937_v19 = vld [vmem:[%s14977_s3 + $0x68] sm:$0xff] }
 0x424   : > { %v13511_v42 = vpack.c.bf16 %v13504_v36, %v4512_v6  ;;  %v15163_v6 = vshrl.u32 %v13321_v1, 16  ;;  %v4931_v1 = vor.u32 %v4930_v32, %v4927_v30  ;;  %v4940_v13 = vor.u32 %v4939_v45, %v4936_v24  ;;  %v8936_v47 = vld [vmem:[%s14977_s3 + $0x60] sm:$0xff] }
 0x425   : > { %v15176_v50 = vshll.u32 %v13222_v22, 16  ;;  %v4958_v34 = vor.u32 %v4957_v48, %v4954_v57  ;;  %v4967_v37 = vor.u32 %v4966_v12, %v4963_v29  ;;  %v15498_v24 = vshrl.u32 %v13351_v8, 16 }
 0x426   : > { %15497 = vst [vmem:[#allocation5_spill] sm:$0xff] %v13511_v42  ;;  %10116 = vmatmul.mubr.msk.bf16.gmra.mrb[68].mxu1 %vm4359_vm4, %v13511_v42  ;;  %v4972_v18 = vrot.slane %v15163_v6, 3  ;;  %v4922_v6 = vor.u32 %v4921_v25, %v4918_v38  ;;  %v13580_v38 = vor.u32 %v4984_v0, %v4981_v23  ;;  %v15499_v45 = vshll.u32 %v13351_v8, 16  ;;  %v15509_v25 = vld [vmem:[#allocation22_spill] sm:$0xff] }
 0x427   : > { %10123 = vmatprep.mubr.msk.bf16.mxu1 %vm4359_vm4, %v13132_v20  ;;  %v4945_v20 = vrot.slane %v15151_v49, 3  ;;  %v8911_v49 = vld [vmem:[%s14977_s3 + $0x58] sm:$0xff]  ;;  %v4990_v30 = vrot.slane %v15498_v24, 3  ;;  %v13594_v48 = vpack.c.bf16 %v8937_v19, %v8936_v47  ;;  %v13601_v57 = vsel %vm719_vm2, %v4931_v1, %v4940_v13  ;;  %v15514_v24 = vld [vmem:[#allocation18_spill] sm:$0xff] }
 0x428   : > { %v5408_v31 = vpack.c.bf16 %v8911_v49, %v8910_v33  ;;  %v4976_v17 = vor.u32 %v4975_v54, %v4972_v18  ;;  %v4993_v32 = vrot.slane %v15499_v45, 4  ;;  %v15174_v49 = vshll.u32 %v13344_v43, 16  ;;  %15502 = vst [vmem:[#allocation36_spill] sm:$0xff] %v13601_v57  ;;  %v15507_v54 = vld [vmem:[#allocation20_spill] sm:$0xff] }
 0x429   : > { %v4949_v9 = vor.u32 %v4948_v58, %v4945_v20  ;;  %v15173_v58 = vshrl.u32 %v13344_v43, 16  ;;  %v5943_v12 = vrot.slane %v15176_v50, 4  ;;  %v13612_v33 = vsel %vm719_vm2, %v4958_v34, %v4967_v37  ;;  %v15513_v50 = vld [vmem:[#allocation14_spill] sm:$0xff] }
 0x42a   : > { %15505 = vst [vmem:[#allocation39_spill] sm:$0xff] %v13612_v33  ;;  %v13615_v18 = vsel %vm719_vm2, %v4967_v37, %v4976_v17  ;;  %v13622_v0 = vor.u32 %v4993_v32, %v4990_v30  ;;  %v15515_v32 = vshrl.u32 %v15507_v54, 16  ;;  %v15516_v37 = vshll.u32 %v15507_v54, 16 }
 0x42b   : > { %v13604_v29 = vsel %vm719_vm2, %v4940_v13, %v4949_v9  ;;  %15506 = vst [vmem:[#allocation40_spill] sm:$0xff] %v13615_v18  ;;  %v15517_v30 = vshrl.u32 %v15509_v25, 16 }
 0x42c   : > { %15503 = vst [vmem:[#allocation37_spill] sm:$0xff] %v13604_v29 }
 0x42d   : > { %v5950_v20 = vrot.slane %v15517_v30, 3  ;;  %v15529_v30 = vshll.u32 %v15514_v24, 16 }
 0x42e   : > { %10124 = vmatmul.mubr.msk.bf16.vlgmr.msra.gmra.mrb[24].mxu1 %vm4359_vm4, %v4905_v15  ;;  %v13592_v15 = vsel %vm719_vm2, %v13501_v14, %v4922_v6  ;;  %v13609_v14 = vsel %vm719_vm2, %v4949_v9, %v4958_v34  ;;  %v13630_v9 = vrot.slane %v15174_v49, 4  ;;  %v5946_v49 = vrot.slane %v15515_v32, 3 }
 0x42f   : > { %10172 = vmatpush3.bf16.msra.mxu1 %v13210_v7  ;;  %10127 = vmatprep.mubr.msk.bf16.mxu1 %vm4359_vm4, %v4914_v26  ;;  %15500 = vst [vmem:[#allocation34_spill] sm:$0xff] %v13592_v15  ;;  %v15175_v7 = vshrl.u32 %v13222_v22, 16  ;;  %v13598_v26 = vsel %vm719_vm2, %v4922_v6, %v4931_v1  ;;  %15504 = vst [vmem:[#allocation38_spill] sm:$0xff] %v13609_v14  ;;  %v13620_v1 = vsel %vm719_vm2, %v4976_v17, %v13580_v38  ;;  %v15510_v17 = vld [vmem:[#allocation30_spill] sm:$0xff] }
 0x430   : > { %10173 = vmatprep.subr.bf16.mxu1 %v5408_v31  ;;  %15501 = vst [vmem:[#allocation35_spill] sm:$0xff] %v13598_v26  ;;  %15508 = vst [vmem:[#allocation41_spill] sm:$0xff] %v13620_v1  ;;  %v13626_v6 = vrot.slane %v15173_v58, 3  ;;  %v15512_v58 = vld [vmem:[#allocation12_spill] sm:$0xff]  ;;  %v15518_v34 = vshll.u32 %v15509_v25, 16  ;;  %v15520_v45 = vshll.u32 %v15510_v17, 16 }
 0x431   : > { %v5942_v47 = vrot.slane %v15175_v7, 3  ;;  %v5947_v7 = vrot.slane %v15516_v37, 4  ;;  %v5971_v11 = vrot.slane %v15529_v30, 4 }
 0x432   : > { %v5951_v23 = vrot.slane %v15518_v34, 4  ;;  %v5955_v13 = vrot.slane %v15520_v45, 4 }
 0x433   : > { %10174 = vmatpush3.bf16.msra.mxu1 %v5408_v31  ;;  %v15511_v31 = vld [vmem:[#allocation6_spill] sm:$0xff]  ;;  %v13676_v19 = vor.u32 %v5943_v12, %v5942_v47  ;;  %v15519_v47 = vshrl.u32 %v15510_v17, 16  ;;  %v15523_v12 = vshrl.u32 %v15512_v58, 16 }
 0x434   : > { %10223 = vmatprep.subr.bf16.mxu1 %v13594_v48  ;;  %v5952_v34 = vor.u32 %v5951_v23, %v5950_v20  ;;  %v15527_v23 = vshll.u32 %v15513_v50, 16 }
 0x435   : > { %v5954_v32 = vrot.slane %v15519_v47, 3  ;;  %v5962_v3 = vrot.slane %v15523_v12, 3  ;;  %v15524_v47 = vshll.u32 %v15512_v58, 16 }
 0x436   : > { %10128 = vmatmul.mubr.msk.bf16.gmra.mrb[28].mxu1 %vm4359_vm4, %v13592_v15  ;;  %v5948_v15 = vor.u32 %v5947_v7, %v5946_v49  ;;  %v15526_v49 = vshrl.u32 %v15513_v50, 16 }
 0x437   : > { %10131 = vmatprep.mubr.msk.bf16.mxu1 %vm4359_vm4, %v13598_v26  ;;  %v5956_v43 = vor.u32 %v5955_v13, %v5954_v32  ;;  %v5963_v4 = vrot.slane %v15524_v47, 4  ;;  %v5967_v13 = vrot.slane %v15527_v23, 4  ;;  %v15528_v32 = vshrl.u32 %v15514_v24, 16 }
 0x438   : > { %v13708_v45 = vsel %vm719_vm2, %v13676_v19, %v5948_v15  ;;  %v5966_v7 = vrot.slane %v15526_v49, 3  ;;  %v15531_v49 = vshll.u32 %v13339_v27, 16 }
 0x439   : > { %v5964_v12 = vor.u32 %v5963_v4, %v5962_v3  ;;  %v5970_v47 = vrot.slane %v15528_v32, 3  ;;  %v15533_v4 = vshrl.u32 %v13353_v44, 16 }
 0x43a   : > { %v5968_v26 = vor.u32 %v5967_v13, %v5966_v7 }
 0x43b   : > { %v5978_v3 = vrot.slane %v15533_v4, 3  ;;  %v5972_v7 = vor.u32 %v5971_v11, %v5970_v47  ;;  %v15538_v4 = vshrl.u32 %v13391_v56, 16  ;;  %v15543_v47 = vshll.u32 %v13403_v62, 16 }
 0x43c   : > { %v13741_v30 = vsel %vm719_vm2, %v5964_v12, %v5968_v26 }
 0x43d   : > { %15535 = vst [vmem:[#allocation44_spill] sm:$0xff] %v13741_v30 }
 0x43e   : > { %10132 = vmatmul.mubr.msk.bf16.gmra.mrb[32].mxu1 %vm4359_vm4, %v13601_v57  ;;  %v15521_v57 = vshrl.u32 %v15511_v31, 16 }
 0x43f   : > { %10135 = vmatprep.mubr.msk.bf16.mxu1 %vm4359_vm4, %v13604_v29  ;;  %v15522_v29 = vshll.u32 %v15511_v31, 16 }
 0x440   : > { %v5958_v37 = vrot.slane %v15521_v57, 3  ;;  %v13711_v57 = vsel %vm719_vm2, %v5948_v15, %v5952_v34  ;;  %v15530_v15 = vshrl.u32 %v13339_v27, 16 }
 0x441   : > { %v5959_v8 = vrot.slane %v15522_v29, 4  ;;  %15525 = vst [vmem:[#allocation42_spill] sm:$0xff] %v13711_v57  ;;  %v13718_v29 = vsel %vm719_vm2, %v5952_v34, %v5956_v43  ;;  %v5975_v57 = vrot.slane %v15531_v49, 4 }
 0x442   : > { %v5974_v52 = vrot.slane %v15530_v15, 3  ;;  %v15537_v15 = vshll.u32 %v13377_v28, 16 }
 0x443   : > { %v5960_v20 = vor.u32 %v5959_v8, %v5958_v37  ;;  %v15534_v8 = vshll.u32 %v13353_v44, 16 }
 0x444   : > { %v5976_v13 = vor.u32 %v5975_v57, %v5974_v52  ;;  %v5983_v49 = vrot.slane %v15537_v15, 4  ;;  %v15542_v52 = vshrl.u32 %v13403_v62, 16 }
 0x445   : > { %v13729_v23 = vsel %vm719_vm2, %v5956_v43, %v5960_v20  ;;  %v13732_v34 = vsel %vm719_vm2, %v5960_v20, %v5964_v12  ;;  %v5979_v37 = vrot.slane %v15534_v8, 4  ;;  %v15536_v43 = vshrl.u32 %v13377_v28, 16 }
 0x446   : > { %15532 = vst [vmem:[#allocation43_spill] sm:$0xff] %v13732_v34  ;;  %10136 = vmatmul.mubr.msk.bf16.gmra.mrb[36].mxu1 %vm4359_vm4, %v13609_v14  ;;  %v5986_v8 = vrot.slane %v15538_v4, 3  ;;  %v15539_v14 = vshll.u32 %v13391_v56, 16  ;;  %v13754_v12 = vsel %vm719_vm2, %v5968_v26, %v5972_v7  ;;  %v13757_v11 = vsel %vm719_vm2, %v5972_v7, %v5976_v13 }
 0x447   : > { %v5982_v32 = vrot.slane %v15536_v43, 3  ;;  %10139 = vmatprep.mubr.msk.bf16.mxu1 %vm4359_vm4, %v13612_v33  ;;  %v5980_v20 = vor.u32 %v5979_v37, %v5978_v3  ;;  %15540 = vst [vmem:[#allocation45_spill] sm:$0xff] %v13754_v12  ;;  %15541 = vst [vmem:[#allocation46_spill] sm:$0xff] %v13757_v11  ;;  %v5990_v57 = vrot.slane %v15542_v52, 3  ;;  %v5991_v3 = vrot.slane %v15543_v47, 4 }
 0x448   : > { %v5987_v34 = vrot.slane %v15539_v14, 4  ;;  %v15545_v4 = vshrl.u32 %v13417_v59, 16  ;;  %v15546_v26 = vshll.u32 %v13417_v59, 16  ;;  %v15547_v7 = vshrl.u32 %v13429_v39, 16 }
 0x449   : > { %v13764_v37 = vsel %vm719_vm2, %v5976_v13, %v5980_v20  ;;  %v5984_v43 = vor.u32 %v5983_v49, %v5982_v32  ;;  %v5992_v33 = vor.u32 %v5991_v3, %v5990_v57  ;;  %v15548_v52 = vshll.u32 %v13429_v39, 16 }
 0x44a   : > { %15544 = vst [vmem:[#allocation47_spill] sm:$0xff] %v13764_v37  ;;  %v5988_v15 = vor.u32 %v5987_v34, %v5986_v8  ;;  %v5994_v14 = vrot.slane %v15545_v4, 3  ;;  %v5995_v12 = vrot.slane %v15546_v26, 4  ;;  %v5998_v11 = vrot.slane %v15547_v7, 3 }
 0x44b   : > { %v5999_v30 = vrot.slane %v15548_v52, 4  ;;  %v13775_v47 = vsel %vm719_vm2, %v5980_v20, %v5984_v43  ;;  %v15551_v34 = vshrl.u32 %v13443_v40, 16  ;;  %v15552_v49 = vshll.u32 %v13443_v40, 16 }
 0x44c   : > { %15549 = vst [vmem:[#allocation48_spill] sm:$0xff] %v13775_v47  ;;  %v13778_v13 = vsel %vm719_vm2, %v5984_v43, %v5988_v15  ;;  %v13785_v57 = vsel %vm719_vm2, %v5988_v15, %v5992_v33  ;;  %v5996_v3 = vor.u32 %v5995_v12, %v5994_v14  ;;  %v15553_v26 = vshrl.u32 %v13453_v61, 16 }
 0x44d   : > { %15550 = vst [vmem:[#allocation49_spill] sm:$0xff] %v13778_v13  ;;  %v6002_v32 = vrot.slane %v15551_v34, 3  ;;  %v6003_v8 = vrot.slane %v15552_v49, 4  ;;  %v6000_v4 = vor.u32 %v5999_v30, %v5998_v11  ;;  %v15554_v20 = vshll.u32 %v13453_v61, 16 }
 0x44e   : > { %v6006_v7 = vrot.slane %v15553_v26, 3  ;;  %v15555_v43 = vshrl.u32 %v13467_v60, 16  ;;  %v15556_v34 = vshll.u32 %v13467_v60, 16  ;;  %10140 = vmatmul.mubr.msk.bf16.gmra.mrb[40].mxu1 %vm4359_vm4, %v13615_v18  ;;  %v13798_v15 = vsel %vm719_vm2, %v5992_v33, %v5996_v3 }
 0x44f   : > { %v6004_v52 = vor.u32 %v6003_v8, %v6002_v32  ;;  %v6007_v47 = vrot.slane %v15554_v20, 4  ;;  %15557 = vst [vmem:[#allocation50_spill] sm:$0xff] %v13798_v15  ;;  %v13801_v30 = vsel %vm719_vm2, %v5996_v3, %v6000_v4  ;;  %v15559_v12 = vshrl.u32 %v13479_v5, 16  ;;  %10143 = vmatprep.mubr.msk.bf16.mxu1 %vm4359_vm4, %v13620_v1  ;;  %v13822_v15 = vld [vmem:[#allocation2 + $0x198] sm:$0xff] }
 0x450   : > { %v6010_v13 = vrot.slane %v15555_v43, 3  ;;  %v6011_v37 = vrot.slane %v15556_v34, 4  ;;  %15558 = vst [vmem:[#allocation52_spill] sm:$0xff] %v13801_v30  ;;  %v15560_v14 = vshll.u32 %v13479_v5, 16  ;;  %v15561_v33 = vshrl.u32 %v13493_v53, 16  ;;  %v13814_v43 = vld [vmem:[#allocation2 + $0x188] sm:$0xff] }
 0x451   : > { %v6014_v11 = vrot.slane %v15559_v12, 3  ;;  %v13810_v49 = vsel %vm719_vm2, %v6000_v4, %v6004_v52  ;;  %v6008_v8 = vor.u32 %v6007_v47, %v6006_v7  ;;  %v15562_v34 = vshll.u32 %v13493_v53, 16 }
 0x452   : > { %v6015_v32 = vrot.slane %v15560_v14, 4  ;;  %v6012_v26 = vor.u32 %v6011_v37, %v6010_v13  ;;  %v6018_v20 = vrot.slane %v15561_v33, 3  ;;  %v15563_v18 = vshrl.u32 %v13511_v42, 16 }
 0x453   : > { %v6019_v12 = vrot.slane %v15562_v34, 4  ;;  %v15564_v30 = vshll.u32 %v13511_v42, 16  ;;  %v15197_v47 = vshrl.u32 %v13389_v16, 16  ;;  %v15198_v37 = vshll.u32 %v13389_v16, 16 }
 0x454   : > { %v6016_v3 = vor.u32 %v6015_v32, %v6014_v11  ;;  %v6022_v14 = vrot.slane %v15563_v18, 3  ;;  %v13827_v13 = vsel %vm719_vm2, %v6004_v52, %v6008_v8  ;;  %v13830_v4 = vsel %vm719_vm2, %v6008_v8, %v6012_v26  ;;  %v4515_v11 = vld [vmem:[#allocation2 + $0x190] sm:$0xff] }
 0x455   : > { %v6023_v1 = vrot.slane %v15564_v30, 4  ;;  %v5003_v7 = vor.u32 %v13630_v9, %v13626_v6  ;;  %v6020_v30 = vor.u32 %v6019_v12, %v6018_v20  ;;  %v13841_v33 = vpack.c.bf16 %v13814_v43, %v13504_v36 }
 0x456   : > { %v13835_v18 = vsel %vm719_vm2, %v6012_v26, %v6016_v3  ;;  %v13844_v52 = vpack.c.bf16 %v13822_v15, %v4515_v11  ;;  %v13849_v8 = vsel %vm719_vm2, %v13580_v38, %v13622_v0  ;;  %v5011_v26 = vrot.slane %v15198_v37, 4 }
 0x457   : > { %v13837_v32 = vor.u32 %v6023_v1, %v6022_v14  ;;  %15566 = vst [vmem:[#allocation20_spill] sm:$0xff] %v13841_v33  ;;  %15568 = vst [vmem:[#allocation30_spill] sm:$0xff] %v13849_v8  ;;  %v13852_v6 = vsel %vm719_vm2, %v6016_v3, %v6020_v30  ;;  %v5008_v1 = vrot.slane %v15197_v47, 3  ;;  %v15570_v20 = vshrl.u32 %v13382_v41, 16  ;;  %10144 = vmatmul.mubr.msk.bf16.gmra.mrb[44].mxu1 %vm4359_vm4, %v13849_v8 }
 0x458   : > { %15567 = vst [vmem:[#allocation22_spill] sm:$0xff] %v13844_v52  ;;  %v15571_v12 = vshll.u32 %v13382_v41, 16  ;;  %v13870_v3 = vsel %vm719_vm2, %v13622_v0, %v5003_v7  ;;  %v15202_v47 = vshrl.u32 %v13415_v63, 16  ;;  %v15203_v37 = vshll.u32 %v13415_v63, 16 }
 0x459   : > { %15565 = vst [vmem:[#allocation51_spill] sm:$0xff] %v13837_v32  ;;  %v13856_v9 = vsel %vm719_vm2, %v6020_v30, %v13837_v32  ;;  %v5017_v34 = vrot.slane %v15570_v20, 3  ;;  %15572 = vst [vmem:[#allocation12_spill] sm:$0xff] %v13870_v3  ;;  %10147 = vmatprep.mubr.msk.bf16.mxu1 %vm4359_vm4, %v13870_v3  ;;  %v5012_v14 = vor.u32 %v5011_v26, %v5008_v1  ;;  %v15206_v20 = vshrl.u32 %v13408_v10, 16 }
 0x45a   : > { %15569 = vst [vmem:[#allocation6_spill] sm:$0xff] %v13856_v9  ;;  %v5020_v38 = vrot.slane %v15571_v12, 4  ;;  %v15207_v12 = vshll.u32 %v13408_v10, 16  ;;  %v5026_v0 = vrot.slane %v15202_v47, 3  ;;  %v5029_v1 = vrot.slane %v15203_v37, 4 }
 0x45b   : > { %v13879_v41 = vsel %vm719_vm2, %v5003_v7, %v5012_v14  ;;  %v5035_v26 = vrot.slane %v15206_v20, 3  ;;  %v15215_v7 = vshrl.u32 %v13441_v2, 16  ;;  %v15214_v47 = vshll.u32 %v13434_v55, 16 }
 0x45c   : > { %v5021_v30 = vor.u32 %v5020_v38, %v5017_v34  ;;  %15573 = vst [vmem:[#allocation14_spill] sm:$0xff] %v13879_v41  ;;  %v5038_v34 = vrot.slane %v15207_v12, 4  ;;  %v15216_v38 = vshll.u32 %v13441_v2, 16  ;;  %v5030_v37 = vor.u32 %v5029_v1, %v5026_v0  ;;  %v13915_v1 = vld [vmem:[#allocation2 + $0x1a0] sm:$0xff] }
 0x45d   : > { %v5056_v10 = vrot.slane %v15214_v47, 4  ;;  %v13912_v63 = vpack.c.bf16 %v4515_v11, %v13814_v43  ;;  %v15579_v11 = vshll.u32 %v13511_v42, 16 }
 0x45e   : > { %v13882_v8 = vsel %vm719_vm2, %v5012_v14, %v5021_v30  ;;  %v15213_v14 = vshrl.u32 %v13434_v55, 16  ;;  %v5039_v3 = vor.u32 %v5038_v34, %v5035_v26  ;;  %v5047_v20 = vrot.slane %v15216_v38, 4  ;;  %v13917_v26 = vld [vmem:[#allocation2 + $0x1a8] sm:$0xff] }
 0x45f   : > { %15574 = vst [vmem:[#allocation18_spill] sm:$0xff] %v13882_v8  ;;  %10148 = vmatmul.mubr.msk.bf16.gmra.mrb[48].mxu1 %vm4359_vm4, %v13879_v41  ;;  %v5044_v41 = vrot.slane %v15215_v7, 3  ;;  %15576 = vst [vmem:[#allocation54_spill] sm:$0xff] %v13912_v63  ;;  %v13929_v47 = vrot.slane %v15579_v11, 1  ;;  %v15226_v7 = vshrl.u32 %v13841_v33, 16  ;;  %v15583_v11 = vshrl.u32 %v13511_v42, 16 }
 0x460   : > { %10151 = vmatprep.mubr.msk.bf16.mxu1 %vm4359_vm4, %v13882_v8  ;;  %v5053_v12 = vrot.slane %v15213_v14, 3  ;;  %v13909_v8 = vsel %vm719_vm2, %v5021_v30, %v5030_v37  ;;  %15577 = vst [vmem:[#allocation55_spill] sm:$0xff] %v13917_v26  ;;  %v13922_v34 = vsel %vm719_vm2, %v5030_v37, %v5039_v3  ;;  %v15580_v37 = vshll.u32 %v13841_v33, 16 }
 0x461   : > { %15575 = vst [vmem:[#allocation53_spill] sm:$0xff] %v13909_v8  ;;  %15578 = vst [vmem:[#allocation56_spill] sm:$0xff] %v13922_v34  ;;  %v5048_v14 = vor.u32 %v5047_v20, %v5044_v41  ;;  %v7158_v41 = vpack.c.bf16 %v13917_v26, %v13915_v1  ;;  %v7167_v38 = vrot.slane %v15226_v7, 3  ;;  %v15582_v20 = vshrl.u32 %v13465_v35, 16 }
 0x462   : > { %v5057_v0 = vor.u32 %v5056_v10, %v5053_v12  ;;  %v7168_v55 = vrot.slane %v15580_v37, 4  ;;  %v15581_v12 = vshll.u32 %v13844_v52, 16  ;;  %v15236_v32 = vshrl.u32 %v13912_v63, 16 }
 0x463   : > { %v7176_v2 = vshrl.u32 %v7158_v41, 16  ;;  %v13949_v26 = vsel %vm719_vm2, %v5039_v3, %v5048_v14  ;;  %v5062_v30 = vrot.slane %v15582_v20, 3  ;;  %v7179_v33 = vshll.u32 %v7158_v41, 16 }
 0x464   : > { %v7172_v37 = vrot.slane %v15581_v12, 4  ;;  %v13958_v7 = vor.u32 %v7168_v55, %v7167_v38  ;;  %v13962_v12 = vpack.c.bf16 %v13915_v1, %v13822_v15  ;;  %v15585_v3 = vshll.u32 %v13465_v35, 16 }
 0x465   : > { %v7181_v20 = vrot.slane %v7179_v33, 4  ;;  %v15586_v9 = vshll.u32 %v13912_v63, 16  ;;  %v13972_v55 = vsel %vm719_vm2, %v5048_v14, %v5057_v0  ;;  %v15588_v41 = vshll.u32 %v13458_v21, 16 }
 0x466   : > { %15584 = vst [vmem:[#allocation57_spill] sm:$0xff] %v13962_v12 }
 0x467   : > { %10152 = vmatmul.mubr.msk.bf16.gmra.mrb[52].mxu1 %vm4359_vm4, %v13909_v8  ;;  %v15229_v8 = vshrl.u32 %v13844_v52, 16  ;;  %v5065_v52 = vrot.slane %v15585_v3, 4  ;;  %v7776_v42 = vrot.slane %v15586_v9, 1  ;;  %v15235_v3 = vshrl.u32 %v13491_v51, 16 }
 0x468   : > { %10155 = vmatprep.mubr.msk.bf16.mxu1 %vm4359_vm4, %v13922_v34  ;;  %v13956_v34 = vor.u32 %v15583_v11, %v13929_v47  ;;  %v5074_v11 = vrot.slane %v15588_v41, 4 }
 0x469   : > { %v7171_v10 = vrot.slane %v15229_v8, 3  ;;  %v7178_v8 = vrot.slane %v7176_v2, 3  ;;  %v15587_v2 = vshrl.u32 %v13458_v21, 16  ;;  %v13992_v14 = vor.u32 %v7776_v42, %v15236_v32 }
 0x46a   : > { %v13988_v9 = vsel %vm1248_vm3, %v13956_v34, %v7776_v42 }
 0x46b   : > { %v7173_v16 = vor.u32 %v7172_v37, %v7171_v10  ;;  %v5071_v38 = vrot.slane %v15587_v2, 3  ;;  %v13984_v33 = vor.u32 %v7181_v20, %v7178_v8  ;;  %15591 = vst [vmem:[#allocation60_spill] sm:$0xff] %v13988_v9  ;;  %15592 = vst [vmem:[#allocation61_spill] sm:$0xff] %v13992_v14  ;;  %v5066_v37 = vor.u32 %v5065_v52, %v5062_v30 }
 0x46c   : > { %v15237_v2 = vshll.u32 %v13491_v51, 16  ;;  %v15239_v8 = vshrl.u32 %v13482_v46, 16  ;;  %v15240_v20 = vshll.u32 %v13482_v46, 16  ;;  %v4545_v9 = vpack.c.bf16 %v13504_v36, %v13504_v36 }
 0x46d   : > { %v13980_v10 = vsel %vm719_vm2, %v13958_v7, %v7173_v16  ;;  %15590 = vst [vmem:[#allocation59_spill] sm:$0xff] %v13984_v33  ;;  %v13998_v41 = vsel %vm719_vm2, %v7173_v16, %v13984_v33  ;;  %v5075_v12 = vor.u32 %v5074_v11, %v5071_v38  ;;  %v14005_v42 = vsel %vm719_vm2, %v5057_v0, %v5066_v37 }
 0x46e   : > { %15589 = vst [vmem:[#allocation58_spill] sm:$0xff] %v13980_v10  ;;  %15593 = vst [vmem:[#allocation62_spill] sm:$0xff] %v13998_v41  ;;  %v5080_v52 = vrot.slane %v15235_v3, 3  ;;  %v5083_v30 = vrot.slane %v15237_v2, 4  ;;  %v5089_v38 = vrot.slane %v15239_v8, 3  ;;  %v5092_v36 = vrot.slane %v15240_v20, 4 }
 0x46f   : > { %10156 = vmatmul.mubr.msk.bf16.gmra.mrb[56].mxu1 %vm4359_vm4, %v13949_v26  ;;  %v14014_v16 = vsel %vm719_vm2, %v5066_v37, %v5075_v12  ;;  %v5096_v11 = vshrl.u32 %v4545_v9, 16  ;;  %v5099_v3 = vshll.u32 %v4545_v9, 16  ;;  %v15595_v2 = vld [vmem:[#allocation7_spill] sm:$0xff]  ;;  %v15596_v9 = vld [vmem:[#allocation9_spill] sm:$0xff] }
 0x470   : > { %10159 = vmatprep.mubr.msk.bf16.mxu1 %vm4359_vm4, %v13972_v55  ;;  %v5084_v0 = vor.u32 %v5083_v30, %v5080_v52  ;;  %v14022_v32 = vor.u32 %v5092_v36, %v5089_v38  ;;  %v5411_v14 = vshll.u32 %v15595_v2, 16  ;;  %v5409_v52 = vshrl.u32 %v15595_v2, 16 }
 0x471   : > { %v5098_v37 = vrot.slane %v5096_v11, 3  ;;  %v5101_v41 = vrot.slane %v5099_v3, 4  ;;  %v15241_v38 = vshll.u32 %v15596_v9, 16  ;;  %v15597_v11 = vld [vmem:[#allocation4_spill] sm:$0xff] }
 0x472   : > { %15594 = vst [vmem:[#allocation63_spill] sm:$0xff] %v14022_v32  ;;  %v14026_v33 = vsel %vm719_vm2, %v5075_v12, %v5084_v0  ;;  %v14032_v8 = vsel %vm719_vm2, %v5084_v0, %v14022_v32  ;;  %v5413_v30 = vrot.slane %v5411_v14, 1  ;;  %v15243_v20 = vshll.u32 %v15597_v11, 16 }
 0x473   : > { %v5102_v36 = vor.u32 %v5101_v41, %v5098_v37  ;;  %v5417_v3 = vrot.slane %v15241_v38, 1  ;;  %v15242_v14 = vshrl.u32 %v15596_v9, 16  ;;  %v8938_v37 = vld [vmem:[%s14977_s3 + $0x70] sm:$0xff] }
 0x474   : > { %v5414_v12 = vor.u32 %v5413_v30, %v5409_v52  ;;  %v5424_v41 = vrot.slane %v15243_v20, 1  ;;  %v15244_v52 = vshrl.u32 %v15597_v11, 16  ;;  %v15598_v30 = vshll.u32 %v13222_v22, 16 }
 0x475   : > { %v5103_v10 = vsel %vm719_vm2, %v14022_v32, %v5102_v36  ;;  %v5421_v0 = vor.u32 %v15242_v14, %v5417_v3  ;;  %v8965_v14 = vld [vmem:[%s14977_s3 + $0x88] sm:$0xff] }
 0x476   : > { %v5418_v2 = vsel %vm1248_vm3, %v5414_v12, %v5417_v3  ;;  %v5431_v36 = vrot.slane %v15598_v30, 1  ;;  %v5428_v12 = vor.u32 %v15244_v52, %v5424_v41  ;;  %v8964_v3 = vld [vmem:[%s14977_s3 + $0x80] sm:$0xff]  ;;  %v15601_v52 = vshll.u32 %v15509_v25, 16 }
 0x477   : > { %10160 = vmatmul.mubr.msk.bf16.gmra.mrb[60].mxu1 %vm4359_vm4, %v14005_v42  ;;  %v5425_v38 = vsel %vm1248_vm3, %v5421_v0, %v5424_v41  ;;  %v14075_v41 = vpack.c.bf16 %v8965_v14, %v8964_v3  ;;  %v15600_v0 = vshrl.u32 %v13222_v22, 16  ;;  %v15605_v14 = vshll.u32 %v15510_v17, 16 }
 0x478   : > { %10163 = vmatprep.mubr.msk.bf16.mxu1 %vm4359_vm4, %v14014_v16  ;;  %v5432_v20 = vsel %vm1248_vm3, %v5428_v12, %v5431_v36  ;;  %v5445_v32 = vrot.slane %v15601_v52, 1  ;;  %v15607_v3 = vshll.u32 %v15511_v31, 16 }
 0x479   : > { %v5435_v30 = vor.u32 %v15600_v0, %v5431_v36  ;;  %v5452_v52 = vrot.slane %v15605_v14, 1  ;;  %v15606_v36 = vshrl.u32 %v15509_v25, 16  ;;  %v15612_v14 = vshrl.u32 %v15511_v31, 16 }
 0x47f   : > { %10164 = vmatmul.mubr.msk.bf16.gmra.mrb[64].mxu1 %vm4359_vm4, %v14026_v33 }
 0x480   : > { %10167 = vmatprep.mubr.msk.bf16.mxu1 %vm4359_vm4, %v14032_v8 }
 0x487   : > { %10168 = vmatmul.mubr.msk.bf16.gmra.mrb[68].mxu1 %vm4359_vm4, %v5103_v10  ;;  %v8939_v10 = vld [vmem:[%s14977_s3 + $0x78] sm:$0xff] }
 0x488   : > { %10175 = vmatprep.mubr.msk.bf16.mxu1 %vm4359_vm4, %v5418_v2  ;;  %v5934_v2 = vpack.c.bf16 %v8939_v10, %v8938_v37  ;;  %v15599_v37 = vshll.u32 %v15507_v54, 16 }
 0x48a   : > { %v5438_v10 = vrot.slane %v15599_v37, 1  ;;  %v5459_v37 = vrot.slane %v15607_v3, 1  ;;  %v15613_v3 = vshll.u32 %v15513_v50, 16 }
 0x48f   : > { %10176 = vmatmul.mubr.msk.bf16.vlgmr.msra.gmra.mrb[24].mxu1 %vm4359_vm4, %v5425_v38  ;;  %v15602_v38 = vshrl.u32 %v15507_v54, 16 }
 0x490   : > { %10224 = vmatpush3.bf16.msra.mxu1 %v13594_v48  ;;  %10179 = vmatprep.mubr.msk.bf16.mxu1 %vm4359_vm4, %v5432_v20  ;;  %v14085_v48 = vsel %vm1248_vm3, %v5435_v30, %v5438_v10 }
 0x491   : > { %10225 = vmatprep.subr.bf16.mxu1 %v5934_v2  ;;  %v5442_v12 = vor.u32 %v15602_v38, %v5438_v10  ;;  %15603 = vst [vmem:[#allocation7_spill] sm:$0xff] %v14085_v48  ;;  %v15608_v10 = vshrl.u32 %v15510_v17, 16 }
 0x493   : > { %v14090_v20 = vsel %vm1248_vm3, %v5442_v12, %v5445_v32  ;;  %v5456_v0 = vor.u32 %v15608_v10, %v5452_v52  ;;  %v5473_v10 = vrot.slane %v15613_v3, 1 }
 0x494   : > { %10226 = vmatpush3.bf16.msra.mxu1 %v5934_v2  ;;  %15604 = vst [vmem:[#allocation9_spill] sm:$0xff] %v14090_v20  ;;  %v5449_v2 = vor.u32 %v15606_v36, %v5445_v32  ;;  %v15611_v32 = vshll.u32 %v15512_v58, 16  ;;  %v5463_v36 = vor.u32 %v15612_v14, %v5459_v37  ;;  %v15618_v14 = vshrl.u32 %v15513_v50, 16 }
 0x495   : > { %10275 = vmatprep.subr.bf16.mxu1 %v14075_v41  ;;  %v14108_v38 = vsel %vm1248_vm3, %v5456_v0, %v5459_v37  ;;  %v15617_v37 = vshll.u32 %v15514_v24, 16 }
 0x496   : > { %v14103_v30 = vsel %vm1248_vm3, %v5449_v2, %v5452_v52  ;;  %15610 = vst [vmem:[#allocation64_spill] sm:$0xff] %v14108_v38  ;;  %v5466_v12 = vrot.slane %v15611_v32, 1  ;;  %v15614_v52 = vshrl.u32 %v15512_v58, 16  ;;  %v5477_v3 = vor.u32 %v15618_v14, %v5473_v10 }
 0x497   : > { %10180 = vmatmul.mubr.msk.bf16.gmra.mrb[28].mxu1 %vm4359_vm4, %v14085_v48  ;;  %15609 = vst [vmem:[#allocation4_spill] sm:$0xff] %v14103_v30  ;;  %v5480_v32 = vrot.slane %v15617_v37, 1  ;;  %v15624_v14 = vshrl.u32 %v13339_v27, 16 }
 0x498   : > { %10183 = vmatprep.mubr.msk.bf16.mxu1 %vm4359_vm4, %v14090_v20  ;;  %v5470_v2 = vor.u32 %v15614_v52, %v5466_v12  ;;  %v15619_v52 = vshll.u32 %v13339_v27, 16 }
 0x49a   : > { %v14126_v0 = vsel %vm1248_vm3, %v5470_v2, %v5473_v10  ;;  %v15623_v10 = vshll.u32 %v13353_v44, 16 }
 0x49b   : > { %15616 = vst [vmem:[#allocation66_spill] sm:$0xff] %v14126_v0 }
 0x49c   : > { %v5494_v37 = vrot.slane %v15623_v10, 1 }
 0x49f   : > { %10184 = vmatmul.mubr.msk.bf16.gmra.mrb[32].mxu1 %vm4359_vm4, %v14103_v30  ;;  %v14121_v30 = vsel %vm1248_vm3, %v5463_v36, %v5466_v12  ;;  %v15620_v12 = vshrl.u32 %v15514_v24, 16 }
 0x4a0   : > { %10187 = vmatprep.mubr.msk.bf16.mxu1 %vm4359_vm4, %v14108_v38  ;;  %15615 = vst [vmem:[#allocation65_spill] sm:$0xff] %v14121_v30  ;;  %v5487_v38 = vrot.slane %v15619_v52, 1 }
 0x4a1   : > { %v5484_v36 = vor.u32 %v15620_v12, %v5480_v32  ;;  %v15625_v12 = vshll.u32 %v13377_v28, 16 }
 0x4a2   : > { %v5491_v52 = vor.u32 %v15624_v14, %v5487_v38  ;;  %v15630_v14 = vshrl.u32 %v13377_v28, 16 }
 0x4a3   : > { %v14144_v2 = vsel %vm1248_vm3, %v5484_v36, %v5487_v38  ;;  %v15629_v38 = vshll.u32 %v13391_v56, 16 }
 0x4a4   : > { %15622 = vst [vmem:[#allocation68_spill] sm:$0xff] %v14144_v2 }
 0x4a5   : > { %v5508_v10 = vrot.slane %v15629_v38, 1 }
 0x4a7   : > { %10188 = vmatmul.mubr.msk.bf16.gmra.mrb[36].mxu1 %vm4359_vm4, %v14121_v30  ;;  %v14139_v30 = vsel %vm1248_vm3, %v5477_v3, %v5480_v32  ;;  %v15626_v32 = vshrl.u32 %v13353_v44, 16 }
 0x4a8   : > { %10191 = vmatprep.mubr.msk.bf16.mxu1 %vm4359_vm4, %v14126_v0  ;;  %15621 = vst [vmem:[#allocation67_spill] sm:$0xff] %v14139_v30  ;;  %v5501_v0 = vrot.slane %v15625_v12, 1 }
 0x4a9   : > { %v5498_v3 = vor.u32 %v15626_v32, %v5494_v37  ;;  %v15631_v32 = vshll.u32 %v13403_v62, 16 }
 0x4aa   : > { %v5505_v12 = vor.u32 %v15630_v14, %v5501_v0  ;;  %v15636_v14 = vshrl.u32 %v13403_v62, 16 }
 0x4ab   : > { %v14162_v36 = vsel %vm1248_vm3, %v5498_v3, %v5501_v0  ;;  %v15635_v0 = vshll.u32 %v13417_v59, 16 }
 0x4ac   : > { %15628 = vst [vmem:[#allocation70_spill] sm:$0xff] %v14162_v36 }
 0x4ad   : > { %v5522_v38 = vrot.slane %v15635_v0, 1 }
 0x4af   : > { %10192 = vmatmul.mubr.msk.bf16.gmra.mrb[40].mxu1 %vm4359_vm4, %v14139_v30  ;;  %v14157_v30 = vsel %vm1248_vm3, %v5491_v52, %v5494_v37  ;;  %v15632_v37 = vshrl.u32 %v13391_v56, 16 }
 0x4b0   : > { %10195 = vmatprep.mubr.msk.bf16.mxu1 %vm4359_vm4, %v14144_v2  ;;  %15627 = vst [vmem:[#allocation69_spill] sm:$0xff] %v14157_v30  ;;  %v5515_v2 = vrot.slane %v15631_v32, 1 }
 0x4b1   : > { %v5512_v52 = vor.u32 %v15632_v37, %v5508_v10  ;;  %v15637_v37 = vshll.u32 %v13429_v39, 16 }
 0x4b2   : > { %v5519_v32 = vor.u32 %v15636_v14, %v5515_v2  ;;  %v15642_v14 = vshrl.u32 %v13429_v39, 16 }
 0x4b3   : > { %v14180_v3 = vsel %vm1248_vm3, %v5512_v52, %v5515_v2  ;;  %v15641_v2 = vshll.u32 %v13443_v40, 16 }
 0x4b4   : > { %15634 = vst [vmem:[#allocation72_spill] sm:$0xff] %v14180_v3 }
 0x4b5   : > { %v5536_v0 = vrot.slane %v15641_v2, 1 }
 0x4b7   : > { %10196 = vmatmul.mubr.msk.bf16.gmra.mrb[44].mxu1 %vm4359_vm4, %v14157_v30  ;;  %v14175_v30 = vsel %vm1248_vm3, %v5505_v12, %v5508_v10  ;;  %v15638_v10 = vshrl.u32 %v13417_v59, 16 }
 0x4b8   : > { %10199 = vmatprep.mubr.msk.bf16.mxu1 %vm4359_vm4, %v14162_v36  ;;  %15633 = vst [vmem:[#allocation71_spill] sm:$0xff] %v14175_v30  ;;  %v5529_v36 = vrot.slane %v15637_v37, 1 }
 0x4b9   : > { %v5526_v12 = vor.u32 %v15638_v10, %v5522_v38  ;;  %v15643_v10 = vshll.u32 %v13453_v61, 16 }
 0x4ba   : > { %v5533_v37 = vor.u32 %v15642_v14, %v5529_v36  ;;  %v15648_v14 = vshrl.u32 %v13453_v61, 16 }
 0x4bb   : > { %v14198_v52 = vsel %vm1248_vm3, %v5526_v12, %v5529_v36  ;;  %v15647_v36 = vshll.u32 %v13467_v60, 16 }
 0x4bc   : > { %15640 = vst [vmem:[#allocation74_spill] sm:$0xff] %v14198_v52 }
 0x4bd   : > { %v5550_v2 = vrot.slane %v15647_v36, 1 }
 0x4bf   : > { %10200 = vmatmul.mubr.msk.bf16.gmra.mrb[48].mxu1 %vm4359_vm4, %v14175_v30  ;;  %v14193_v30 = vsel %vm1248_vm3, %v5519_v32, %v5522_v38  ;;  %v15644_v38 = vshrl.u32 %v13443_v40, 16 }
 0x4c0   : > { %10203 = vmatprep.mubr.msk.bf16.mxu1 %vm4359_vm4, %v14180_v3  ;;  %15639 = vst [vmem:[#allocation73_spill] sm:$0xff] %v14193_v30  ;;  %v5543_v3 = vrot.slane %v15643_v10, 1 }
 0x4c1   : > { %v5540_v32 = vor.u32 %v15644_v38, %v5536_v0  ;;  %v15649_v38 = vshll.u32 %v13479_v5, 16 }
 0x4c2   : > { %v5547_v10 = vor.u32 %v15648_v14, %v5543_v3  ;;  %v15654_v14 = vshrl.u32 %v13479_v5, 16  ;;  %v9049_v5 = vld [vmem:[%s14977_s3 + $0xe8] sm:$0xff] }
 0x4c3   : > { %v14216_v12 = vsel %vm1248_vm3, %v5540_v32, %v5543_v3  ;;  %v15653_v3 = vshll.u32 %v13493_v53, 16 }
 0x4c4   : > { %15646 = vst [vmem:[#allocation76_spill] sm:$0xff] %v14216_v12 }
 0x4c5   : > { %v5564_v36 = vrot.slane %v15653_v3, 1  ;;  %v15658_v3 = vshrl.u32 %v15597_v11, 16 }
 0x4c7   : > { %10204 = vmatmul.mubr.msk.bf16.gmra.mrb[52].mxu1 %vm4359_vm4, %v14193_v30  ;;  %v14211_v30 = vsel %vm1248_vm3, %v5533_v37, %v5536_v0  ;;  %v15650_v0 = vshrl.u32 %v13467_v60, 16 }
 0x4c8   : > { %10207 = vmatprep.mubr.msk.bf16.mxu1 %vm4359_vm4, %v14198_v52  ;;  %15645 = vst [vmem:[#allocation75_spill] sm:$0xff] %v14211_v30  ;;  %v5557_v52 = vrot.slane %v15649_v38, 1 }
 0x4c9   : > { %v5554_v37 = vor.u32 %v15650_v0, %v5550_v2  ;;  %v5401_v0 = vpack.c.bf16 %v13814_v43, %v13814_v43 }
 0x4ca   : > { %v5561_v38 = vor.u32 %v15654_v14, %v5557_v52  ;;  %v15659_v14 = vshll.u32 %v15597_v11, 16 }
 0x4cb   : > { %v14234_v32 = vsel %vm1248_vm3, %v5554_v37, %v5557_v52  ;;  %v5577_v37 = vshll.u32 %v5401_v0, 16  ;;  %v5938_v52 = vrot.slane %v15658_v3, 3  ;;  %v15661_v0 = vshll.u32 %v15596_v9, 16 }
 0x4cc   : > { %15652 = vst [vmem:[#allocation78_spill] sm:$0xff] %v14234_v32  ;;  %v5939_v43 = vrot.slane %v15659_v14, 4  ;;  %v15667_v14 = vld [vmem:[#allocation47_spill] sm:$0xff] }
 0x4cf   : > { %10208 = vmatmul.mubr.msk.bf16.gmra.mrb[56].mxu1 %vm4359_vm4, %v14211_v30  ;;  %v14229_v30 = vsel %vm1248_vm3, %v5547_v10, %v5550_v2  ;;  %v15655_v2 = vshrl.u32 %v13493_v53, 16  ;;  %v9048_v53 = vld [vmem:[%s14977_s3 + $0xe0] sm:$0xff] }
 0x4d0   : > { %10211 = vmatprep.mubr.msk.bf16.mxu1 %vm4359_vm4, %v14216_v12  ;;  %15651 = vst [vmem:[#allocation77_spill] sm:$0xff] %v14229_v30  ;;  %v5940_v12 = vor.u32 %v5939_v43, %v5938_v52  ;;  %v15666_v52 = vld [vmem:[#allocation46_spill] sm:$0xff]  ;;  %v15668_v43 = vld [vmem:[#allocation48_spill] sm:$0xff] }
 0x4d1   : > { %v5568_v10 = vor.u32 %v15655_v2, %v5564_v36  ;;  %v5936_v2 = vrot.slane %v15661_v0, 4 }
 0x4d2   : > { %v5945_v3 = vsel %vm719_vm2, %v5940_v12, %v13676_v19  ;;  %v15662_v19 = vld [vmem:[#allocation42_spill] sm:$0xff] }
 0x4d7   : > { %10212 = vmatmul.mubr.msk.bf16.gmra.mrb[60].mxu1 %vm4359_vm4, %v14229_v30  ;;  %v14247_v30 = vsel %vm1248_vm3, %v5561_v38, %v5564_v36  ;;  %v15660_v36 = vshrl.u32 %v15596_v9, 16  ;;  %v8967_v9 = vld [vmem:[%s14977_s3 + $0x98] sm:$0xff] }
 0x4d8   : > { %10215 = vmatprep.mubr.msk.bf16.mxu1 %vm4359_vm4, %v14234_v32  ;;  %15656 = vst [vmem:[#allocation79_spill] sm:$0xff] %v14247_v30  ;;  %v14253_v32 = vsel %vm1248_vm3, %v5568_v10, %v13929_v47  ;;  %v8966_v10 = vld [vmem:[%s14977_s3 + $0x90] sm:$0xff] }
 0x4d9   : > { %15657 = vst [vmem:[#allocation80_spill] sm:$0xff] %v14253_v32  ;;  %v5935_v38 = vrot.slane %v15660_v36, 3  ;;  %v15671_v36 = vld [vmem:[#allocation52_spill] sm:$0xff] }
 0x4db   : > { %v5937_v20 = vor.u32 %v5936_v2, %v5935_v38  ;;  %v5927_v38 = vpack.c.bf16 %v13822_v15, %v13822_v15  ;;  %v15673_v2 = vshll.u32 %v13912_v63, 16  ;;  %v15675_v15 = vld [vmem:[#allocation51_spill] sm:$0xff] }
 0x4dd   : > { %v5941_v11 = vsel %vm719_vm2, %v5937_v20, %v5940_v12  ;;  %v8993_v20 = vld [vmem:[%s14977_s3 + $0xa8] sm:$0xff] }
 0x4de   : > { %v15663_v12 = vld [vmem:[#allocation43_spill] sm:$0xff] }
 0x4df   : > { %10216 = vmatmul.mubr.msk.bf16.gmra.mrb[64].mxu1 %vm4359_vm4, %v14247_v30  ;;  %v5579_v30 = vrot.slane %v5577_v37, 1  ;;  %v6397_v37 = vpack.c.bf16 %v8967_v9, %v8966_v10  ;;  %v15674_v9 = vld [vmem:[#allocation6_spill] sm:$0xff] }
 0x4e0   : > { %10219 = vmatprep.mubr.msk.bf16.mxu1 %vm4359_vm4, %v14253_v32 }
 0x4e1   : > { %v5580_v47 = vsel %vm1248_vm3, %v13956_v34, %v5579_v30  ;;  %v8992_v34 = vld [vmem:[%s14977_s3 + $0xa0] sm:$0xff] }
 0x4e2   : > { %v6727_v30 = vpack.c.bf16 %v8993_v20, %v8992_v34  ;;  %v15676_v34 = vld [vmem:[#allocation13_spill] sm:$0xff] }
 0x4e3   : > { %v8995_v20 = vld [vmem:[%s14977_s3 + $0xb8] sm:$0xff] }
 0x4e7   : > { %10220 = vmatmul.mubr.msk.bf16.gmra.mrb[68].mxu1 %vm4359_vm4, %v5580_v47  ;;  %v6032_v47 = vrot.slane %v15673_v2, 4  ;;  %v15687_v2 = vld [vmem:[#allocation21_spill] sm:$0xff] }
 0x4e8   : > { %10227 = vmatprep.mubr.msk.bf16.mxu1 %vm4359_vm4, %v5941_v11 }
 0x4ef   : > { %10228 = vmatmul.mubr.msk.bf16.vlgmr.msra.gmra.mrb[24].mxu1 %vm4359_vm4, %v5945_v3 }
 0x4f0   : > { %10276 = vmatpush3.bf16.msra.mxu1 %v14075_v41  ;;  %10231 = vmatprep.mubr.msk.bf16.mxu1 %vm4359_vm4, %v13708_v45  ;;  %v15664_v41 = vld [vmem:[#allocation44_spill] sm:$0xff]  ;;  %v15665_v45 = vld [vmem:[#allocation45_spill] sm:$0xff] }
 0x4f1   : > { %10277 = vmatprep.subr.bf16.mxu1 %v6397_v37 }
 0x4f4   : > { %10278 = vmatpush3.bf16.msra.mxu1 %v6397_v37 }
 0x4f5   : > { %10327 = vmatprep.subr.bf16.mxu1 %v6727_v30 }
 0x4f7   : > { %10232 = vmatmul.mubr.msk.bf16.gmra.mrb[28].mxu1 %vm4359_vm4, %v15662_v19 }
 0x4f8   : > { %10235 = vmatprep.mubr.msk.bf16.mxu1 %vm4359_vm4, %v13718_v29  ;;  %v15669_v29 = vld [vmem:[#allocation49_spill] sm:$0xff] }
 0x4ff   : > { %10236 = vmatmul.mubr.msk.bf16.gmra.mrb[32].mxu1 %vm4359_vm4, %v13729_v23  ;;  %v15670_v23 = vld [vmem:[#allocation50_spill] sm:$0xff] }
 0x500   : > { %10239 = vmatprep.mubr.msk.bf16.mxu1 %vm4359_vm4, %v15663_v12  ;;  %v9020_v12 = vld [vmem:[%s14977_s3 + $0xc0] sm:$0xff] }
 0x507   : > { %10240 = vmatmul.mubr.msk.bf16.gmra.mrb[36].mxu1 %vm4359_vm4, %v15664_v41  ;;  %v9021_v41 = vld [vmem:[%s14977_s3 + $0xc8] sm:$0xff] }
 0x508   : > { %10243 = vmatprep.mubr.msk.bf16.mxu1 %vm4359_vm4, %v15665_v45  ;;  %v15677_v45 = vld [vmem:[#allocation11_spill] sm:$0xff] }
 0x50f   : > { %10244 = vmatmul.mubr.msk.bf16.gmra.mrb[40].mxu1 %vm4359_vm4, %v15666_v52  ;;  %v15678_v52 = vld [vmem:[#allocation19_spill] sm:$0xff] }
 0x510   : > { %10247 = vmatprep.mubr.msk.bf16.mxu1 %vm4359_vm4, %v15667_v14  ;;  %v7165_v14 = vpack.c.bf16 %v9021_v41, %v9020_v12  ;;  %v15699_v41 = vshll.u32 %v15678_v52, 16 }
 0x512   : > { %v6734_v32 = vrot.slane %v15699_v41, 1 }
 0x517   : > { %10248 = vmatmul.mubr.msk.bf16.gmra.mrb[44].mxu1 %vm4359_vm4, %v15668_v43  ;;  %v15679_v43 = vld [vmem:[#allocation17_spill] sm:$0xff] }
 0x518   : > { %10251 = vmatprep.mubr.msk.bf16.mxu1 %vm4359_vm4, %v15669_v29  ;;  %v15680_v29 = vld [vmem:[#allocation27_spill] sm:$0xff] }
 0x51f   : > { %10252 = vmatmul.mubr.msk.bf16.gmra.mrb[48].mxu1 %vm4359_vm4, %v13785_v57  ;;  %v15672_v57 = vshrl.u32 %v13912_v63, 16 }
 0x520   : > { %10255 = vmatprep.mubr.msk.bf16.mxu1 %vm4359_vm4, %v15670_v23  ;;  %v15681_v23 = vld [vmem:[#allocation24_spill] sm:$0xff] }
 0x521   : > { %v6029_v0 = vrot.slane %v15672_v57, 3  ;;  %v15685_v57 = vld [vmem:[#allocation15_spill] sm:$0xff] }
 0x523   : > { %v6033_v11 = vor.u32 %v6032_v47, %v6029_v0  ;;  %v15686_v0 = vld [vmem:[#allocation23_spill] sm:$0xff]  ;;  %v15688_v47 = vld [vmem:[#allocation26_spill] sm:$0xff] }
 0x527   : > { %10256 = vmatmul.mubr.msk.bf16.gmra.mrb[52].mxu1 %vm4359_vm4, %v15671_v36  ;;  %v15682_v36 = vld [vmem:[#allocation10_spill] sm:$0xff] }
 0x528   : > { %10259 = vmatprep.mubr.msk.bf16.mxu1 %vm4359_vm4, %v13810_v49  ;;  %v6036_v49 = vshrl.u32 %v5927_v38, 16 }
 0x52a   : > { %v6038_v10 = vrot.slane %v6036_v49, 3  ;;  %v15689_v49 = vld [vmem:[#allocation25_spill] sm:$0xff] }
 0x52f   : > { %10260 = vmatmul.mubr.msk.bf16.gmra.mrb[56].mxu1 %vm4359_vm4, %v13827_v13  ;;  %v6039_v13 = vshll.u32 %v5927_v38, 16  ;;  %v15684_v38 = vld [vmem:[#allocation16_spill] sm:$0xff] }
 0x530   : > { %10263 = vmatprep.mubr.msk.bf16.mxu1 %vm4359_vm4, %v13830_v4 }
 0x531   : > { %v6041_v4 = vrot.slane %v6039_v13, 4  ;;  %v15690_v13 = vld [vmem:[#allocation29_spill] sm:$0xff] }
 0x533   : > { %v6042_v37 = vor.u32 %v6041_v4, %v6038_v10  ;;  %v15692_v10 = vld [vmem:[#allocation32_spill] sm:$0xff]  ;;  %v15693_v4 = vld [vmem:[#allocation31_spill] sm:$0xff] }
 0x535   : > { %v6043_v3 = vsel %vm719_vm2, %v6033_v11, %v6042_v37  ;;  %v15696_v37 = vshrl.u32 %v15676_v34, 16 }
 0x537   : > { %10264 = vmatmul.mubr.msk.bf16.gmra.mrb[60].mxu1 %vm4359_vm4, %v13835_v18  ;;  %v6034_v18 = vsel %vm719_vm2, %v15675_v15, %v6033_v11  ;;  %v15691_v11 = vld [vmem:[#allocation28_spill] sm:$0xff] }
 0x538   : > { %10267 = vmatprep.mubr.msk.bf16.mxu1 %vm4359_vm4, %v13852_v6  ;;  %v8994_v6 = vld [vmem:[%s14977_s3 + $0xb0] sm:$0xff] }
 0x539   : > { %v6728_v19 = vpack.c.bf16 %v8995_v20, %v8994_v6  ;;  %v15697_v6 = vshll.u32 %v15677_v45, 16 }
 0x53b   : > { %v6731_v20 = vrot.slane %v15697_v6, 1  ;;  %v15701_v6 = vshrl.u32 %v15677_v45, 16 }
 0x53d   : > { %v6733_v48 = vor.u32 %v6731_v20, %v15701_v6  ;;  %v15706_v6 = vshll.u32 %v15681_v23, 16 }
 0x53f   : > { %10268 = vmatmul.mubr.msk.bf16.gmra.mrb[64].mxu1 %vm4359_vm4, %v15674_v9  ;;  %v15694_v9 = vshll.u32 %v15676_v34, 16 }
 0x540   : > { %10271 = vmatprep.mubr.msk.bf16.mxu1 %vm4359_vm4, %v6034_v18  ;;  %v15695_v18 = vld [vmem:[#allocation20_spill] sm:$0xff] }
 0x541   : > { %v6729_v15 = vrot.slane %v15694_v9, 1  ;;  %v9022_v9 = vld [vmem:[%s14977_s3 + $0xd0] sm:$0xff] }
 0x547   : > { %10272 = vmatmul.mubr.msk.bf16.gmra.mrb[68].mxu1 %vm4359_vm4, %v6043_v3  ;;  %v6730_v3 = vor.u32 %v6729_v15, %v15696_v37  ;;  %v15700_v15 = vshrl.u32 %v15678_v52, 16 }
 0x548   : > { %10279 = vmatprep.mubr.msk.bf16.mxu1 %vm4359_vm4, %v15676_v34  ;;  %v9023_v34 = vld [vmem:[%s14977_s3 + $0xd8] sm:$0xff] }
 0x549   : > { %v6732_v12 = vsel %vm1248_vm3, %v6730_v3, %v6731_v20  ;;  %v6736_v37 = vor.u32 %v6734_v32, %v15700_v15  ;;  %v15702_v3 = vshll.u32 %v15679_v43, 16  ;;  %v7166_v41 = vpack.c.bf16 %v9023_v34, %v9022_v9 }
 0x54a   : > { %v15705_v34 = vshrl.u32 %v15679_v43, 16 }
 0x54b   : > { %v6737_v63 = vrot.slane %v15702_v3, 1  ;;  %v6743_v3 = vrot.slane %v15706_v6, 1  ;;  %v15714_v6 = vshll.u32 %v15685_v57, 16 }
 0x54d   : > { %v6739_v15 = vor.u32 %v6737_v63, %v15705_v34 }
 0x54f   : > { %10280 = vmatmul.mubr.msk.bf16.vlgmr.msra.gmra.mrb[24].mxu1 %vm4359_vm4, %v15677_v45  ;;  %v15703_v45 = vshll.u32 %v15680_v29, 16 }
 0x550   : > { %10328 = vmatpush3.bf16.msra.mxu1 %v6727_v30  ;;  %10283 = vmatprep.mubr.msk.bf16.mxu1 %vm4359_vm4, %v15678_v52  ;;  %v15683_v30 = vld [vmem:[#allocation8_spill] sm:$0xff]  ;;  %v6738_v52 = vsel %vm1248_vm3, %v6736_v37, %v6737_v63 }
 0x551   : > { %10329 = vmatprep.subr.bf16.mxu1 %v6728_v19  ;;  %v6740_v20 = vrot.slane %v15703_v45, 1 }
 0x553   : > { %v6741_v37 = vsel %vm1248_vm3, %v6739_v15, %v6740_v20 }
 0x554   : > { %10330 = vmatpush3.bf16.msra.mxu1 %v6728_v19  ;;  %v15698_v19 = vld [vmem:[#allocation22_spill] sm:$0xff] }
 0x555   : > { %10379 = vmatprep.subr.bf16.mxu1 %v7165_v14 }
 0x557   : > { %10284 = vmatmul.mubr.msk.bf16.gmra.mrb[28].mxu1 %vm4359_vm4, %v15679_v43  ;;  %v15708_v43 = vshrl.u32 %v15682_v36, 16 }
 0x558   : > { %10287 = vmatprep.mubr.msk.bf16.mxu1 %vm4359_vm4, %v15680_v29 }
 0x55f   : > { %10288 = vmatmul.mubr.msk.bf16.gmra.mrb[32].mxu1 %vm4359_vm4, %v15681_v23 }
 0x560   : > { %10291 = vmatprep.mubr.msk.bf16.mxu1 %vm4359_vm4, %v15682_v36 }
 0x567   : > { %10292 = vmatmul.mubr.msk.bf16.gmra.mrb[36].mxu1 %vm4359_vm4, %v15683_v30 }
 0x568   : > { %10295 = vmatprep.mubr.msk.bf16.mxu1 %vm4359_vm4, %v15684_v38 }
 0x56f   : > { %10296 = vmatmul.mubr.msk.bf16.gmra.mrb[40].mxu1 %vm4359_vm4, %v15685_v57 }
 0x570   : > { %10299 = vmatprep.mubr.msk.bf16.mxu1 %vm4359_vm4, %v15686_v0 }
 0x577   : > { %10300 = vmatmul.mubr.msk.bf16.gmra.mrb[44].mxu1 %vm4359_vm4, %v15687_v2 }
 0x578   : > { %10303 = vmatprep.mubr.msk.bf16.mxu1 %vm4359_vm4, %v15688_v47 }
 0x57f   : > { %10304 = vmatmul.mubr.msk.bf16.gmra.mrb[48].mxu1 %vm4359_vm4, %v15689_v49 }
 0x580   : > { %10307 = vmatprep.mubr.msk.bf16.mxu1 %vm4359_vm4, %v15690_v13 }
 0x587   : > { %10308 = vmatmul.mubr.msk.bf16.gmra.mrb[52].mxu1 %vm4359_vm4, %v15691_v11 }
 0x588   : > { %10311 = vmatprep.mubr.msk.bf16.mxu1 %vm4359_vm4, %v15692_v10 }
 0x58f   : > { %10312 = vmatmul.mubr.msk.bf16.gmra.mrb[56].mxu1 %vm4359_vm4, %v15693_v4 }
 0x590   : > { %10315 = vmatprep.mubr.msk.bf16.mxu1 %vm4359_vm4, %v13465_v35 }
 0x597   : > { %10316 = vmatmul.mubr.msk.bf16.gmra.mrb[60].mxu1 %vm4359_vm4, %v13458_v21 }
 0x598   : > { %10319 = vmatprep.mubr.msk.bf16.mxu1 %vm4359_vm4, %v13491_v51 }
 0x59f   : > { %10320 = vmatmul.mubr.msk.bf16.gmra.mrb[64].mxu1 %vm4359_vm4, %v13482_v46 }
 0x5a0   : > { %10323 = vmatprep.mubr.msk.bf16.mxu1 %vm4359_vm4, %v15695_v18 }
 0x5a7   : > { %10324 = vmatmul.mubr.msk.bf16.gmra.mrb[68].mxu1 %vm4359_vm4, %v15698_v19 }
 0x5a8   : > { %10331 = vmatprep.mubr.msk.bf16.mxu1 %vm4359_vm4, %v6732_v12  ;;  %v6735_v12 = vsel %vm1248_vm3, %v6733_v48, %v6734_v32  ;;  %v14431_v48 = vpack.c.bf16 %v9049_v5, %v9048_v53  ;;  %v15704_v32 = vshrl.u32 %v15680_v29, 16  ;;  %v15707_v5 = vshll.u32 %v15682_v36, 16 }
 0x5a9   : > { %v15709_v29 = vshrl.u32 %v15681_v23, 16  ;;  %v15712_v36 = vshrl.u32 %v15684_v38, 16  ;;  %v15713_v23 = vshrl.u32 %v15683_v30, 16 }
 0x5aa   : > { %v6742_v9 = vor.u32 %v6740_v20, %v15704_v32  ;;  %v6746_v53 = vrot.slane %v15707_v5, 1  ;;  %v15711_v32 = vshll.u32 %v15684_v38, 16  ;;  %v15715_v5 = vshll.u32 %v15686_v0, 16 }
 0x5ab   : > { %v15716_v38 = vshrl.u32 %v15686_v0, 16  ;;  %v15720_v0 = vshrl.u32 %v15688_v47, 16 }
 0x5ac   : > { %v6748_v63 = vor.u32 %v6746_v53, %v15708_v43 }
 0x5af   : > { %10332 = vmatmul.mubr.msk.bf16.vlgmr.msra.gmra.mrb[24].mxu1 %vm4359_vm4, %v6735_v12  ;;  %v15710_v12 = vshll.u32 %v15683_v30, 16  ;;  %v15717_v30 = vshrl.u32 %v15685_v57, 16  ;;  %v15721_v57 = vshrl.u32 %v15687_v2, 16 }
 0x5b0   : > { %10380 = vmatpush3.bf16.msra.mxu1 %v7165_v14  ;;  %10335 = vmatprep.mubr.msk.bf16.mxu1 %vm4359_vm4, %v6738_v52  ;;  %v6744_v14 = vsel %vm1248_vm3, %v6742_v9, %v6743_v3  ;;  %v6752_v9 = vrot.slane %v15711_v32, 1 }
 0x5b1   : > { %10381 = vmatprep.subr.bf16.mxu1 %v7166_v41  ;;  %v6749_v52 = vrot.slane %v15710_v12, 1 }
 0x5b2   : > { %v6754_v34 = vor.u32 %v6752_v9, %v15712_v36  ;;  %v15722_v36 = vshll.u32 %v15689_v49, 16 }
 0x5b3   : > { %v6750_v20 = vsel %vm1248_vm3, %v6748_v63, %v6749_v52  ;;  %v6751_v15 = vor.u32 %v6749_v52, %v15713_v23 }
 0x5b4   : > { %10382 = vmatpush3.bf16.msra.mxu1 %v7166_v41  ;;  %v6745_v41 = vor.u32 %v6743_v3, %v15709_v29  ;;  %v6755_v3 = vrot.slane %v15714_v6, 1  ;;  %v15718_v29 = vshll.u32 %v15687_v2, 16  ;;  %v15723_v6 = vshll.u32 %v15690_v13, 16 }
 0x5b5   : > { %10431 = vmatprep.subr.bf16.mxu1 %v14431_v48  ;;  %v15725_v2 = vshrl.u32 %v15689_v49, 16  ;;  %v15729_v49 = vshrl.u32 %v15691_v11, 16 }
 0x5b6   : > { %v6747_v45 = vsel %vm1248_vm3, %v6745_v41, %v6746_v53  ;;  %v6758_v53 = vrot.slane %v15715_v5, 1  ;;  %v6757_v63 = vor.u32 %v6755_v3, %v15717_v30  ;;  %v6761_v41 = vrot.slane %v15718_v29, 1 }
 0x5b7   : > { %10336 = vmatmul.mubr.msk.bf16.gmra.mrb[28].mxu1 %vm4359_vm4, %v6741_v37  ;;  %v6753_v37 = vsel %vm1248_vm3, %v6751_v15, %v6752_v9  ;;  %v15726_v5 = vshll.u32 %v15691_v11, 16  ;;  %v15727_v30 = vshll.u32 %v15692_v10, 16  ;;  %v15733_v11 = vshrl.u32 %v15693_v4, 16 }
 0x5b8   : > { %10339 = vmatprep.mubr.msk.bf16.mxu1 %vm4359_vm4, %v6744_v14  ;;  %v6756_v14 = vsel %vm1248_vm3, %v6754_v34, %v6755_v3  ;;  %v6760_v43 = vor.u32 %v6758_v53, %v15716_v38  ;;  %v6759_v12 = vsel %vm1248_vm3, %v6757_v63, %v6758_v53  ;;  %v6763_v9 = vor.u32 %v6761_v41, %v15721_v57 }
 0x5b9   : > { %v6767_v34 = vrot.slane %v15722_v36, 1  ;;  %v6770_v3 = vrot.slane %v15723_v6, 1  ;;  %v6773_v53 = vrot.slane %v15726_v5, 1  ;;  %v6776_v63 = vrot.slane %v15727_v30, 1 }
 0x5ba   : > { %v6762_v52 = vsel %vm1248_vm3, %v6760_v43, %v6761_v41  ;;  %v15734_v36 = vshll.u32 %v13458_v21, 16  ;;  %v15735_v6 = vshll.u32 %v13491_v51, 16 }
 0x5bb   : > { %v6775_v41 = vor.u32 %v6773_v53, %v15729_v49 }
 0x5bf   : > { %10340 = vmatmul.mubr.msk.bf16.gmra.mrb[32].mxu1 %vm4359_vm4, %v6747_v45  ;;  %v15719_v45 = vshll.u32 %v15688_v47, 16  ;;  %v15724_v47 = vshrl.u32 %v15690_v13, 16  ;;  %v15728_v13 = vshrl.u32 %v15692_v10, 16  ;;  %v15732_v10 = vshrl.u32 %v13465_v35, 16 }
 0x5c0   : > { %10343 = vmatprep.mubr.msk.bf16.mxu1 %vm4359_vm4, %v6750_v20 }
 0x5c1   : > { %v6764_v20 = vrot.slane %v15719_v45, 1  ;;  %v6778_v29 = vor.u32 %v6776_v63, %v15728_v13  ;;  %v6777_v45 = vsel %vm1248_vm3, %v6775_v41, %v6776_v63  ;;  %v15741_v63 = vshrl.u32 %v13482_v46, 16 }
 0x5c3   : > { %v6766_v32 = vor.u32 %v6764_v20, %v15720_v0  ;;  %v6765_v23 = vsel %vm1248_vm3, %v6763_v9, %v6764_v20  ;;  %v15731_v0 = vshll.u32 %v13465_v35, 16  ;;  %v15736_v35 = vshrl.u32 %v13491_v51, 16 }
 0x5c4   : > { %v6721_v51 = vpack.c.bf16 %v13915_v1, %v13915_v1  ;;  %v15743_v1 = vshrl.u32 %v15698_v19, 16 }
 0x5c5   : > { %v6768_v15 = vsel %vm1248_vm3, %v6766_v32, %v6767_v34  ;;  %v6782_v32 = vrot.slane %v15731_v0, 1  ;;  %v9050_v0 = vld [vmem:[%s14977_s3 + $0xf0] sm:$0xff] }
 0x5c7   : > { %10344 = vmatmul.mubr.msk.bf16.gmra.mrb[36].mxu1 %vm4359_vm4, %v6753_v37  ;;  %v6772_v37 = vor.u32 %v6770_v3, %v15724_v47  ;;  %v6784_v57 = vor.u32 %v6782_v32, %v15732_v10 }
 0x5c8   : > { %10347 = vmatprep.mubr.msk.bf16.mxu1 %vm4359_vm4, %v6756_v14  ;;  %v6769_v14 = vor.u32 %v6767_v34, %v15725_v2  ;;  %v6785_v34 = vrot.slane %v15734_v36, 1  ;;  %v15738_v2 = vshll.u32 %v13482_v46, 16  ;;  %v15744_v46 = vld [vmem:[#allocation34_spill] sm:$0xff] }
 0x5c9   : > { %v6774_v43 = vsel %vm1248_vm3, %v6772_v37, %v6773_v53 }
 0x5ca   : > { %v6771_v38 = vsel %vm1248_vm3, %v6769_v14, %v6770_v3  ;;  %v6788_v3 = vrot.slane %v15735_v6, 1  ;;  %v6791_v14 = vrot.slane %v15738_v2, 1  ;;  %v15750_v6 = vld [vmem:[#allocation40_spill] sm:$0xff] }
 0x5cb   : > { %v15757_v2 = vld [vmem:[#allocation56_spill] sm:$0xff] }
 0x5cc   : > { %v6790_v47 = vor.u32 %v6788_v3, %v15736_v35  ;;  %v6793_v13 = vor.u32 %v6791_v14, %v15741_v63  ;;  %v15753_v35 = vld [vmem:[#allocation12_spill] sm:$0xff] }
 0x5ce   : > { %v6792_v53 = vsel %vm1248_vm3, %v6790_v47, %v6791_v14  ;;  %v15754_v47 = vld [vmem:[#allocation14_spill] sm:$0xff]  ;;  %v4519_v14 = vld [vmem:[#allocation2 + $0x1b0] sm:$0xff] }
 0x5cf   : > { %10348 = vmatmul.mubr.msk.bf16.gmra.mrb[40].mxu1 %vm4359_vm4, %v6759_v12  ;;  %v15730_v12 = vshll.u32 %v15693_v4, 16  ;;  %v15737_v4 = vshrl.u32 %v13458_v21, 16  ;;  %v15740_v21 = vshrl.u32 %v15695_v18, 16 }
 0x5d0   : > { %10351 = vmatprep.mubr.msk.bf16.mxu1 %vm4359_vm4, %v6762_v52 }
 0x5d1   : > { %v6779_v52 = vrot.slane %v15730_v12, 1  ;;  %v6787_v37 = vor.u32 %v6785_v34, %v15737_v4  ;;  %v6809_v12 = vshll.u32 %v6721_v51, 16  ;;  %v15755_v4 = vld [vmem:[#allocation18_spill] sm:$0xff] }
 0x5d2   : > { %v15759_v51 = vld [vmem:[#allocation58_spill] sm:$0xff] }
 0x5d3   : > { %v6780_v20 = vsel %vm1248_vm3, %v6778_v29, %v6779_v52  ;;  %v6781_v9 = vor.u32 %v6779_v52, %v15733_v11  ;;  %v6789_v5 = vsel %vm1248_vm3, %v6787_v37, %v6788_v3  ;;  %v15742_v29 = vshll.u32 %v15698_v19, 16  ;;  %v9076_v19 = vld [vmem:[%s14977_s3 + $0x100] sm:$0xff]  ;;  %v15745_v11 = vld [vmem:[#allocation35_spill] sm:$0xff]  ;;  %v15756_v37 = vld [vmem:[#allocation53_spill] sm:$0xff] }
 0x5d4   : > { %v15752_v3 = vld [vmem:[#allocation30_spill] sm:$0xff] }
 0x5d5   : > { %v6803_v49 = vrot.slane %v15742_v29, 1  ;;  %v15774_v29 = vld [vmem:[#allocation67_spill] sm:$0xff] }
 0x5d7   : > { %10352 = vmatmul.mubr.msk.bf16.gmra.mrb[44].mxu1 %vm4359_vm4, %v6765_v23  ;;  %v6783_v23 = vsel %vm1248_vm3, %v6781_v9, %v6782_v32  ;;  %v9051_v32 = vld [vmem:[%s14977_s3 + $0xf8] sm:$0xff]  ;;  %v15746_v9 = vld [vmem:[#allocation36_spill] sm:$0xff] }
 0x5d8   : > { %10355 = vmatprep.mubr.msk.bf16.mxu1 %vm4359_vm4, %v6768_v15  ;;  %v6786_v15 = vsel %vm1248_vm3, %v6784_v57, %v6785_v34  ;;  %v7486_v10 = vpack.c.bf16 %v9051_v32, %v9050_v0  ;;  %v9077_v57 = vld [vmem:[%s14977_s3 + $0x108] sm:$0xff]  ;;  %v15747_v34 = vld [vmem:[#allocation37_spill] sm:$0xff]  ;;  %v15785_v32 = vld [vmem:[#allocation78_spill] sm:$0xff] }
 0x5d9   : > { %v7774_v36 = vpack.c.bf16 %v9077_v57, %v9076_v19  ;;  %v15784_v0 = vld [vmem:[#allocation77_spill] sm:$0xff] }
 0x5da   : > { %v4520_v57 = vld [vmem:[#allocation2 + $0x1b8] sm:$0xff] }
 0x5df   : > { %10356 = vmatmul.mubr.msk.bf16.gmra.mrb[48].mxu1 %vm4359_vm4, %v6771_v38  ;;  %v15739_v38 = vshll.u32 %v15695_v18, 16  ;;  %v6811_v18 = vrot.slane %v6809_v12, 1  ;;  %v15777_v12 = vld [vmem:[#allocation70_spill] sm:$0xff] }
 0x5e0   : > { %10359 = vmatprep.mubr.msk.bf16.mxu1 %vm4359_vm4, %v6774_v43 }
 0x5e1   : > { %v6796_v43 = vrot.slane %v15739_v38, 1 }
 0x5e3   : > { %v6800_v30 = vor.u32 %v15740_v21, %v6796_v43  ;;  %v6797_v41 = vsel %vm1248_vm3, %v6793_v13, %v6796_v43  ;;  %v15761_v21 = vld [vmem:[#allocation59_spill] sm:$0xff]  ;;  %v15773_v13 = vld [vmem:[#allocation66_spill] sm:$0xff] }
 0x5e5   : > { %v6804_v52 = vsel %vm1248_vm3, %v6800_v30, %v6803_v49  ;;  %v9079_v30 = vld [vmem:[%s14977_s3 + $0x118] sm:$0xff] }
 0x5e7   : > { %10360 = vmatmul.mubr.msk.bf16.gmra.mrb[52].mxu1 %vm4359_vm4, %v6777_v45  ;;  %v6807_v45 = vor.u32 %v15743_v1, %v6803_v49  ;;  %v15775_v49 = vld [vmem:[#allocation68_spill] sm:$0xff] }
 0x5e8   : > { %10363 = vmatprep.mubr.msk.bf16.mxu1 %vm4359_vm4, %v6780_v20  ;;  %v15779_v1 = vld [vmem:[#allocation72_spill] sm:$0xff] }
 0x5e9   : > { %v6812_v20 = vsel %vm1248_vm3, %v6807_v45, %v6811_v18  ;;  %v15780_v45 = vld [vmem:[#allocation73_spill] sm:$0xff]  ;;  %v15781_v18 = vld [vmem:[#allocation74_spill] sm:$0xff] }
 0x5ef   : > { %10364 = vmatmul.mubr.msk.bf16.gmra.mrb[56].mxu1 %vm4359_vm4, %v6783_v23  ;;  %v15748_v23 = vld [vmem:[#allocation38_spill] sm:$0xff] }
 0x5f0   : > { %10367 = vmatprep.mubr.msk.bf16.mxu1 %vm4359_vm4, %v6786_v15  ;;  %v15749_v15 = vld [vmem:[#allocation39_spill] sm:$0xff] }
 0x5f7   : > { %10368 = vmatmul.mubr.msk.bf16.gmra.mrb[60].mxu1 %vm4359_vm4, %v6789_v5  ;;  %v7159_v5 = vpack.c.bf16 %v4519_v14, %v4519_v14 }
 0x5f8   : > { %10371 = vmatprep.mubr.msk.bf16.mxu1 %vm4359_vm4, %v6792_v53  ;;  %v15758_v53 = vld [vmem:[#allocation63_spill] sm:$0xff] }
 0x5f9   : > { %v7188_v38 = vshll.u32 %v7159_v5, 16 }
 0x5fb   : > { %v7190_v43 = vrot.slane %v7188_v38, 4 }
 0x5ff   : > { %10372 = vmatmul.mubr.msk.bf16.gmra.mrb[64].mxu1 %vm4359_vm4, %v6797_v41  ;;  %v15776_v41 = vld [vmem:[#allocation69_spill] sm:$0xff] }
 0x600   : > { %10375 = vmatprep.mubr.msk.bf16.mxu1 %vm4359_vm4, %v6804_v52  ;;  %v15778_v52 = vld [vmem:[#allocation71_spill] sm:$0xff] }
 0x607   : > { %10376 = vmatmul.mubr.msk.bf16.gmra.mrb[68].mxu1 %vm4359_vm4, %v6812_v20  ;;  %v15782_v20 = vld [vmem:[#allocation75_spill] sm:$0xff] }
 0x608   : > { %10383 = vmatprep.mubr.msk.bf16.mxu1 %vm4359_vm4, %v15744_v46  ;;  %v15783_v46 = vld [vmem:[#allocation76_spill] sm:$0xff] }
 0x60f   : > { %10384 = vmatmul.mubr.msk.bf16.vlgmr.msra.gmra.mrb[24].mxu1 %vm4359_vm4, %v15745_v11  ;;  %v15787_v11 = vld [vmem:[#allocation80_spill] sm:$0xff] }
 0x610   : > { %10432 = vmatpush3.bf16.msra.mxu1 %v14431_v48  ;;  %10387 = vmatprep.mubr.msk.bf16.mxu1 %vm4359_vm4, %v15746_v9  ;;  %v15751_v48 = vld [vmem:[#allocation41_spill] sm:$0xff] }
 0x611   : > { %10433 = vmatprep.subr.bf16.mxu1 %v7486_v10 }
 0x614   : > { %10434 = vmatpush3.bf16.msra.mxu1 %v7486_v10  ;;  %v15786_v10 = vld [vmem:[#allocation79_spill] sm:$0xff] }
 0x615   : > { %10483 = vmatprep.subr.bf16.mxu1 %v7774_v36 }
 0x617   : > { %10388 = vmatmul.mubr.msk.bf16.gmra.mrb[28].mxu1 %vm4359_vm4, %v15747_v34  ;;  %v15788_v34 = vld [vmem:[#allocation60_spill] sm:$0xff] }
 0x618   : > { %10391 = vmatprep.mubr.msk.bf16.mxu1 %vm4359_vm4, %v15748_v23  ;;  %v7768_v23 = vpack.c.bf16 %v4520_v57, %v4520_v57 }
 0x61f   : > { %10392 = vmatmul.mubr.msk.bf16.gmra.mrb[32].mxu1 %vm4359_vm4, %v15749_v15 }
 0x620   : > { %10395 = vmatprep.mubr.msk.bf16.mxu1 %vm4359_vm4, %v15750_v6 }
 0x627   : > { %10396 = vmatmul.mubr.msk.bf16.gmra.mrb[36].mxu1 %vm4359_vm4, %v15751_v48 }
 0x628   : > { %10399 = vmatprep.mubr.msk.bf16.mxu1 %vm4359_vm4, %v15752_v3 }
 0x62f   : > { %10400 = vmatmul.mubr.msk.bf16.gmra.mrb[40].mxu1 %vm4359_vm4, %v15753_v35  ;;  %v7794_v35 = vshll.u32 %v7768_v23, 16 }
 0x630   : > { %10403 = vmatprep.mubr.msk.bf16.mxu1 %vm4359_vm4, %v15754_v47  ;;  %v15789_v47 = vld [vmem:[#allocation61_spill] sm:$0xff] }
 0x637   : > { %10404 = vmatmul.mubr.msk.bf16.gmra.mrb[44].mxu1 %vm4359_vm4, %v15755_v4 }
 0x638   : > { %10407 = vmatprep.mubr.msk.bf16.mxu1 %vm4359_vm4, %v15756_v37 }
 0x63f   : > { %10408 = vmatmul.mubr.msk.bf16.gmra.mrb[48].mxu1 %vm4359_vm4, %v15757_v2 }
 0x640   : > { %10411 = vmatprep.mubr.msk.bf16.mxu1 %vm4359_vm4, %v13949_v26  ;;  %v7170_v26 = vsel %vm719_vm2, %v15758_v53, %v13958_v7  ;;  %v9078_v7 = vld [vmem:[%s14977_s3 + $0x110] sm:$0xff]  ;;  %v14742_v53 = vld [vmem:[%s14978_s4] ss:$0 sm:$0xff] }
 0x641   : > { %v7775_v63 = vpack.c.bf16 %v9079_v30, %v9078_v7 }
 0x647   : > { %10412 = vmatmul.mubr.msk.bf16.gmra.mrb[52].mxu1 %vm4359_vm4, %v13972_v55  ;;  %v7185_v55 = vshrl.u32 %v7159_v5, 16 }
 0x648   : > { %10415 = vmatprep.mubr.msk.bf16.mxu1 %vm4359_vm4, %v14005_v42 }
 0x649   : > { %v7187_v42 = vrot.slane %v7185_v55, 3 }
 0x64f   : > { %10416 = vmatmul.mubr.msk.bf16.gmra.mrb[56].mxu1 %vm4359_vm4, %v14014_v16  ;;  %v15760_v16 = vld [vmem:[#allocation62_spill] sm:$0xff] }
 0x650   : > { %10419 = vmatprep.mubr.msk.bf16.mxu1 %vm4359_vm4, %v14026_v33  ;;  %v7191_v33 = vor.u32 %v7190_v43, %v7187_v42 }
 0x657   : > { %10420 = vmatmul.mubr.msk.bf16.gmra.mrb[60].mxu1 %vm4359_vm4, %v14032_v8  ;;  %v7192_v8 = vsel %vm719_vm2, %v15761_v21, %v7191_v33 }
 0x658   : > { %10423 = vmatprep.mubr.msk.bf16.mxu1 %vm4359_vm4, %v7170_v26 }
 0x65f   : > { %10424 = vmatmul.mubr.msk.bf16.gmra.mrb[64].mxu1 %vm4359_vm4, %v15759_v51 }
 0x660   : > { %10427 = vmatprep.mubr.msk.bf16.mxu1 %vm4359_vm4, %v15760_v16 }
 0x667   : > { %10428 = vmatmul.mubr.msk.bf16.gmra.mrb[68].mxu1 %vm4359_vm4, %v7192_v8 }
 0x668   : > { %10435 = vmatprep.mubr.msk.bf16.mxu1 %vm4359_vm4, %v13222_v22  ;;  %v8210_v22 = vld [vmem:[%s14979_s5] sm:$0xff] }
 0x66f   : > { %10436 = vmatmul.mubr.msk.bf16.vlgmr.msra.gmra.mrb[24].mxu1 %vm4359_vm4, %v15507_v54 }
 0x670   : > { %10484 = vmatpush3.bf16.msra.mxu1 %v7774_v36  ;;  %10439 = vmatprep.mubr.msk.bf16.mxu1 %vm4359_vm4, %v15509_v25  ;;  %v15769_v25 = vld [vmem:[#allocation9_spill] sm:$0xff] }
 0x671   : > { %10485 = vmatprep.subr.bf16.mxu1 %v7775_v63 }
 0x674   : > { %10486 = vmatpush3.bf16.msra.mxu1 %v7775_v63 }
 0x677   : > { %10440 = vmatmul.mubr.msk.bf16.gmra.mrb[28].mxu1 %vm4359_vm4, %v15510_v17  ;;  %v15770_v17 = vld [vmem:[#allocation4_spill] sm:$0xff] }
 0x678   : > { %10443 = vmatprep.mubr.msk.bf16.mxu1 %vm4359_vm4, %v15511_v31  ;;  %v15772_v31 = vld [vmem:[#allocation65_spill] sm:$0xff] }
 0x67f   : > { %10444 = vmatmul.mubr.msk.bf16.gmra.mrb[32].mxu1 %vm4359_vm4, %v15512_v58  ;;  %v15767_v58 = vld [vmem:[#allocation55_spill] sm:$0xff] }
 0x680   : > { %10447 = vmatprep.mubr.msk.bf16.mxu1 %vm4359_vm4, %v15513_v50  ;;  %v8211_v50 = vld [vmem:[%s14979_s5 + $0x8] sm:$0xff]  ;;  %v7479_v54 = vpack.c.bf16 %v4519_v14, %v15767_v58  ;;  %v7796_v14 = vrot.slane %v7794_v35, 1 }
 0x682   : > { %v7786_v36 = vshll.u32 %v7479_v54, 16  ;;  %v7790_v3 = vshrl.u32 %v7479_v54, 16 }
 0x684   : > { %v7788_v48 = vrot.slane %v7786_v36, 1 }
 0x686   : > { %v7792_v2 = vor.u32 %v7790_v3, %v7788_v48 }
 0x687   : > { %10448 = vmatmul.mubr.msk.bf16.gmra.mrb[36].mxu1 %vm4359_vm4, %v15514_v24  ;;  %v15771_v24 = vld [vmem:[#allocation64_spill] sm:$0xff] }
 0x688   : > { %10451 = vmatprep.mubr.msk.bf16.mxu1 %vm4359_vm4, %v13339_v27  ;;  %v8212_v27 = vld [vmem:[%s14979_s5 + $0x10] sm:$0xff]  ;;  %v7797_v5 = vsel %vm1248_vm3, %v7792_v2, %v7796_v14 }
 0x68f   : > { %10452 = vmatmul.mubr.msk.bf16.gmra.mrb[40].mxu1 %vm4359_vm4, %v13353_v44  ;;  %v8214_v44 = vpack.c.bf16 %v8211_v50, %v8210_v22 }
 0x690   : > { %10455 = vmatprep.mubr.msk.bf16.mxu1 %vm4359_vm4, %v13377_v28  ;;  %v8213_v28 = vld [vmem:[%s14979_s5 + $0x18] sm:$0xff] }
 0x691   : > { %10535 = vmatprep.subr.bf16.mxu0 %v8214_v44 }
 0x692   : > { %10536 = vmatpush3.bf16.msra.mxu0 %v8214_v44 }
 0x697   : > { %10456 = vmatmul.mubr.msk.bf16.gmra.mrb[44].mxu1 %vm4359_vm4, %v13391_v56  ;;  %v8215_v56 = vpack.c.bf16 %v8213_v28, %v8212_v27 }
 0x698   : > { %10459 = vmatprep.mubr.msk.bf16.mxu1 %vm4359_vm4, %v13403_v62  ;;  %v15762_v62 = vld [vmem:[#allocation33_spill] sm:$0xff] }
 0x699   : > { %10537 = vmatprep.subr.bf16.mxu0 %v8215_v56 }
 0x69a   : > { %10538 = vmatpush3.bf16.msra.mxu0 %v8215_v56 }
 0x69f   : > { %10460 = vmatmul.mubr.msk.bf16.gmra.mrb[48].mxu1 %vm4359_vm4, %v13417_v59  ;;  %v15763_v59 = vld [vmem:[#allocation3_spill] sm:$0xff] }
 0x6a0   : > { %10463 = vmatprep.mubr.msk.bf16.mxu1 %vm4359_vm4, %v13429_v39  ;;  %v15764_v39 = vld [vmem:[#allocation5_spill] sm:$0xff] }
 0x6a7   : > { %10464 = vmatmul.mubr.msk.bf16.gmra.mrb[52].mxu1 %vm4359_vm4, %v13443_v40  ;;  %v15765_v40 = vld [vmem:[#allocation54_spill] sm:$0xff] }
 0x6a8   : > { %10467 = vmatprep.mubr.msk.bf16.mxu1 %vm4359_vm4, %v13453_v61  ;;  %v15766_v61 = vld [vmem:[#allocation57_spill] sm:$0xff] }
 0x6a9   : > { %v7779_v19 = vshll.u32 %v15766_v61, 16  ;;  %v7783_v15 = vshrl.u32 %v15766_v61, 16 }
 0x6ab   : > { %v7781_v9 = vrot.slane %v7779_v19, 1 }
 0x6ad   : > { %v7785_v6 = vor.u32 %v7783_v15, %v7781_v9  ;;  %v7782_v4 = vsel %vm1248_vm3, %v15789_v47, %v7781_v9 }
 0x6af   : > { %10468 = vmatmul.mubr.msk.bf16.gmra.mrb[56].mxu1 %vm4359_vm4, %v13467_v60  ;;  %v15768_v60 = vld [vmem:[#allocation7_spill] sm:$0xff]  ;;  %v7789_v37 = vsel %vm1248_vm3, %v7785_v6, %v7788_v48 }
 0x6b0   : > { %10471 = vmatprep.mubr.msk.bf16.mxu1 %vm4359_vm4, %v15762_v62 }
 0x6b7   : > { %10472 = vmatmul.mubr.msk.bf16.gmra.mrb[60].mxu1 %vm4359_vm4, %v15763_v59 }
 0x6b8   : > { %10475 = vmatprep.mubr.msk.bf16.mxu1 %vm4359_vm4, %v15764_v39 }
 0x6bf   : > { %10476 = vmatmul.mubr.msk.bf16.gmra.mrb[64].mxu1 %vm4359_vm4, %v15765_v40 }
 0x6c0   : > { %10479 = vmatprep.mubr.msk.bf16.mxu1 %vm4359_vm4, %v15766_v61 }
 0x6c7   : > { %10480 = vmatmul.mubr.msk.bf16.gmra.mrb[68].mxu1 %vm4359_vm4, %v7479_v54 }
 0x6c8   : > { %10487 = vmatprep.mubr.msk.bf16.mxu1 %vm4359_vm4, %v15768_v60 }
 0x6cf   : > { %10488 = vmatmul.mubr.msk.bf16.vlgmr.msra.gmra.mrb[24].mxu1 %vm4359_vm4, %v15769_v25 }
 0x6d0   : > { %10491 = vmatprep.mubr.msk.bf16.mxu1 %vm4359_vm4, %v15770_v17 }
 0x6d7   : > { %10492 = vmatmul.mubr.msk.bf16.gmra.mrb[28].mxu1 %vm4359_vm4, %v15771_v24 }
 0x6d8   : > { %10495 = vmatprep.mubr.msk.bf16.mxu1 %vm4359_vm4, %v15772_v31 }
 0x6df   : > { %10496 = vmatmul.mubr.msk.bf16.gmra.mrb[32].mxu1 %vm4359_vm4, %v15773_v13 }
 0x6e0   : > { %10499 = vmatprep.mubr.msk.bf16.mxu1 %vm4359_vm4, %v15774_v29 }
 0x6e7   : > { %10500 = vmatmul.mubr.msk.bf16.gmra.mrb[36].mxu1 %vm4359_vm4, %v15775_v49 }
 0x6e8   : > { %10503 = vmatprep.mubr.msk.bf16.mxu1 %vm4359_vm4, %v15776_v41 }
 0x6ef   : > { %10504 = vmatmul.mubr.msk.bf16.gmra.mrb[40].mxu1 %vm4359_vm4, %v15777_v12 }
 0x6f0   : > { %10507 = vmatprep.mubr.msk.bf16.mxu1 %vm4359_vm4, %v15778_v52 }
 0x6f7   : > { %10508 = vmatmul.mubr.msk.bf16.gmra.mrb[44].mxu1 %vm4359_vm4, %v15779_v1 }
 0x6f8   : > { %10511 = vmatprep.mubr.msk.bf16.mxu1 %vm4359_vm4, %v15780_v45 }
 0x6ff   : > { %10512 = vmatmul.mubr.msk.bf16.gmra.mrb[48].mxu1 %vm4359_vm4, %v15781_v18 }
 0x700   : > { %10515 = vmatprep.mubr.msk.bf16.mxu1 %vm4359_vm4, %v15782_v20 }
 0x707   : > { %10516 = vmatmul.mubr.msk.bf16.gmra.mrb[52].mxu1 %vm4359_vm4, %v15783_v46 }
 0x708   : > { %10519 = vmatprep.mubr.msk.bf16.mxu1 %vm4359_vm4, %v15784_v0 }
 0x70f   : > { %10520 = vmatmul.mubr.msk.bf16.gmra.mrb[56].mxu1 %vm4359_vm4, %v15785_v32 }
 0x710   : > { %10523 = vmatprep.mubr.msk.bf16.mxu1 %vm4359_vm4, %v15786_v10 }
 0x717   : > { %10524 = vmatmul.mubr.msk.bf16.gmra.mrb[60].mxu1 %vm4359_vm4, %v15787_v11 }
 0x718   : > { %10527 = vmatprep.mubr.msk.bf16.mxu1 %vm4359_vm4, %v15788_v34 }
 0x71f   : > { %10528 = vmatmul.mubr.msk.bf16.gmra.mrb[64].mxu1 %vm4359_vm4, %v7782_v4 }
 0x720   : > { %10531 = vmatprep.mubr.msk.bf16.mxu1 %vm4359_vm4, %v7789_v37 }
 0x727   : > { %10532 = vmatmul.mubr.msk.bf16.gmra.mrb[68].mxu1 %vm4359_vm4, %v7797_v5 }
 0x7a2   : > { %v10489_v26 = vpop.f32.mrb[24].mxu1 }
 0x7a3   : > { %v8092_v55 = vadd.f32 %v10489_v26, %v14742_v53  ;;  %v7844_v38 = vpop.f32.mrb[25].mxu1 }
 0x7a4   : > { %v8090_v42 = vadd.f32 %v14742_v53, %v7844_v38  ;;  %v10490_v43 = vpop.f32.mrb[26].mxu1 }
 0x7a5   : > { %v8093_v51 = vadd.f32 %v10490_v43, %v14742_v53  ;;  %v7847_v16 = vpop.f32.mrb[27].mxu1  ;;  %v8140_v21 = vmax.f32 %v8092_v55, 0.0 }
 0x7a6   : > { %v8091_v33 = vadd.f32 %v14742_v53, %v7847_v16  ;;  %v8138_v7 = vmax.f32 %v8090_v42, 0.0 }
 0x7a7   : > { %v8141_v8 = vmax.f32 %v8093_v51, 0.0 }
 0x7a8   : > { %v8139_v30 = vmax.f32 %v8091_v33, 0.0 }
 0x7a9   : > { %v8187_v63 = vpack.c.bf16 %v8141_v8, %v8140_v21 }
 0x7aa   : > { %v8186_v22 = vpack.c.bf16 %v8139_v30, %v8138_v7  ;;  %v10493_v50 = vpop.f32.mrb[28].mxu1 }
 0x7ab   : > { %v8096_v27 = vadd.f32 %v10493_v50, %v14742_v53  ;;  %v7860_v44 = vpop.f32.mrb[29].mxu1 }
 0x7ac   : > { %v8094_v28 = vadd.f32 %v14742_v53, %v7860_v44  ;;  %v10494_v56 = vpop.f32.mrb[30].mxu1  ;;  %10539 = vmatprep.mubr.msk.bf16.mxu0 %vm4359_vm4, %v8186_v22 }
 0x7ad   : > { %v8097_v62 = vadd.f32 %v10494_v56, %v14742_v53  ;;  %v7863_v59 = vpop.f32.mrb[31].mxu1  ;;  %10540 = vmatmul.mubr.msk.bf16.vlgmr.msra.gmra.mrb[48].mxu0 %vm4359_vm4, %v8187_v63  ;;  %v8144_v40 = vmax.f32 %v8096_v27, 0.0 }
 0x7ae   : > { %v8095_v39 = vadd.f32 %v14742_v53, %v7863_v59  ;;  %v8142_v58 = vmax.f32 %v8094_v28, 0.0 }
 0x7af   : > { %v8145_v61 = vmax.f32 %v8097_v62, 0.0 }
 0x7b0   : > { %v8143_v54 = vmax.f32 %v8095_v39, 0.0 }
 0x7b1   : > { %v8189_v60 = vpack.c.bf16 %v8145_v61, %v8144_v40 }
 0x7b2   : > { %v8188_v25 = vpack.c.bf16 %v8143_v54, %v8142_v58  ;;  %v10497_v17 = vpop.f32.mrb[32].mxu1 }
 0x7b3   : > { %v8100_v24 = vadd.f32 %v10497_v17, %v14742_v53  ;;  %v7876_v31 = vpop.f32.mrb[33].mxu1 }
 0x7b4   : > { %v8098_v13 = vadd.f32 %v14742_v53, %v7876_v31  ;;  %v10498_v29 = vpop.f32.mrb[34].mxu1  ;;  %10543 = vmatprep.mubr.msk.bf16.mxu0 %vm4359_vm4, %v8188_v25 }
 0x7b5   : > { %v8101_v49 = vadd.f32 %v10498_v29, %v14742_v53  ;;  %v7879_v41 = vpop.f32.mrb[35].mxu1  ;;  %10544 = vmatmul.mubr.msk.bf16.gmra.mrb[52].mxu0 %vm4359_vm4, %v8189_v60  ;;  %v8148_v52 = vmax.f32 %v8100_v24, 0.0 }
 0x7b6   : > { %v8099_v12 = vadd.f32 %v14742_v53, %v7879_v41  ;;  %v8146_v45 = vmax.f32 %v8098_v13, 0.0 }
 0x7b7   : > { %v8149_v1 = vmax.f32 %v8101_v49, 0.0 }
 0x7b8   : > { %v8147_v18 = vmax.f32 %v8099_v12, 0.0 }
 0x7b9   : > { %v8191_v20 = vpack.c.bf16 %v8149_v1, %v8148_v52 }
 0x7ba   : > { %v8190_v46 = vpack.c.bf16 %v8147_v18, %v8146_v45  ;;  %v10501_v0 = vpop.f32.mrb[36].mxu1 }
 0x7bb   : > { %v8104_v32 = vadd.f32 %v10501_v0, %v14742_v53  ;;  %v7892_v10 = vpop.f32.mrb[37].mxu1 }
 0x7bc   : > { %v8102_v19 = vadd.f32 %v14742_v53, %v7892_v10  ;;  %v10502_v57 = vpop.f32.mrb[38].mxu1  ;;  %10547 = vmatprep.mubr.msk.bf16.mxu0 %vm4359_vm4, %v8190_v46 }
 0x7bd   : > { %v8105_v11 = vadd.f32 %v10502_v57, %v14742_v53  ;;  %v7895_v9 = vpop.f32.mrb[39].mxu1  ;;  %10548 = vmatmul.mubr.msk.bf16.gmra.mrb[56].mxu0 %vm4359_vm4, %v8191_v20  ;;  %v8152_v34 = vmax.f32 %v8104_v32, 0.0 }
 0x7be   : > { %v8103_v36 = vadd.f32 %v14742_v53, %v7895_v9  ;;  %v8150_v15 = vmax.f32 %v8102_v19, 0.0 }
 0x7bf   : > { %v8153_v23 = vmax.f32 %v8105_v11, 0.0 }
 0x7c0   : > { %v8151_v6 = vmax.f32 %v8103_v36, 0.0 }
 0x7c1   : > { %v8193_v48 = vpack.c.bf16 %v8153_v23, %v8152_v34 }
 0x7c2   : > { %v8192_v3 = vpack.c.bf16 %v8151_v6, %v8150_v15  ;;  %v10505_v35 = vpop.f32.mrb[40].mxu1 }
 0x7c3   : > { %v8108_v47 = vadd.f32 %v10505_v35, %v14742_v53  ;;  %v7908_v4 = vpop.f32.mrb[41].mxu1 }
 0x7c4   : > { %v8106_v37 = vadd.f32 %v14742_v53, %v7908_v4  ;;  %v10506_v2 = vpop.f32.mrb[42].mxu1  ;;  %10551 = vmatprep.mubr.msk.bf16.mxu0 %vm4359_vm4, %v8192_v3 }
 0x7c5   : > { %v8109_v14 = vadd.f32 %v10506_v2, %v14742_v53  ;;  %v7911_v5 = vpop.f32.mrb[43].mxu1  ;;  %10552 = vmatmul.mubr.msk.bf16.gmra.mrb[60].mxu0 %vm4359_vm4, %v8193_v48  ;;  %v8156_v55 = vmax.f32 %v8108_v47, 0.0 }
 0x7c6   : > { %v8107_v26 = vadd.f32 %v14742_v53, %v7911_v5  ;;  %v8154_v42 = vmax.f32 %v8106_v37, 0.0 }
 0x7c7   : > { %v8157_v38 = vmax.f32 %v8109_v14, 0.0 }
 0x7c8   : > { %v8155_v43 = vmax.f32 %v8107_v26, 0.0 }
 0x7c9   : > { %v8195_v51 = vpack.c.bf16 %v8157_v38, %v8156_v55 }
 0x7ca   : > { %v8194_v16 = vpack.c.bf16 %v8155_v43, %v8154_v42  ;;  %v10509_v33 = vpop.f32.mrb[44].mxu1 }
 0x7cb   : > { %v8112_v21 = vadd.f32 %v10509_v33, %v14742_v53  ;;  %v7924_v8 = vpop.f32.mrb[45].mxu1 }
 0x7cc   : > { %v8110_v7 = vadd.f32 %v14742_v53, %v7924_v8  ;;  %v10510_v30 = vpop.f32.mrb[46].mxu1  ;;  %10555 = vmatprep.mubr.msk.bf16.mxu0 %vm4359_vm4, %v8194_v16 }
 0x7cd   : > { %v8113_v63 = vadd.f32 %v10510_v30, %v14742_v53  ;;  %v7927_v22 = vpop.f32.mrb[47].mxu1  ;;  %10556 = vmatmul.mubr.msk.bf16.gmra.mrb[64].mxu0 %vm4359_vm4, %v8195_v51  ;;  %v8160_v27 = vmax.f32 %v8112_v21, 0.0 }
 0x7ce   : > { %v8111_v50 = vadd.f32 %v14742_v53, %v7927_v22  ;;  %v8158_v28 = vmax.f32 %v8110_v7, 0.0 }
 0x7cf   : > { %v8161_v44 = vmax.f32 %v8113_v63, 0.0 }
 0x7d0   : > { %v8159_v56 = vmax.f32 %v8111_v50, 0.0 }
 0x7d1   : > { %v8197_v62 = vpack.c.bf16 %v8161_v44, %v8160_v27 }
 0x7d2   : > { %v8196_v59 = vpack.c.bf16 %v8159_v56, %v8158_v28  ;;  %v10513_v39 = vpop.f32.mrb[48].mxu1 }
 0x7d3   : > { %v8116_v40 = vadd.f32 %v10513_v39, %v14742_v53  ;;  %v7940_v61 = vpop.f32.mrb[49].mxu1 }
 0x7d4   : > { %v8114_v58 = vadd.f32 %v14742_v53, %v7940_v61  ;;  %v10514_v54 = vpop.f32.mrb[50].mxu1  ;;  %10559 = vmatprep.mubr.msk.bf16.mxu0 %vm4359_vm4, %v8196_v59 }
 0x7d5   : > { %v8117_v60 = vadd.f32 %v10514_v54, %v14742_v53  ;;  %v7943_v25 = vpop.f32.mrb[51].mxu1  ;;  %10560 = vmatmul.mubr.msk.bf16.gmra.mrb[68].mxu0 %vm4359_vm4, %v8197_v62  ;;  %v8164_v24 = vmax.f32 %v8116_v40, 0.0 }
 0x7d6   : > { %v8115_v17 = vadd.f32 %v14742_v53, %v7943_v25  ;;  %v8162_v13 = vmax.f32 %v8114_v58, 0.0 }
 0x7d7   : > { %v8165_v31 = vmax.f32 %v8117_v60, 0.0 }
 0x7d8   : > { %v8163_v29 = vmax.f32 %v8115_v17, 0.0 }
 0x7d9   : > { %v8199_v49 = vpack.c.bf16 %v8165_v31, %v8164_v24 }
 0x7da   : > { %v8198_v41 = vpack.c.bf16 %v8163_v29, %v8162_v13  ;;  %v10517_v12 = vpop.f32.mrb[52].mxu1 }
 0x7db   : > { %v8120_v52 = vadd.f32 %v10517_v12, %v14742_v53  ;;  %v7956_v1 = vpop.f32.mrb[53].mxu1 }
 0x7dc   : > { %v8118_v45 = vadd.f32 %v14742_v53, %v7956_v1  ;;  %v10518_v18 = vpop.f32.mrb[54].mxu1  ;;  %10563 = vmatprep.mubr.msk.bf16.mxu0 %vm4359_vm4, %v8198_v41 }
 0x7dd   : > { %v8121_v20 = vadd.f32 %v10518_v18, %v14742_v53  ;;  %v7959_v46 = vpop.f32.mrb[55].mxu1  ;;  %10564 = vmatmul.mubr.msk.bf16.gmra.mrb[72].mxu0 %vm4359_vm4, %v8199_v49  ;;  %v8168_v32 = vmax.f32 %v8120_v52, 0.0 }
 0x7de   : > { %v8119_v0 = vadd.f32 %v14742_v53, %v7959_v46  ;;  %v8166_v19 = vmax.f32 %v8118_v45, 0.0 }
 0x7df   : > { %v8169_v10 = vmax.f32 %v8121_v20, 0.0 }
 0x7e0   : > { %v8167_v57 = vmax.f32 %v8119_v0, 0.0  ;;  %v14820_v0 = vld [vmem:[%s14980_s6] ss:$0 sm:$0xff] }
 0x7e1   : > { %v8201_v11 = vpack.c.bf16 %v8169_v10, %v8168_v32 }
 0x7e2   : > { %v8200_v9 = vpack.c.bf16 %v8167_v57, %v8166_v19  ;;  %v10521_v36 = vpop.f32.mrb[56].mxu1 }
 0x7e3   : > { %v8124_v34 = vadd.f32 %v10521_v36, %v14742_v53  ;;  %v7972_v23 = vpop.f32.mrb[57].mxu1 }
 0x7e4   : > { %v8122_v15 = vadd.f32 %v14742_v53, %v7972_v23  ;;  %v10522_v6 = vpop.f32.mrb[58].mxu1  ;;  %10567 = vmatprep.mubr.msk.bf16.mxu0 %vm4359_vm4, %v8200_v9 }
 0x7e5   : > { %v8125_v48 = vadd.f32 %v10522_v6, %v14742_v53  ;;  %v7975_v3 = vpop.f32.mrb[59].mxu1  ;;  %10568 = vmatmul.mubr.msk.bf16.gmra.mrb[76].mxu0 %vm4359_vm4, %v8201_v11  ;;  %v8172_v47 = vmax.f32 %v8124_v34, 0.0 }
 0x7e6   : > { %v8123_v35 = vadd.f32 %v14742_v53, %v7975_v3  ;;  %v8170_v37 = vmax.f32 %v8122_v15, 0.0 }
 0x7e7   : > { %v8173_v4 = vmax.f32 %v8125_v48, 0.0 }
 0x7e8   : > { %v8171_v2 = vmax.f32 %v8123_v35, 0.0 }
 0x7e9   : > { %v8203_v14 = vpack.c.bf16 %v8173_v4, %v8172_v47 }
 0x7ea   : > { %v8202_v5 = vpack.c.bf16 %v8171_v2, %v8170_v37  ;;  %v10525_v26 = vpop.f32.mrb[60].mxu1 }
 0x7eb   : > { %v8128_v55 = vadd.f32 %v10525_v26, %v14742_v53  ;;  %v7988_v38 = vpop.f32.mrb[61].mxu1 }
 0x7ec   : > { %v8126_v42 = vadd.f32 %v14742_v53, %v7988_v38  ;;  %v10526_v43 = vpop.f32.mrb[62].mxu1  ;;  %10571 = vmatprep.mubr.msk.bf16.mxu0 %vm4359_vm4, %v8202_v5 }
 0x7ed   : > { %v8129_v51 = vadd.f32 %v10526_v43, %v14742_v53  ;;  %v7991_v16 = vpop.f32.mrb[63].mxu1  ;;  %10572 = vmatmul.mubr.msk.bf16.gmra.mrb[80].mxu0 %vm4359_vm4, %v8203_v14  ;;  %v8176_v21 = vmax.f32 %v8128_v55, 0.0 }
 0x7ee   : > { %v8127_v33 = vadd.f32 %v14742_v53, %v7991_v16  ;;  %v8174_v7 = vmax.f32 %v8126_v42, 0.0 }
 0x7ef   : > { %v8177_v8 = vmax.f32 %v8129_v51, 0.0 }
 0x7f0   : > { %v8175_v30 = vmax.f32 %v8127_v33, 0.0 }
 0x7f1   : > { %v8205_v63 = vpack.c.bf16 %v8177_v8, %v8176_v21 }
 0x7f2   : > { %v8204_v22 = vpack.c.bf16 %v8175_v30, %v8174_v7  ;;  %v10529_v50 = vpop.f32.mrb[64].mxu1 }
 0x7f3   : > { %v8132_v27 = vadd.f32 %v10529_v50, %v14742_v53  ;;  %v8004_v44 = vpop.f32.mrb[65].mxu1 }
 0x7f4   : > { %v8130_v28 = vadd.f32 %v14742_v53, %v8004_v44  ;;  %v10530_v56 = vpop.f32.mrb[66].mxu1  ;;  %10575 = vmatprep.mubr.msk.bf16.mxu0 %vm4359_vm4, %v8204_v22 }
 0x7f5   : > { %v8133_v62 = vadd.f32 %v10530_v56, %v14742_v53  ;;  %v8007_v59 = vpop.f32.mrb[67].mxu1  ;;  %10576 = vmatmul.mubr.msk.bf16.gmra.mrb[84].mxu0 %vm4359_vm4, %v8205_v63  ;;  %v8180_v40 = vmax.f32 %v8132_v27, 0.0 }
 0x7f6   : > { %v8131_v39 = vadd.f32 %v14742_v53, %v8007_v59  ;;  %v8178_v58 = vmax.f32 %v8130_v28, 0.0 }
 0x7f7   : > { %v8181_v61 = vmax.f32 %v8133_v62, 0.0 }
 0x7f8   : > { %v8179_v54 = vmax.f32 %v8131_v39, 0.0 }
 0x7f9   : > { %v8207_v60 = vpack.c.bf16 %v8181_v61, %v8180_v40 }
 0x7fa   : > { %v8206_v25 = vpack.c.bf16 %v8179_v54, %v8178_v58  ;;  %v10533_v17 = vpop.f32.mrb[68].mxu1 }
 0x7fb   : > { %v8136_v24 = vadd.f32 %v10533_v17, %v14742_v53  ;;  %v8020_v31 = vpop.f32.mrb[69].mxu1 }
 0x7fc   : > { %v8134_v13 = vadd.f32 %v14742_v53, %v8020_v31  ;;  %v10534_v29 = vpop.f32.mrb[70].mxu1  ;;  %10579 = vmatprep.mubr.msk.bf16.mxu0 %vm4359_vm4, %v8206_v25 }
 0x7fd   : > { %v8137_v49 = vadd.f32 %v10534_v29, %v14742_v53  ;;  %v8023_v41 = vpop.f32.mrb[71].mxu1  ;;  %10580 = vmatmul.mubr.msk.bf16.gmra.mrb[88].mxu0 %vm4359_vm4, %v8207_v60  ;;  %v8184_v52 = vmax.f32 %v8136_v24, 0.0 }
 0x7fe   : > { %v8135_v12 = vadd.f32 %v14742_v53, %v8023_v41  ;;  %v8182_v45 = vmax.f32 %v8134_v13, 0.0 }
 0x7ff   : > { %v8185_v1 = vmax.f32 %v8137_v49, 0.0 }
 0x800   : > { %v8183_v18 = vmax.f32 %v8135_v12, 0.0 }
 0x801   : > { %v8209_v20 = vpack.c.bf16 %v8185_v1, %v8184_v52 }
 0x802   : > { %v8208_v46 = vpack.c.bf16 %v8183_v18, %v8182_v45 }
 0x804   : > { %10583 = vmatprep.mubr.msk.bf16.mxu0 %vm4359_vm4, %v8208_v46 }
 0x805   : > { %10584 = vmatmul.mubr.msk.bf16.gmra.mrb[92].mxu0 %vm4359_vm4, %v8209_v20 }
 0x880   : > { %v10541_v53 = vpop.f32.mrb[48].mxu0 }
 0x881   : > { %v8338_v32 = vadd.f32 %v10541_v53, %v14820_v0  ;;  %v8329_v10 = vpop.f32.mrb[49].mxu0 }
 0x882   : > { %v8330_v19 = vadd.f32 %v14820_v0, %v8329_v10  ;;  %v10542_v57 = vpop.f32.mrb[50].mxu0 }
 0x883   : > { %8523 = vst.msk [vmem:[%s14825_s19 + $0x10] sm:$0xff] %vm8520_vm5, %v8338_v32  ;;  %v8341_v11 = vadd.f32 %v10542_v57, %v14820_v0  ;;  %v8332_v9 = vpop.f32.mrb[51].mxu0 }
 0x884   : > { %8521 = vst.msk [vmem:[%s14825_s19] sm:$0xff] %vm8520_vm5, %v8330_v19  ;;  %v8333_v36 = vadd.f32 %v14820_v0, %v8332_v9 }
 0x885   : > { %8524 = vst.msk [vmem:[%s14825_s19 + $0x18] sm:$0xff] %vm8520_vm5, %v8341_v11 }
 0x886   : > { %8522 = vst.msk [vmem:[%s14825_s19 + $0x8] sm:$0xff] %vm8520_vm5, %v8333_v36 }
 0x888   : > { %v10545_v34 = vpop.f32.mrb[52].mxu0 }
 0x889   : > { %v8354_v23 = vadd.f32 %v10545_v34, %v14820_v0  ;;  %v8345_v15 = vpop.f32.mrb[53].mxu0 }
 0x88a   : > { %v8346_v6 = vadd.f32 %v14820_v0, %v8345_v15  ;;  %v10546_v48 = vpop.f32.mrb[54].mxu0 }
 0x88b   : > { %8527 = vst.msk [vmem:[%s14825_s19 + $0x30] sm:$0xff] %vm8520_vm5, %v8354_v23  ;;  %v8357_v3 = vadd.f32 %v10546_v48, %v14820_v0  ;;  %v8348_v35 = vpop.f32.mrb[55].mxu0 }
 0x88c   : > { %8525 = vst.msk [vmem:[%s14825_s19 + $0x20] sm:$0xff] %vm8520_vm5, %v8346_v6  ;;  %v8349_v47 = vadd.f32 %v14820_v0, %v8348_v35 }
 0x88d   : > { %8528 = vst.msk [vmem:[%s14825_s19 + $0x38] sm:$0xff] %vm8520_vm5, %v8357_v3 }
 0x88e   : > { %8526 = vst.msk [vmem:[%s14825_s19 + $0x28] sm:$0xff] %vm8520_vm5, %v8349_v47 }
 0x890   : > { %v10549_v4 = vpop.f32.mrb[56].mxu0 }
 0x891   : > { %v8370_v37 = vadd.f32 %v10549_v4, %v14820_v0  ;;  %v8361_v2 = vpop.f32.mrb[57].mxu0 }
 0x892   : > { %v8362_v14 = vadd.f32 %v14820_v0, %v8361_v2  ;;  %v10550_v5 = vpop.f32.mrb[58].mxu0 }
 0x893   : > { %8531 = vst.msk [vmem:[%s14825_s19 + $0x50] sm:$0xff] %vm8520_vm5, %v8370_v37  ;;  %v8373_v26 = vadd.f32 %v10550_v5, %v14820_v0  ;;  %v8364_v55 = vpop.f32.mrb[59].mxu0 }
 0x894   : > { %8529 = vst.msk [vmem:[%s14825_s19 + $0x40] sm:$0xff] %vm8520_vm5, %v8362_v14  ;;  %v8365_v38 = vadd.f32 %v14820_v0, %v8364_v55 }
 0x895   : > { %8532 = vst.msk [vmem:[%s14825_s19 + $0x58] sm:$0xff] %vm8520_vm5, %v8373_v26 }
 0x896   : > { %8530 = vst.msk [vmem:[%s14825_s19 + $0x48] sm:$0xff] %vm8520_vm5, %v8365_v38 }
 0x898   : > { %v10553_v42 = vpop.f32.mrb[60].mxu0 }
 0x899   : > { %v8386_v43 = vadd.f32 %v10553_v42, %v14820_v0  ;;  %v8377_v51 = vpop.f32.mrb[61].mxu0 }
 0x89a   : > { %v8378_v16 = vadd.f32 %v14820_v0, %v8377_v51  ;;  %v10554_v33 = vpop.f32.mrb[62].mxu0 }
 0x89b   : > { %8535 = vst.msk [vmem:[%s14825_s19 + $0x70] sm:$0xff] %vm8520_vm5, %v8386_v43  ;;  %v8389_v21 = vadd.f32 %v10554_v33, %v14820_v0  ;;  %v8380_v8 = vpop.f32.mrb[63].mxu0 }
 0x89c   : > { %8533 = vst.msk [vmem:[%s14825_s19 + $0x60] sm:$0xff] %vm8520_vm5, %v8378_v16  ;;  %v8381_v7 = vadd.f32 %v14820_v0, %v8380_v8 }
 0x89d   : > { %8536 = vst.msk [vmem:[%s14825_s19 + $0x78] sm:$0xff] %vm8520_vm5, %v8389_v21 }
 0x89e   : > { %8534 = vst.msk [vmem:[%s14825_s19 + $0x68] sm:$0xff] %vm8520_vm5, %v8381_v7 }
 0x8a0   : > { %v10557_v30 = vpop.f32.mrb[64].mxu0 }
 0x8a1   : > { %v8402_v63 = vadd.f32 %v10557_v30, %v14820_v0  ;;  %v8393_v22 = vpop.f32.mrb[65].mxu0 }
 0x8a2   : > { %v8394_v50 = vadd.f32 %v14820_v0, %v8393_v22  ;;  %v10558_v27 = vpop.f32.mrb[66].mxu0 }
 0x8a3   : > { %8539 = vst.msk [vmem:[%s14825_s19 + $0x90] sm:$0xff] %vm8520_vm5, %v8402_v63  ;;  %v8405_v44 = vadd.f32 %v10558_v27, %v14820_v0  ;;  %v8396_v28 = vpop.f32.mrb[67].mxu0 }
 0x8a4   : > { %8537 = vst.msk [vmem:[%s14825_s19 + $0x80] sm:$0xff] %vm8520_vm5, %v8394_v50  ;;  %v8397_v56 = vadd.f32 %v14820_v0, %v8396_v28 }
 0x8a5   : > { %8540 = vst.msk [vmem:[%s14825_s19 + $0x98] sm:$0xff] %vm8520_vm5, %v8405_v44 }
 0x8a6   : > { %8538 = vst.msk [vmem:[%s14825_s19 + $0x88] sm:$0xff] %vm8520_vm5, %v8397_v56 }
 0x8a8   : > { %v10561_v62 = vpop.f32.mrb[68].mxu0 }
 0x8a9   : > { %v8418_v59 = vadd.f32 %v10561_v62, %v14820_v0  ;;  %v8409_v39 = vpop.f32.mrb[69].mxu0 }
 0x8aa   : > { %v8410_v40 = vadd.f32 %v14820_v0, %v8409_v39  ;;  %v10562_v61 = vpop.f32.mrb[70].mxu0 }
 0x8ab   : > { %8543 = vst.msk [vmem:[%s14825_s19 + $0xb0] sm:$0xff] %vm8520_vm5, %v8418_v59  ;;  %v8421_v58 = vadd.f32 %v10562_v61, %v14820_v0  ;;  %v8412_v54 = vpop.f32.mrb[71].mxu0 }
 0x8ac   : > { %8541 = vst.msk [vmem:[%s14825_s19 + $0xa0] sm:$0xff] %vm8520_vm5, %v8410_v40  ;;  %v8413_v60 = vadd.f32 %v14820_v0, %v8412_v54 }
 0x8ad   : > { %8544 = vst.msk [vmem:[%s14825_s19 + $0xb8] sm:$0xff] %vm8520_vm5, %v8421_v58 }
 0x8ae   : > { %8542 = vst.msk [vmem:[%s14825_s19 + $0xa8] sm:$0xff] %vm8520_vm5, %v8413_v60 }
 0x8b0   : > { %v10565_v25 = vpop.f32.mrb[72].mxu0 }
 0x8b1   : > { %v8434_v17 = vadd.f32 %v10565_v25, %v14820_v0  ;;  %v8425_v24 = vpop.f32.mrb[73].mxu0 }
 0x8b2   : > { %v8426_v31 = vadd.f32 %v14820_v0, %v8425_v24  ;;  %v10566_v13 = vpop.f32.mrb[74].mxu0 }
 0x8b3   : > { %8547 = vst.msk [vmem:[%s14825_s19 + $0xd0] sm:$0xff] %vm8520_vm5, %v8434_v17  ;;  %v8437_v29 = vadd.f32 %v10566_v13, %v14820_v0  ;;  %v8428_v49 = vpop.f32.mrb[75].mxu0 }
 0x8b4   : > { %8545 = vst.msk [vmem:[%s14825_s19 + $0xc0] sm:$0xff] %vm8520_vm5, %v8426_v31  ;;  %v8429_v41 = vadd.f32 %v14820_v0, %v8428_v49 }
 0x8b5   : > { %8548 = vst.msk [vmem:[%s14825_s19 + $0xd8] sm:$0xff] %vm8520_vm5, %v8437_v29 }
 0x8b6   : > { %8546 = vst.msk [vmem:[%s14825_s19 + $0xc8] sm:$0xff] %vm8520_vm5, %v8429_v41 }
 0x8b8   : > { %v10569_v12 = vpop.f32.mrb[76].mxu0 }
 0x8b9   : > { %v8450_v52 = vadd.f32 %v10569_v12, %v14820_v0  ;;  %v8441_v1 = vpop.f32.mrb[77].mxu0 }
 0x8ba   : > { %v8442_v45 = vadd.f32 %v14820_v0, %v8441_v1  ;;  %v10570_v18 = vpop.f32.mrb[78].mxu0 }
 0x8bb   : > { %8551 = vst.msk [vmem:[%s14825_s19 + $0xf0] sm:$0xff] %vm8520_vm5, %v8450_v52  ;;  %v8453_v20 = vadd.f32 %v10570_v18, %v14820_v0  ;;  %v8444_v46 = vpop.f32.mrb[79].mxu0 }
 0x8bc   : > { %8549 = vst.msk [vmem:[%s14825_s19 + $0xe0] sm:$0xff] %vm8520_vm5, %v8442_v45  ;;  %v8445_v53 = vadd.f32 %v14820_v0, %v8444_v46 }
 0x8bd   : > { %8552 = vst.msk [vmem:[%s14825_s19 + $0xf8] sm:$0xff] %vm8520_vm5, %v8453_v20 }
 0x8be   : > { %8550 = vst.msk [vmem:[%s14825_s19 + $0xe8] sm:$0xff] %vm8520_vm5, %v8445_v53 }
 0x8c0   : > { %v10573_v32 = vpop.f32.mrb[80].mxu0 }
 0x8c1   : > { %v8466_v10 = vadd.f32 %v10573_v32, %v14820_v0  ;;  %v8457_v19 = vpop.f32.mrb[81].mxu0 }
 0x8c2   : > { %v8458_v57 = vadd.f32 %v14820_v0, %v8457_v19  ;;  %v10574_v11 = vpop.f32.mrb[82].mxu0 }
 0x8c3   : > { %8555 = vst.msk [vmem:[%s14825_s19 + $0x110] sm:$0xff] %vm8520_vm5, %v8466_v10  ;;  %v8469_v9 = vadd.f32 %v10574_v11, %v14820_v0  ;;  %v8460_v36 = vpop.f32.mrb[83].mxu0 }
 0x8c4   : > { %8553 = vst.msk [vmem:[%s14825_s19 + $0x100] sm:$0xff] %vm8520_vm5, %v8458_v57  ;;  %v8461_v34 = vadd.f32 %v14820_v0, %v8460_v36 }
 0x8c5   : > { %8556 = vst.msk [vmem:[%s14825_s19 + $0x118] sm:$0xff] %vm8520_vm5, %v8469_v9 }
 0x8c6   : > { %8554 = vst.msk [vmem:[%s14825_s19 + $0x108] sm:$0xff] %vm8520_vm5, %v8461_v34 }
 0x8c8   : > { %v10577_v23 = vpop.f32.mrb[84].mxu0 }
 0x8c9   : > { %v8482_v15 = vadd.f32 %v10577_v23, %v14820_v0  ;;  %v8473_v6 = vpop.f32.mrb[85].mxu0 }
 0x8ca   : > { %v8474_v48 = vadd.f32 %v14820_v0, %v8473_v6  ;;  %v10578_v3 = vpop.f32.mrb[86].mxu0 }
 0x8cb   : > { %8559 = vst.msk [vmem:[%s14825_s19 + $0x130] sm:$0xff] %vm8520_vm5, %v8482_v15  ;;  %v8485_v35 = vadd.f32 %v10578_v3, %v14820_v0  ;;  %v8476_v47 = vpop.f32.mrb[87].mxu0 }
 0x8cc   : > { %8557 = vst.msk [vmem:[%s14825_s19 + $0x120] sm:$0xff] %vm8520_vm5, %v8474_v48  ;;  %v8477_v4 = vadd.f32 %v14820_v0, %v8476_v47 }
 0x8cd   : > { %8560 = vst.msk [vmem:[%s14825_s19 + $0x138] sm:$0xff] %vm8520_vm5, %v8485_v35 }
 0x8ce   : > { %8558 = vst.msk [vmem:[%s14825_s19 + $0x128] sm:$0xff] %vm8520_vm5, %v8477_v4 }
 0x8d0   : > { %v10581_v37 = vpop.f32.mrb[88].mxu0 }
 0x8d1   : > { %v8498_v2 = vadd.f32 %v10581_v37, %v14820_v0  ;;  %v8489_v14 = vpop.f32.mrb[89].mxu0 }
 0x8d2   : > { %v8490_v5 = vadd.f32 %v14820_v0, %v8489_v14  ;;  %v10582_v26 = vpop.f32.mrb[90].mxu0 }
 0x8d3   : > { %8563 = vst.msk [vmem:[%s14825_s19 + $0x150] sm:$0xff] %vm8520_vm5, %v8498_v2  ;;  %v8501_v55 = vadd.f32 %v10582_v26, %v14820_v0  ;;  %v8492_v38 = vpop.f32.mrb[91].mxu0 }
 0x8d4   : > { %8561 = vst.msk [vmem:[%s14825_s19 + $0x140] sm:$0xff] %vm8520_vm5, %v8490_v5  ;;  %v8493_v42 = vadd.f32 %v14820_v0, %v8492_v38 }
 0x8d5   : > { %8564 = vst.msk [vmem:[%s14825_s19 + $0x158] sm:$0xff] %vm8520_vm5, %v8501_v55 }
 0x8d6   : > { %8562 = vst.msk [vmem:[%s14825_s19 + $0x148] sm:$0xff] %vm8520_vm5, %v8493_v42 }
 0x8d8   : > { %v10585_v43 = vpop.f32.mrb[92].mxu0 }
 0x8d9   : > { %v8514_v51 = vadd.f32 %v10585_v43, %v14820_v0  ;;  %v8505_v16 = vpop.f32.mrb[93].mxu0 }
 0x8da   : > { %v8506_v33 = vadd.f32 %v14820_v0, %v8505_v16  ;;  %v10586_v21 = vpop.f32.mrb[94].mxu0 }
 0x8db   : > { %8567 = vst.msk [vmem:[%s14825_s19 + $0x170] sm:$0xff] %vm8520_vm5, %v8514_v51  ;;  %v8517_v8 = vadd.f32 %v10586_v21, %v14820_v0  ;;  %v8508_v7 = vpop.f32.mrb[95].mxu0 }
 0x8dc   : > { %8565 = vst.msk [vmem:[%s14825_s19 + $0x160] sm:$0xff] %vm8520_vm5, %v8506_v33  ;;  %v8509_v30 = vadd.f32 %v14820_v0, %v8508_v7 }
 0x8dd   : > { %8568 = vst.msk [vmem:[%s14825_s19 + $0x178] sm:$0xff] %vm8520_vm5, %v8517_v8 }
 0x8de   : > { %8566 = vst.msk [vmem:[%s14825_s19 + $0x168] sm:$0xff] %vm8520_vm5, %v8509_v30 }
 0x8df PF: > { %s18_s27 = sadd.s32 1, %s11387_s27  }
 0x8e0   : > { %p15_p4 = scmp.ge.s32.totalorder %s18_s27, 4  }
 0x8e2   :  { %17 = sbr.rel (!%p15_p4) target bundleno = 1 (0x1), region = 98 }

</bundles_post_ra>
